<compile_context>
chip_gen: v6e
topology: v6e:2x2x1
jax: 0.10.0
libtpu: 0.0.40
codegen_flags: <defaults>
</compile_context>

<pallas_src>
import functools
import math
from types import SimpleNamespace

import numpy as np
import jax
import jax.numpy as jnp
from jax.experimental import pallas as pl
from jax.experimental.pallas import tpu as pltpu


# ----------------------------------------------------------------------------
# Fused kernel
# ----------------------------------------------------------------------------
def _fused_kernel(p1_ref, sel_ref, wblk_ref, blk784_ref, f2w_ref,
                  out_ref, attn_ref, upd_ref, cpt_sc,
                  *, batch, n_cpt, offs, offs784, iters, eps, use_agg_fc1,
                  deactivate, n1, pb, n_pos, pos_pad, taps, c1, d_hid,
                  rec_w, cpt_off, pred_off, n_cls):
    f32 = jnp.float32

    def blk(name, ref=wblk_ref, table=offs):
        start, r, c = table[name]
        return ref[start:start + r, 0:c].astype(f32)

    # Small packed parameters (loaded once; static 8-aligned row offsets).
    w1 = blk("w1")
    b1 = blk("b1")
    w2 = blk("w2")
    b2 = blk("b2")
    pe = blk("pe")
    kw = blk("kw")
    kb = blk("kb")
    qwb = blk("qwb")            # (d_hid + 1, d_hid); dot_scale already folded in
    slots0 = blk("slots0")

    # conv2 0/1 selectors: stored bf16 in HBM (exact for {0,1}); gather matmul stays f32.
    sel = sel_ref[...].astype(f32)                                    # (taps*pos_pad, n1)

    # ---- conv1 + ReLU for the whole batch in ONE matmul ------------------------------
    h1_all = jnp.maximum(
        jnp.dot(p1_ref[...], w1, preferred_element_type=f32) + b1, 0.0)   # (B*pb, c1)

    for b in range(batch):   # static unroll; B is tiny.
        # TODO(synk): for large B move batch onto a leading "parallel" grid axis instead.
        h1 = h1_all[b * pb:b * pb + n1, :]                            # (196, c1)

        # ---- conv2 + ReLU: one gather matmul + per-tap weight matmuls ----------------
        g = jnp.dot(sel, h1, preferred_element_type=f32)              # (taps*pos_pad, c1)
        acc = jnp.zeros((pos_pad, d_hid), f32)
        for t in range(taps):
            acc = acc + jnp.dot(g[t * pos_pad:(t + 1) * pos_pad, :],
                                w2[t * c1:(t + 1) * c1, :],
                                preferred_element_type=f32)
        feat = jnp.maximum(acc[0:n_pos, :] + b2, 0.0)                 # (49, d_hid) == x

        # ---- ScouterAttention (sigmoid slot attention, q-proj folded into keys) ------
        k_t = (jnp.dot(feat + pe, kw, preferred_element_type=f32) + kb).T   # (d_hid, 49)
        m2 = jnp.dot(qwb, k_t, preferred_element_type=f32)            # (d_hid+1, 49)
        m_mat = m2[0:d_hid, :]                                        # qW @ K^T (scaled)
        b_vec = m2[d_hid:d_hid + 1, :]                                # qb @ K^T (scaled)
        slots = slots0
        attn = jnp.zeros((n_cpt, n_pos), f32)
        for _ in range(iters):                                        # static unroll (3)
            dots = jnp.dot(slots, m_mat, preferred_element_type=f32) + b_vec
            attn = jax.nn.sigmoid(dots)
            attn_n = attn / (jnp.sum(attn, axis=-1, keepdims=True) + eps)
            slots = jnp.dot(attn_n, feat, preferred_element_type=f32)

        attn_ref[b] = attn.astype(attn_ref.dtype)
        upd_ref[b] = slots.astype(upd_ref.dtype)
        # cpt = tanh(scale * sum(attn, -1)), scale == 1 in the module
        cpt_sc[b:b + 1, :] = jnp.tanh(jnp.sum(attn, axis=-1))[None, :]

    cpt = cpt_sc[...]                                                 # (B, C)

    # In-place deactivation of a concept (torch mutates row 0 of cpt only).
    if deactivate != -1:
        rid = jax.lax.broadcasted_iota(jnp.int32, cpt.shape, 0)
        cid = jax.lax.broadcasted_iota(jnp.int32, cpt.shape, 1)
        cpt = jnp.where((rid == 0) & (cid == (deactivate - 1)), 0.0, cpt)

    # ---- Aggregate head + decoder, whole batch flattened into the MXU M dim ----------
    h = cpt
    if use_agg_fc1:                                                   # args.layer != 1
        h = jnp.maximum(jnp.dot(cpt, blk("a1w"), preferred_element_type=f32)
                        + blk("a1b"), 0.0)
    pred = jnp.dot(h, blk("a2w"), preferred_element_type=f32) + blk("a2b")        # (B, 3)

    f1w = blk("f1w", blk784_ref, offs784)
    f1b = blk("f1b", blk784_ref, offs784)
    f2b = blk("f2b", blk784_ref, offs784)
    d1 = jnp.maximum(jnp.dot(cpt, f1w, preferred_element_type=f32) + f1b, 0.0)    # (B,400)
    f2w = f2w_ref[...]                                                # bf16 weight
    rec = jnp.tanh(jnp.dot(d1.astype(f2w.dtype), f2w,
                           preferred_element_type=f32) + f2b)                     # (B,784)

    # Packed, lane-aligned output slab: [rec | (cpt-.5)*2 | pred]
    out_ref[:, 0:rec_w] = rec.astype(out_ref.dtype)
    out_ref[:, cpt_off:cpt_off + n_cpt] = ((cpt - 0.5) * 2.0).astype(out_ref.dtype)
    out_ref[:, pred_off:pred_off + n_cls] = pred.astype(out_ref.dtype)


# ----------------------------------------------------------------------------
# Glue: conv1 im2col, conv2 selectors, sine PE, parameter packing
# ----------------------------------------------------------------------------
def extract_patches(x, ksize=3, stride=2, pad=1):
    """x: (B, H, W, C) channels-last -> (B, OH*OW, ksize*ksize*C), (kh, kw, c) order."""
    B, H, W, C = x.shape
    xp = jnp.pad(x, ((0, 0), (pad, pad), (pad, pad), (0, 0)))
    OH = (H + 2 * pad - ksize) // stride + 1
    OW = (W + 2 * pad - ksize) // stride + 1
    pieces = []
    for di in range(ksize):
        for dj in range(ksize):
            pieces.append(xp[:, di:di + stride * OH:stride, dj:dj + stride * OW:stride, :])
    p = jnp.stack(pieces, axis=-2)                     # (B, OH, OW, 9, C)
    return p.reshape(B, OH * OW, ksize * ksize * C)


def build_sel_big(in_h, in_w, out_h, out_w, ksize=3, stride=2, pad=1):
    """Tap-major 0/1 selector block (taps * pos_pad, in_h*in_w); pos padded to mult of 8."""
    n_pos = out_h * out_w
    pos_pad = ((n_pos + 7) // 8) * 8
    sel = np.zeros((ksize * ksize, pos_pad, in_h * in_w), np.float32)
    for di in range(ksize):
        for dj in range(ksize):
            t = di * ksize + dj
            for oi in range(out_h):
                for oj in range(out_w):
                    ii = oi * stride + di - pad
                    jj = oj * stride + dj - pad
                    if 0 <= ii < in_h and 0 <= jj < in_w:
                        sel[t, oi * out_w + oj, ii * in_w + jj] = 1.0
    return sel.reshape(ksize * ksize * pos_pad, in_h * in_w)


def conv_w_to_mat(w):
    """PyTorch conv weight (O, I, KH, KW) -> matmul weight (KH*KW*I, O)."""
    O, I, KH, KW = w.shape
    return jnp.transpose(w, (2, 3, 1, 0)).reshape(KH * KW * I, O)


def sine_position_encoding(h, w, hidden_dim, temperature=10000.0):
    """DETR-style sine PE (normalize=True), channels-last: (h, w, hidden_dim)."""
    num_pos_feats = hidden_dim // 2
    scale = 2.0 * math.pi
    eps = 1e-6
    ones = jnp.ones((h, w), jnp.float32)
    y_embed = jnp.cumsum(ones, axis=0)
    x_embed = jnp.cumsum(ones, axis=1)
    y_embed = y_embed / (y_embed[-1:, :] + eps) * scale
    x_embed = x_embed / (x_embed[:, -1:] + eps) * scale
    dim_t = jnp.arange(num_pos_feats, dtype=jnp.float32)
    dim_t = temperature ** (2.0 * jnp.floor(dim_t / 2.0) / num_pos_feats)
    pos_x = x_embed[:, :, None] / dim_t
    pos_y = y_embed[:, :, None] / dim_t
    pos_x = jnp.stack([jnp.sin(pos_x[:, :, 0::2]), jnp.cos(pos_x[:, :, 1::2])],
                      axis=3).reshape(h, w, -1)
    pos_y = jnp.stack([jnp.sin(pos_y[:, :, 0::2]), jnp.cos(pos_y[:, :, 1::2])],
                      axis=3).reshape(h, w, -1)
    return jnp.concatenate([pos_y, pos_x], axis=-1)


def init_params(key, num_concepts, hidden_dim=32):
    ks = jax.random.split(key, 17)

    def w(k, shape, s=0.1):
        return s * jax.random.normal(k, shape, jnp.float32)

    return dict(
        conv1_w=w(ks[0], (16, 1, 3, 3)), conv1_b=w(ks[1], (1, 16)),
        conv2_w=w(ks[2], (hidden_dim, 16, 3, 3)), conv2_b=w(ks[3], (1, hidden_dim)),
        to_q_w=w(ks[4], (hidden_dim, hidden_dim)), to_q_b=w(ks[5], (1, hidden_dim)),
        to_k_w=w(ks[6], (hidden_dim, hidden_dim)), to_k_b=w(ks[7], (1, hidden_dim)),
        slots0=w(ks[8], (num_concepts, hidden_dim), 1.0),
        agg1_w=w(ks[9], (num_concepts, num_concepts)), agg1_b=w(ks[10], (1, num_concepts)),
        agg2_w=w(ks[11], (num_concepts, 3)), agg2_b=w(ks[12], (1, 3)),
        fc1_w=w(ks[13], (num_concepts, 400)), fc1_b=w(ks[14], (1, 400)),
        fc2_w=w(ks[15], (400, 28 * 28)), fc2_b=w(ks[16], (1, 28 * 28)),
    )


def _pack_block(entries, width):
    """Stack 2D params into one (rows, width) f32 block; 8-aligned row offsets."""
    rows, offs, cur = [], {}, 0
    for name, a in entries:
        a = jnp.asarray(a, jnp.float32)
        r, c = a.shape
        offs[name] = (cur, r, c)
        pad_r = (-r) % 8
        rows.append(jnp.pad(a, ((0, pad_r), (0, width - c))))
        cur += r + pad_r
    return jnp.concatenate(rows, axis=0), offs


def pack_params(params, num_concepts, hidden_dim=32, big_weight_dtype=jnp.bfloat16):
    """One-time packing.  Returns (arrays_dict, static_meta_dict).
    big_weight_dtype=bf16 halves HBM traffic of the dominant fc2 weight and of the 0/1
    conv2 selectors (exact for {0,1}); everything else stays f32."""
    scale = float(hidden_dim) ** -0.5
    qwb = jnp.concatenate([params["to_q_w"] * scale, params["to_q_b"] * scale], axis=0)
    pe = sine_position_encoding(7, 7, hidden_dim).reshape(7 * 7, hidden_dim)

    w32_entries = [
        ("w1", conv_w_to_mat(params["conv1_w"])), ("b1", params["conv1_b"]),
        ("w2", conv_w_to_mat(params["conv2_w"])), ("b2", params["conv2_b"]),
        ("pe", pe),
        ("kw", params["to_k_w"]), ("kb", params["to_k_b"]),
        ("qwb", qwb),
        ("slots0", params["slots0"]),
        ("a1w", params["agg1_w"]), ("a1b", params["agg1_b"]),
        ("a2w", params["agg2_w"]), ("a2b", params["agg2_b"]),
    ]
    wblk, offs = _pack_block(w32_entries, width=max(hidden_dim, num_concepts))

    b784_entries = [
        ("f1w", params["fc1_w"]), ("f1b", params["fc1_b"]), ("f2b", params["fc2_b"]),
    ]
    blk784, offs784 = _pack_block(b784_entries, width=params["fc2_w"].shape[1])

    arrays = dict(
        wblk=wblk,
        blk784=blk784,
        sel=jnp.asarray(build_sel_big(14, 14, 7, 7), big_weight_dtype),
        f2w=params["fc2_w"].astype(big_weight_dtype),
    )
    meta = dict(offs=offs, offs784=offs784)
    return arrays, meta


def concept_autoencoder_forward(x_nchw, packed, cfg, num_concepts, meta):
    B = x_nchw.shape[0]
    C = num_concepts
    offs, offs784 = meta["offs"], meta["offs784"]

    # conv1 im2col patches (glue, outside the kernel), padded per-image to 8-aligned rows.
    x_nhwc = jnp.transpose(x_nchw, (0, 2, 3, 1)).astype(jnp.float32)       # (B,28,28,1)
    p1 = extract_patches(x_nhwc)                                           # (B,196,9)
    n1 = p1.shape[1]
    pb = ((n1 + 7) // 8) * 8
    p1 = jnp.pad(p1, ((0, 0), (0, pb - n1), (0, 0))).reshape(B * pb, p1.shape[2])

    # Static geometry derived from the packed blocks.
    c1 = offs["w1"][2]
    d_hid = offs["w2"][2]
    taps = offs["w2"][1] // c1
    n_pos = offs["pe"][1]
    pos_pad = packed["sel"].shape[0] // taps
    n_cls = offs["a2w"][2]
    rec_w = packed["f2w"].shape[1]
    cpt_off = ((rec_w + 127) // 128) * 128
    pred_off = cpt_off + ((C + 127) // 128) * 128
    out_w = pred_off + n_cls

    inputs = (p1, packed["sel"], packed["wblk"], packed["blk784"], packed["f2w"])

    def full_spec(shape):
        nd = len(shape)
        return pl.BlockSpec(shape, lambda i, _nd=nd: (0,) * _nd)

    out_shape = (
        jax.ShapeDtypeStruct((B, out_w), jnp.float32),       # [rec | (cpt-.5)*2 | pred]
        jax.ShapeDtypeStruct((B, C, n_pos), jnp.float32),    # attn
        jax.ShapeDtypeStruct((B, C, d_hid), jnp.float32),    # updates
    )

    kernel = functools.partial(
        _fused_kernel, batch=B, n_cpt=C, offs=offs, offs784=offs784,
        iters=3, eps=1e-8, use_agg_fc1=(cfg.layer != 1),
        deactivate=int(cfg.deactivate), n1=n1, pb=pb, n_pos=n_pos, pos_pad=pos_pad,
        taps=taps, c1=c1, d_hid=d_hid, rec_w=rec_w, cpt_off=cpt_off,
        pred_off=pred_off, n_cls=n_cls)

    out_main, attn, updates = pl.pallas_call(
        kernel,
        out_shape=out_shape,
        grid_spec=pltpu.PrefetchScalarGridSpec(
            num_scalar_prefetch=0,
            grid=(1,),                                        # fully fused, one step
            in_specs=[full_spec(a.shape) for a in inputs],
            out_specs=tuple(full_spec(s.shape) for s in out_shape),
            scratch_shapes=[pltpu.VMEM((B, C), jnp.float32)],
        ),
        # TODO(synk): for large B (esp. v7x: 2 TensorCores, 64 MiB VMEM) put batch on a
        # leading "parallel" grid axis with constant index_maps for the weight blocks and
        # set vmem_limit_bytes explicitly; at B=2 one fused step is optimal.
        compiler_params=pltpu.CompilerParams(dimension_semantics=("arbitrary",)),
    )(*inputs)

    rec = out_main[:, 0:rec_w]
    cpt_scaled = out_main[:, cpt_off:cpt_off + C]
    pred = out_main[:, pred_off:pred_off + n_cls]
    return cpt_scaled, pred, rec, attn, updates


if __name__ == "__main__":
    num_concepts = 10
    cfg = SimpleNamespace(layer=2, deactivate=-1)   # layer!=1 -> Aggregate uses fc1+relu

    key = jax.random.PRNGKey(0)
    params = init_params(key, num_concepts)
    packed, meta = pack_params(params, num_concepts)       # bf16 fc2 weight + selectors
    x = jax.random.normal(jax.random.fold_in(key, 999), (2, 1, 28, 28), jnp.float32)

    fwd = jax.jit(functools.partial(concept_autoencoder_forward,
                                    cfg=cfg, num_concepts=num_concepts, meta=meta))
    outs = jax.block_until_ready(fwd(x, packed))

    cpt_scaled, pred, rec, attn, updates = outs
    assert cpt_scaled.shape == (2, num_concepts)
    assert pred.shape == (2, 3)
    assert rec.shape == (2, 784)
    assert attn.shape == (2, num_concepts, 49)
    assert updates.shape == (2, num_concepts, 32)
    assert all(bool(jnp.all(jnp.isfinite(o))) for o in outs)
    print("KERNEL_OK")
</pallas_src>

<mosaic_0001>
module attributes {stable_mosaic.version = 11 : i64} {
  func.func @_fused_kernel(%arg0: i32, %arg1: memref<400x9xf32, #tpu.memory_space<vmem>>, %arg2: memref<504x196xbf16, #tpu.memory_space<vmem>>, %arg3: memref<376x32xf32, #tpu.memory_space<vmem>>, %arg4: memref<32x784xf32, #tpu.memory_space<vmem>>, %arg5: memref<400x784xbf16, #tpu.memory_space<vmem>>, %arg6: memref<2x1027xf32, #tpu.memory_space<vmem>>, %arg7: memref<2x10x49xf32, #tpu.memory_space<vmem>>, %arg8: memref<2x10x32xf32, #tpu.memory_space<vmem>>, %arg9: memref<2x10xf32, #tpu.memory_space<vmem>>) attributes {dimension_semantics = [#tpu.dimension_semantics<arbitrary>], iteration_bounds = array<i64: 1>, scalar_prefetch = 0 : i64, scratch_operands = 1 : i64, tpu.core_type = #tpu.core_type<tc>, window_params = [{pipeline_mode = #tpu.pipeline_mode<synchronous>, transform_indices = @transform_0, window_bounds = array<i64: 400, 9>}, {pipeline_mode = #tpu.pipeline_mode<synchronous>, transform_indices = @transform_1, window_bounds = array<i64: 504, 196>}, {pipeline_mode = #tpu.pipeline_mode<synchronous>, transform_indices = @transform_2, window_bounds = array<i64: 376, 32>}, {pipeline_mode = #tpu.pipeline_mode<synchronous>, transform_indices = @transform_3, window_bounds = array<i64: 32, 784>}, {pipeline_mode = #tpu.pipeline_mode<synchronous>, transform_indices = @transform_4, window_bounds = array<i64: 400, 784>}, {pipeline_mode = #tpu.pipeline_mode<synchronous>, transform_indices = @transform_5, window_bounds = array<i64: 2, 1027>}, {pipeline_mode = #tpu.pipeline_mode<synchronous>, transform_indices = @transform_6, window_bounds = array<i64: 2, 10, 49>}, {pipeline_mode = #tpu.pipeline_mode<synchronous>, transform_indices = @transform_7, window_bounds = array<i64: 2, 10, 32>}]} {
    %c0 = arith.constant 0 : index
    %c0_0 = arith.constant 0 : index
    %0 = vector.load %arg3[%c0, %c0_0] : memref<376x32xf32, #tpu.memory_space<vmem>>, vector<9x16xf32>
    %c16 = arith.constant 16 : index
    %c0_1 = arith.constant 0 : index
    %1 = vector.load %arg3[%c16, %c0_1] : memref<376x32xf32, #tpu.memory_space<vmem>>, vector<1x16xf32>
    %c24 = arith.constant 24 : index
    %c0_2 = arith.constant 0 : index
    %2 = vector.load %arg3[%c24, %c0_2] : memref<376x32xf32, #tpu.memory_space<vmem>>, vector<144x32xf32>
    %c168 = arith.constant 168 : index
    %c0_3 = arith.constant 0 : index
    %3 = vector.load %arg3[%c168, %c0_3] : memref<376x32xf32, #tpu.memory_space<vmem>>, vector<1x32xf32>
    %c176 = arith.constant 176 : index
    %c0_4 = arith.constant 0 : index
    %4 = vector.load %arg3[%c176, %c0_4] : memref<376x32xf32, #tpu.memory_space<vmem>>, vector<49x32xf32>
    %c232 = arith.constant 232 : index
    %c0_5 = arith.constant 0 : index
    %5 = vector.load %arg3[%c232, %c0_5] : memref<376x32xf32, #tpu.memory_space<vmem>>, vector<32x32xf32>
    %c264 = arith.constant 264 : index
    %c0_6 = arith.constant 0 : index
    %6 = vector.load %arg3[%c264, %c0_6] : memref<376x32xf32, #tpu.memory_space<vmem>>, vector<1x32xf32>
    %c272 = arith.constant 272 : index
    %c0_7 = arith.constant 0 : index
    %7 = vector.load %arg3[%c272, %c0_7] : memref<376x32xf32, #tpu.memory_space<vmem>>, vector<33x32xf32>
    %c312 = arith.constant 312 : index
    %c0_8 = arith.constant 0 : index
    %8 = vector.load %arg3[%c312, %c0_8] : memref<376x32xf32, #tpu.memory_space<vmem>>, vector<10x32xf32>
    %c0_9 = arith.constant 0 : index
    %c0_10 = arith.constant 0 : index
    %9 = vector.load %arg2[%c0_9, %c0_10] : memref<504x196xbf16, #tpu.memory_space<vmem>>, vector<504x196xbf16>
    %10 = arith.extf %9 : vector<504x196xbf16> to vector<504x196xf32>
    %c0_11 = arith.constant 0 : index
    %c0_12 = arith.constant 0 : index
    %11 = vector.load %arg1[%c0_11, %c0_12] : memref<400x9xf32, #tpu.memory_space<vmem>>, vector<400x9xf32>
    %cst = arith.constant dense<0.000000e+00> : vector<400x16xf32>
    %12 = tpu.matmul %11, %0, %cst {dimension_numbers = #tpu.dot_dimension_numbers<[1], [0], [0], [1], [0, 0, 1, 1], [], []>} : vector<400x9xf32>, vector<9x16xf32>, vector<400x16xf32> -> vector<400x16xf32>
    %13 = vector.broadcast %1 : vector<1x16xf32> to vector<400x16xf32>
    %14 = arith.addf %12, %13 : vector<400x16xf32>
    %cst_13 = arith.constant 0.000000e+00 : f32
    %15 = vector.broadcast %cst_13 : f32 to vector<400x16xf32>
    %16 = arith.maximumf %14, %15 : vector<400x16xf32>
    %17 = vector.extract_strided_slice %16 {offsets = [0, 0], sizes = [196, 16], strides = [1, 1]} : vector<400x16xf32> to vector<196x16xf32>
    %cst_14 = arith.constant dense<0.000000e+00> : vector<504x16xf32>
    %18 = tpu.matmul %10, %17, %cst_14 {dimension_numbers = #tpu.dot_dimension_numbers<[1], [0], [0], [1], [0, 0, 1, 1], [], []>} : vector<504x196xf32>, vector<196x16xf32>, vector<504x16xf32> -> vector<504x16xf32>
    %cst_15 = arith.constant 0.000000e+00 : f32
    %19 = vector.broadcast %cst_15 : f32 to vector<56x32xf32>
    %20 = vector.extract_strided_slice %18 {offsets = [0, 0], sizes = [56, 16], strides = [1, 1]} : vector<504x16xf32> to vector<56x16xf32>
    %21 = vector.extract_strided_slice %2 {offsets = [0, 0], sizes = [16, 32], strides = [1, 1]} : vector<144x32xf32> to vector<16x32xf32>
    %cst_16 = arith.constant dense<0.000000e+00> : vector<56x32xf32>
    %22 = tpu.matmul %20, %21, %cst_16 {dimension_numbers = #tpu.dot_dimension_numbers<[1], [0], [0], [1], [0, 0, 1, 1], [], []>} : vector<56x16xf32>, vector<16x32xf32>, vector<56x32xf32> -> vector<56x32xf32>
    %23 = arith.addf %19, %22 : vector<56x32xf32>
    %24 = vector.extract_strided_slice %18 {offsets = [56, 0], sizes = [56, 16], strides = [1, 1]} : vector<504x16xf32> to vector<56x16xf32>
    %25 = vector.extract_strided_slice %2 {offsets = [16, 0], sizes = [16, 32], strides = [1, 1]} : vector<144x32xf32> to vector<16x32xf32>
    %cst_17 = arith.constant dense<0.000000e+00> : vector<56x32xf32>
    %26 = tpu.matmul %24, %25, %cst_17 {dimension_numbers = #tpu.dot_dimension_numbers<[1], [0], [0], [1], [0, 0, 1, 1], [], []>} : vector<56x16xf32>, vector<16x32xf32>, vector<56x32xf32> -> vector<56x32xf32>
    %27 = arith.addf %23, %26 : vector<56x32xf32>
    %28 = vector.extract_strided_slice %18 {offsets = [112, 0], sizes = [56, 16], strides = [1, 1]} : vector<504x16xf32> to vector<56x16xf32>
    %29 = vector.extract_strided_slice %2 {offsets = [32, 0], sizes = [16, 32], strides = [1, 1]} : vector<144x32xf32> to vector<16x32xf32>
    %cst_18 = arith.constant dense<0.000000e+00> : vector<56x32xf32>
    %30 = tpu.matmul %28, %29, %cst_18 {dimension_numbers = #tpu.dot_dimension_numbers<[1], [0], [0], [1], [0, 0, 1, 1], [], []>} : vector<56x16xf32>, vector<16x32xf32>, vector<56x32xf32> -> vector<56x32xf32>
    %31 = arith.addf %27, %30 : vector<56x32xf32>
    %32 = vector.extract_strided_slice %18 {offsets = [168, 0], sizes = [56, 16], strides = [1, 1]} : vector<504x16xf32> to vector<56x16xf32>
    %33 = vector.extract_strided_slice %2 {offsets = [48, 0], sizes = [16, 32], strides = [1, 1]} : vector<144x32xf32> to vector<16x32xf32>
    %cst_19 = arith.constant dense<0.000000e+00> : vector<56x32xf32>
    %34 = tpu.matmul %32, %33, %cst_19 {dimension_numbers = #tpu.dot_dimension_numbers<[1], [0], [0], [1], [0, 0, 1, 1], [], []>} : vector<56x16xf32>, vector<16x32xf32>, vector<56x32xf32> -> vector<56x32xf32>
    %35 = arith.addf %31, %34 : vector<56x32xf32>
    %36 = vector.extract_strided_slice %18 {offsets = [224, 0], sizes = [56, 16], strides = [1, 1]} : vector<504x16xf32> to vector<56x16xf32>
    %37 = vector.extract_strided_slice %2 {offsets = [64, 0], sizes = [16, 32], strides = [1, 1]} : vector<144x32xf32> to vector<16x32xf32>
    %cst_20 = arith.constant dense<0.000000e+00> : vector<56x32xf32>
    %38 = tpu.matmul %36, %37, %cst_20 {dimension_numbers = #tpu.dot_dimension_numbers<[1], [0], [0], [1], [0, 0, 1, 1], [], []>} : vector<56x16xf32>, vector<16x32xf32>, vector<56x32xf32> -> vector<56x32xf32>
    %39 = arith.addf %35, %38 : vector<56x32xf32>
    %40 = vector.extract_strided_slice %18 {offsets = [280, 0], sizes = [56, 16], strides = [1, 1]} : vector<504x16xf32> to vector<56x16xf32>
    %41 = vector.extract_strided_slice %2 {offsets = [80, 0], sizes = [16, 32], strides = [1, 1]} : vector<144x32xf32> to vector<16x32xf32>
    %cst_21 = arith.constant dense<0.000000e+00> : vector<56x32xf32>
    %42 = tpu.matmul %40, %41, %cst_21 {dimension_numbers = #tpu.dot_dimension_numbers<[1], [0], [0], [1], [0, 0, 1, 1], [], []>} : vector<56x16xf32>, vector<16x32xf32>, vector<56x32xf32> -> vector<56x32xf32>
    %43 = arith.addf %39, %42 : vector<56x32xf32>
    %44 = vector.extract_strided_slice %18 {offsets = [336, 0], sizes = [56, 16], strides = [1, 1]} : vector<504x16xf32> to vector<56x16xf32>
    %45 = vector.extract_strided_slice %2 {offsets = [96, 0], sizes = [16, 32], strides = [1, 1]} : vector<144x32xf32> to vector<16x32xf32>
    %cst_22 = arith.constant dense<0.000000e+00> : vector<56x32xf32>
    %46 = tpu.matmul %44, %45, %cst_22 {dimension_numbers = #tpu.dot_dimension_numbers<[1], [0], [0], [1], [0, 0, 1, 1], [], []>} : vector<56x16xf32>, vector<16x32xf32>, vector<56x32xf32> -> vector<56x32xf32>
    %47 = arith.addf %43, %46 : vector<56x32xf32>
    %48 = vector.extract_strided_slice %18 {offsets = [392, 0], sizes = [56, 16], strides = [1, 1]} : vector<504x16xf32> to vector<56x16xf32>
    %49 = vector.extract_strided_slice %2 {offsets = [112, 0], sizes = [16, 32], strides = [1, 1]} : vector<144x32xf32> to vector<16x32xf32>
    %cst_23 = arith.constant dense<0.000000e+00> : vector<56x32xf32>
    %50 = tpu.matmul %48, %49, %cst_23 {dimension_numbers = #tpu.dot_dimension_numbers<[1], [0], [0], [1], [0, 0, 1, 1], [], []>} : vector<56x16xf32>, vector<16x32xf32>, vector<56x32xf32> -> vector<56x32xf32>
    %51 = arith.addf %47, %50 : vector<56x32xf32>
    %52 = vector.extract_strided_slice %18 {offsets = [448, 0], sizes = [56, 16], strides = [1, 1]} : vector<504x16xf32> to vector<56x16xf32>
    %53 = vector.extract_strided_slice %2 {offsets = [128, 0], sizes = [16, 32], strides = [1, 1]} : vector<144x32xf32> to vector<16x32xf32>
    %cst_24 = arith.constant dense<0.000000e+00> : vector<56x32xf32>
    %54 = tpu.matmul %52, %53, %cst_24 {dimension_numbers = #tpu.dot_dimension_numbers<[1], [0], [0], [1], [0, 0, 1, 1], [], []>} : vector<56x16xf32>, vector<16x32xf32>, vector<56x32xf32> -> vector<56x32xf32>
    %55 = arith.addf %51, %54 : vector<56x32xf32>
    %56 = vector.extract_strided_slice %55 {offsets = [0, 0], sizes = [49, 32], strides = [1, 1]} : vector<56x32xf32> to vector<49x32xf32>
    %57 = vector.broadcast %3 : vector<1x32xf32> to vector<49x32xf32>
    %58 = arith.addf %56, %57 : vector<49x32xf32>
    %cst_25 = arith.constant 0.000000e+00 : f32
    %59 = vector.broadcast %cst_25 : f32 to vector<49x32xf32>
    %60 = arith.maximumf %58, %59 : vector<49x32xf32>
    %61 = arith.addf %60, %4 : vector<49x32xf32>
    %cst_26 = arith.constant dense<0.000000e+00> : vector<49x32xf32>
    %62 = tpu.matmul %61, %5, %cst_26 {dimension_numbers = #tpu.dot_dimension_numbers<[1], [0], [0], [1], [0, 0, 1, 1], [], []>} : vector<49x32xf32>, vector<32x32xf32>, vector<49x32xf32> -> vector<49x32xf32>
    %63 = vector.broadcast %6 : vector<1x32xf32> to vector<49x32xf32>
    %64 = arith.addf %62, %63 : vector<49x32xf32>
    %65 = tpu.transpose %64, [1, 0] : vector<49x32xf32> -> vector<32x49xf32>
    %cst_27 = arith.constant dense<0.000000e+00> : vector<33x49xf32>
    %66 = tpu.matmul %7, %65, %cst_27 {dimension_numbers = #tpu.dot_dimension_numbers<[1], [0], [0], [1], [0, 0, 1, 1], [], []>} : vector<33x32xf32>, vector<32x49xf32>, vector<33x49xf32> -> vector<33x49xf32>
    %67 = vector.extract_strided_slice %66 {offsets = [0, 0], sizes = [32, 49], strides = [1, 1]} : vector<33x49xf32> to vector<32x49xf32>
    %68 = vector.extract_strided_slice %66 {offsets = [32, 0], sizes = [1, 49], strides = [1, 1]} : vector<33x49xf32> to vector<1x49xf32>
    %cst_28 = arith.constant dense<0.000000e+00> : vector<10x49xf32>
    %69 = tpu.matmul %8, %67, %cst_28 {dimension_numbers = #tpu.dot_dimension_numbers<[1], [0], [0], [1], [0, 0, 1, 1], [], []>} : vector<10x32xf32>, vector<32x49xf32>, vector<10x49xf32> -> vector<10x49xf32>
    %70 = vector.broadcast %68 : vector<1x49xf32> to vector<10x49xf32>
    %71 = arith.addf %69, %70 : vector<10x49xf32>
    %72 = arith.negf %71 : vector<10x49xf32>
    %73 = math.exp %72 : vector<10x49xf32>
    %cst_29 = arith.constant 1.000000e+00 : f32
    %74 = vector.broadcast %cst_29 : f32 to vector<10x49xf32>
    %75 = arith.addf %74, %73 : vector<10x49xf32>
    %76 = arith.divf %74, %75 : vector<10x49xf32>
    %cst_30 = arith.constant dense<0.000000e+00> : vector<10xf32>
    %77 = vector.multi_reduction <add>, %76, %cst_30 [1] : vector<10x49xf32> to vector<10xf32>
    %78 = vector.shape_cast %77 : vector<10xf32> to vector<10x1xf32>
    %cst_31 = arith.constant 9.99999993E-9 : f32
    %79 = vector.broadcast %cst_31 : f32 to vector<10x1xf32>
    %80 = arith.addf %78, %79 : vector<10x1xf32>
    %81 = vector.broadcast %80 : vector<10x1xf32> to vector<10x49xf32>
    %82 = arith.divf %76, %81 : vector<10x49xf32>
    %cst_32 = arith.constant dense<0.000000e+00> : vector<10x32xf32>
    %83 = tpu.matmul %82, %60, %cst_32 {dimension_numbers = #tpu.dot_dimension_numbers<[1], [0], [0], [1], [0, 0, 1, 1], [], []>} : vector<10x49xf32>, vector<49x32xf32>, vector<10x32xf32> -> vector<10x32xf32>
    %cst_33 = arith.constant dense<0.000000e+00> : vector<10x49xf32>
    %84 = tpu.matmul %83, %67, %cst_33 {dimension_numbers = #tpu.dot_dimension_numbers<[1], [0], [0], [1], [0, 0, 1, 1], [], []>} : vector<10x32xf32>, vector<32x49xf32>, vector<10x49xf32> -> vector<10x49xf32>
    %85 = vector.broadcast %68 : vector<1x49xf32> to vector<10x49xf32>
    %86 = arith.addf %84, %85 : vector<10x49xf32>
    %87 = arith.negf %86 : vector<10x49xf32>
    %88 = math.exp %87 : vector<10x49xf32>
    %cst_34 = arith.constant 1.000000e+00 : f32
    %89 = vector.broadcast %cst_34 : f32 to vector<10x49xf32>
    %90 = arith.addf %89, %88 : vector<10x49xf32>
    %91 = arith.divf %89, %90 : vector<10x49xf32>
    %cst_35 = arith.constant dense<0.000000e+00> : vector<10xf32>
    %92 = vector.multi_reduction <add>, %91, %cst_35 [1] : vector<10x49xf32> to vector<10xf32>
    %93 = vector.shape_cast %92 : vector<10xf32> to vector<10x1xf32>
    %cst_36 = arith.constant 9.99999993E-9 : f32
    %94 = vector.broadcast %cst_36 : f32 to vector<10x1xf32>
    %95 = arith.addf %93, %94 : vector<10x1xf32>
    %96 = vector.broadcast %95 : vector<10x1xf32> to vector<10x49xf32>
    %97 = arith.divf %91, %96 : vector<10x49xf32>
    %cst_37 = arith.constant dense<0.000000e+00> : vector<10x32xf32>
    %98 = tpu.matmul %97, %60, %cst_37 {dimension_numbers = #tpu.dot_dimension_numbers<[1], [0], [0], [1], [0, 0, 1, 1], [], []>} : vector<10x49xf32>, vector<49x32xf32>, vector<10x32xf32> -> vector<10x32xf32>
    %cst_38 = arith.constant dense<0.000000e+00> : vector<10x49xf32>
    %99 = tpu.matmul %98, %67, %cst_38 {dimension_numbers = #tpu.dot_dimension_numbers<[1], [0], [0], [1], [0, 0, 1, 1], [], []>} : vector<10x32xf32>, vector<32x49xf32>, vector<10x49xf32> -> vector<10x49xf32>
    %100 = vector.broadcast %68 : vector<1x49xf32> to vector<10x49xf32>
    %101 = arith.addf %99, %100 : vector<10x49xf32>
    %102 = arith.negf %101 : vector<10x49xf32>
    %103 = math.exp %102 : vector<10x49xf32>
    %cst_39 = arith.constant 1.000000e+00 : f32
    %104 = vector.broadcast %cst_39 : f32 to vector<10x49xf32>
    %105 = arith.addf %104, %103 : vector<10x49xf32>
    %106 = arith.divf %104, %105 : vector<10x49xf32>
    %cst_40 = arith.constant dense<0.000000e+00> : vector<10xf32>
    %107 = vector.multi_reduction <add>, %106, %cst_40 [1] : vector<10x49xf32> to vector<10xf32>
    %108 = vector.shape_cast %107 : vector<10xf32> to vector<10x1xf32>
    %cst_41 = arith.constant 9.99999993E-9 : f32
    %109 = vector.broadcast %cst_41 : f32 to vector<10x1xf32>
    %110 = arith.addf %108, %109 : vector<10x1xf32>
    %111 = vector.broadcast %110 : vector<10x1xf32> to vector<10x49xf32>
    %112 = arith.divf %106, %111 : vector<10x49xf32>
    %cst_42 = arith.constant dense<0.000000e+00> : vector<10x32xf32>
    %113 = tpu.matmul %112, %60, %cst_42 {dimension_numbers = #tpu.dot_dimension_numbers<[1], [0], [0], [1], [0, 0, 1, 1], [], []>} : vector<10x49xf32>, vector<49x32xf32>, vector<10x32xf32> -> vector<10x32xf32>
    %c0_43 = arith.constant 0 : index
    %c0_44 = arith.constant 0 : index
    %c0_45 = arith.constant 0 : index
    %114 = vector.load %arg7[%c0_43, %c0_44, %c0_45] : memref<2x10x49xf32, #tpu.memory_space<vmem>>, vector<1x10x49xf32>
    %115 = vector.shape_cast %114 : vector<1x10x49xf32> to vector<10x49xf32>
    %116 = vector.shape_cast %106 : vector<10x49xf32> to vector<1x10x49xf32>
    tpu.vector_store %arg7[%c0_43, %c0_44, %c0_45], %116 {strides = array<i32>} : memref<2x10x49xf32, #tpu.memory_space<vmem>>, vector<1x10x49xf32>,
    %c0_46 = arith.constant 0 : index
    %c0_47 = arith.constant 0 : index
    %c0_48 = arith.constant 0 : index
    %117 = vector.load %arg8[%c0_46, %c0_47, %c0_48] : memref<2x10x32xf32, #tpu.memory_space<vmem>>, vector<1x10x32xf32>
    %118 = vector.shape_cast %117 : vector<1x10x32xf32> to vector<10x32xf32>
    %119 = vector.shape_cast %113 : vector<10x32xf32> to vector<1x10x32xf32>
    tpu.vector_store %arg8[%c0_46, %c0_47, %c0_48], %119 {strides = array<i32>} : memref<2x10x32xf32, #tpu.memory_space<vmem>>, vector<1x10x32xf32>,
    %cst_49 = arith.constant dense<0.000000e+00> : vector<10xf32>
    %120 = vector.multi_reduction <add>, %106, %cst_49 [1] : vector<10x49xf32> to vector<10xf32>
    %121 = math.tanh %120 : vector<10xf32>
    %122 = vector.shape_cast %121 : vector<10xf32> to vector<1x10xf32>
    %c0_50 = arith.constant 0 : index
    %c0_51 = arith.constant 0 : index
    %123 = vector.load %arg9[%c0_50, %c0_51] : memref<2x10xf32, #tpu.memory_space<vmem>>, vector<1x10xf32>
    tpu.vector_store %arg9[%c0_50, %c0_51], %122 {strides = array<i32>} : memref<2x10xf32, #tpu.memory_space<vmem>>, vector<1x10xf32>,
    %124 = vector.extract_strided_slice %16 {offsets = [200, 0], sizes = [196, 16], strides = [1, 1]} : vector<400x16xf32> to vector<196x16xf32>
    %cst_52 = arith.constant dense<0.000000e+00> : vector<504x16xf32>
    %125 = tpu.matmul %10, %124, %cst_52 {dimension_numbers = #tpu.dot_dimension_numbers<[1], [0], [0], [1], [0, 0, 1, 1], [], []>} : vector<504x196xf32>, vector<196x16xf32>, vector<504x16xf32> -> vector<504x16xf32>
    %cst_53 = arith.constant 0.000000e+00 : f32
    %126 = vector.broadcast %cst_53 : f32 to vector<56x32xf32>
    %127 = vector.extract_strided_slice %125 {offsets = [0, 0], sizes = [56, 16], strides = [1, 1]} : vector<504x16xf32> to vector<56x16xf32>
    %128 = vector.extract_strided_slice %2 {offsets = [0, 0], sizes = [16, 32], strides = [1, 1]} : vector<144x32xf32> to vector<16x32xf32>
    %cst_54 = arith.constant dense<0.000000e+00> : vector<56x32xf32>
    %129 = tpu.matmul %127, %128, %cst_54 {dimension_numbers = #tpu.dot_dimension_numbers<[1], [0], [0], [1], [0, 0, 1, 1], [], []>} : vector<56x16xf32>, vector<16x32xf32>, vector<56x32xf32> -> vector<56x32xf32>
    %130 = arith.addf %126, %129 : vector<56x32xf32>
    %131 = vector.extract_strided_slice %125 {offsets = [56, 0], sizes = [56, 16], strides = [1, 1]} : vector<504x16xf32> to vector<56x16xf32>
    %132 = vector.extract_strided_slice %2 {offsets = [16, 0], sizes = [16, 32], strides = [1, 1]} : vector<144x32xf32> to vector<16x32xf32>
    %cst_55 = arith.constant dense<0.000000e+00> : vector<56x32xf32>
    %133 = tpu.matmul %131, %132, %cst_55 {dimension_numbers = #tpu.dot_dimension_numbers<[1], [0], [0], [1], [0, 0, 1, 1], [], []>} : vector<56x16xf32>, vector<16x32xf32>, vector<56x32xf32> -> vector<56x32xf32>
    %134 = arith.addf %130, %133 : vector<56x32xf32>
    %135 = vector.extract_strided_slice %125 {offsets = [112, 0], sizes = [56, 16], strides = [1, 1]} : vector<504x16xf32> to vector<56x16xf32>
    %136 = vector.extract_strided_slice %2 {offsets = [32, 0], sizes = [16, 32], strides = [1, 1]} : vector<144x32xf32> to vector<16x32xf32>
    %cst_56 = arith.constant dense<0.000000e+00> : vector<56x32xf32>
    %137 = tpu.matmul %135, %136, %cst_56 {dimension_numbers = #tpu.dot_dimension_numbers<[1], [0], [0], [1], [0, 0, 1, 1], [], []>} : vector<56x16xf32>, vector<16x32xf32>, vector<56x32xf32> -> vector<56x32xf32>
    %138 = arith.addf %134, %137 : vector<56x32xf32>
    %139 = vector.extract_strided_slice %125 {offsets = [168, 0], sizes = [56, 16], strides = [1, 1]} : vector<504x16xf32> to vector<56x16xf32>
    %140 = vector.extract_strided_slice %2 {offsets = [48, 0], sizes = [16, 32], strides = [1, 1]} : vector<144x32xf32> to vector<16x32xf32>
    %cst_57 = arith.constant dense<0.000000e+00> : vector<56x32xf32>
    %141 = tpu.matmul %139, %140, %cst_57 {dimension_numbers = #tpu.dot_dimension_numbers<[1], [0], [0], [1], [0, 0, 1, 1], [], []>} : vector<56x16xf32>, vector<16x32xf32>, vector<56x32xf32> -> vector<56x32xf32>
    %142 = arith.addf %138, %141 : vector<56x32xf32>
    %143 = vector.extract_strided_slice %125 {offsets = [224, 0], sizes = [56, 16], strides = [1, 1]} : vector<504x16xf32> to vector<56x16xf32>
    %144 = vector.extract_strided_slice %2 {offsets = [64, 0], sizes = [16, 32], strides = [1, 1]} : vector<144x32xf32> to vector<16x32xf32>
    %cst_58 = arith.constant dense<0.000000e+00> : vector<56x32xf32>
    %145 = tpu.matmul %143, %144, %cst_58 {dimension_numbers = #tpu.dot_dimension_numbers<[1], [0], [0], [1], [0, 0, 1, 1], [], []>} : vector<56x16xf32>, vector<16x32xf32>, vector<56x32xf32> -> vector<56x32xf32>
    %146 = arith.addf %142, %145 : vector<56x32xf32>
    %147 = vector.extract_strided_slice %125 {offsets = [280, 0], sizes = [56, 16], strides = [1, 1]} : vector<504x16xf32> to vector<56x16xf32>
    %148 = vector.extract_strided_slice %2 {offsets = [80, 0], sizes = [16, 32], strides = [1, 1]} : vector<144x32xf32> to vector<16x32xf32>
    %cst_59 = arith.constant dense<0.000000e+00> : vector<56x32xf32>
    %149 = tpu.matmul %147, %148, %cst_59 {dimension_numbers = #tpu.dot_dimension_numbers<[1], [0], [0], [1], [0, 0, 1, 1], [], []>} : vector<56x16xf32>, vector<16x32xf32>, vector<56x32xf32> -> vector<56x32xf32>
    %150 = arith.addf %146, %149 : vector<56x32xf32>
    %151 = vector.extract_strided_slice %125 {offsets = [336, 0], sizes = [56, 16], strides = [1, 1]} : vector<504x16xf32> to vector<56x16xf32>
    %152 = vector.extract_strided_slice %2 {offsets = [96, 0], sizes = [16, 32], strides = [1, 1]} : vector<144x32xf32> to vector<16x32xf32>
    %cst_60 = arith.constant dense<0.000000e+00> : vector<56x32xf32>
    %153 = tpu.matmul %151, %152, %cst_60 {dimension_numbers = #tpu.dot_dimension_numbers<[1], [0], [0], [1], [0, 0, 1, 1], [], []>} : vector<56x16xf32>, vector<16x32xf32>, vector<56x32xf32> -> vector<56x32xf32>
    %154 = arith.addf %150, %153 : vector<56x32xf32>
    %155 = vector.extract_strided_slice %125 {offsets = [392, 0], sizes = [56, 16], strides = [1, 1]} : vector<504x16xf32> to vector<56x16xf32>
    %156 = vector.extract_strided_slice %2 {offsets = [112, 0], sizes = [16, 32], strides = [1, 1]} : vector<144x32xf32> to vector<16x32xf32>
    %cst_61 = arith.constant dense<0.000000e+00> : vector<56x32xf32>
    %157 = tpu.matmul %155, %156, %cst_61 {dimension_numbers = #tpu.dot_dimension_numbers<[1], [0], [0], [1], [0, 0, 1, 1], [], []>} : vector<56x16xf32>, vector<16x32xf32>, vector<56x32xf32> -> vector<56x32xf32>
    %158 = arith.addf %154, %157 : vector<56x32xf32>
    %159 = vector.extract_strided_slice %125 {offsets = [448, 0], sizes = [56, 16], strides = [1, 1]} : vector<504x16xf32> to vector<56x16xf32>
    %160 = vector.extract_strided_slice %2 {offsets = [128, 0], sizes = [16, 32], strides = [1, 1]} : vector<144x32xf32> to vector<16x32xf32>
    %cst_62 = arith.constant dense<0.000000e+00> : vector<56x32xf32>
    %161 = tpu.matmul %159, %160, %cst_62 {dimension_numbers = #tpu.dot_dimension_numbers<[1], [0], [0], [1], [0, 0, 1, 1], [], []>} : vector<56x16xf32>, vector<16x32xf32>, vector<56x32xf32> -> vector<56x32xf32>
    %162 = arith.addf %158, %161 : vector<56x32xf32>
    %163 = vector.extract_strided_slice %162 {offsets = [0, 0], sizes = [49, 32], strides = [1, 1]} : vector<56x32xf32> to vector<49x32xf32>
    %164 = vector.broadcast %3 : vector<1x32xf32> to vector<49x32xf32>
    %165 = arith.addf %163, %164 : vector<49x32xf32>
    %cst_63 = arith.constant 0.000000e+00 : f32
    %166 = vector.broadcast %cst_63 : f32 to vector<49x32xf32>
    %167 = arith.maximumf %165, %166 : vector<49x32xf32>
    %168 = arith.addf %167, %4 : vector<49x32xf32>
    %cst_64 = arith.constant dense<0.000000e+00> : vector<49x32xf32>
    %169 = tpu.matmul %168, %5, %cst_64 {dimension_numbers = #tpu.dot_dimension_numbers<[1], [0], [0], [1], [0, 0, 1, 1], [], []>} : vector<49x32xf32>, vector<32x32xf32>, vector<49x32xf32> -> vector<49x32xf32>
    %170 = vector.broadcast %6 : vector<1x32xf32> to vector<49x32xf32>
    %171 = arith.addf %169, %170 : vector<49x32xf32>
    %172 = tpu.transpose %171, [1, 0] : vector<49x32xf32> -> vector<32x49xf32>
    %cst_65 = arith.constant dense<0.000000e+00> : vector<33x49xf32>
    %173 = tpu.matmul %7, %172, %cst_65 {dimension_numbers = #tpu.dot_dimension_numbers<[1], [0], [0], [1], [0, 0, 1, 1], [], []>} : vector<33x32xf32>, vector<32x49xf32>, vector<33x49xf32> -> vector<33x49xf32>
    %174 = vector.extract_strided_slice %173 {offsets = [0, 0], sizes = [32, 49], strides = [1, 1]} : vector<33x49xf32> to vector<32x49xf32>
    %175 = vector.extract_strided_slice %173 {offsets = [32, 0], sizes = [1, 49], strides = [1, 1]} : vector<33x49xf32> to vector<1x49xf32>
    %cst_66 = arith.constant dense<0.000000e+00> : vector<10x49xf32>
    %176 = tpu.matmul %8, %174, %cst_66 {dimension_numbers = #tpu.dot_dimension_numbers<[1], [0], [0], [1], [0, 0, 1, 1], [], []>} : vector<10x32xf32>, vector<32x49xf32>, vector<10x49xf32> -> vector<10x49xf32>
    %177 = vector.broadcast %175 : vector<1x49xf32> to vector<10x49xf32>
    %178 = arith.addf %176, %177 : vector<10x49xf32>
    %179 = arith.negf %178 : vector<10x49xf32>
    %180 = math.exp %179 : vector<10x49xf32>
    %cst_67 = arith.constant 1.000000e+00 : f32
    %181 = vector.broadcast %cst_67 : f32 to vector<10x49xf32>
    %182 = arith.addf %181, %180 : vector<10x49xf32>
    %183 = arith.divf %181, %182 : vector<10x49xf32>
    %cst_68 = arith.constant dense<0.000000e+00> : vector<10xf32>
    %184 = vector.multi_reduction <add>, %183, %cst_68 [1] : vector<10x49xf32> to vector<10xf32>
    %185 = vector.shape_cast %184 : vector<10xf32> to vector<10x1xf32>
    %cst_69 = arith.constant 9.99999993E-9 : f32
    %186 = vector.broadcast %cst_69 : f32 to vector<10x1xf32>
    %187 = arith.addf %185, %186 : vector<10x1xf32>
    %188 = vector.broadcast %187 : vector<10x1xf32> to vector<10x49xf32>
    %189 = arith.divf %183, %188 : vector<10x49xf32>
    %cst_70 = arith.constant dense<0.000000e+00> : vector<10x32xf32>
    %190 = tpu.matmul %189, %167, %cst_70 {dimension_numbers = #tpu.dot_dimension_numbers<[1], [0], [0], [1], [0, 0, 1, 1], [], []>} : vector<10x49xf32>, vector<49x32xf32>, vector<10x32xf32> -> vector<10x32xf32>
    %cst_71 = arith.constant dense<0.000000e+00> : vector<10x49xf32>
    %191 = tpu.matmul %190, %174, %cst_71 {dimension_numbers = #tpu.dot_dimension_numbers<[1], [0], [0], [1], [0, 0, 1, 1], [], []>} : vector<10x32xf32>, vector<32x49xf32>, vector<10x49xf32> -> vector<10x49xf32>
    %192 = vector.broadcast %175 : vector<1x49xf32> to vector<10x49xf32>
    %193 = arith.addf %191, %192 : vector<10x49xf32>
    %194 = arith.negf %193 : vector<10x49xf32>
    %195 = math.exp %194 : vector<10x49xf32>
    %cst_72 = arith.constant 1.000000e+00 : f32
    %196 = vector.broadcast %cst_72 : f32 to vector<10x49xf32>
    %197 = arith.addf %196, %195 : vector<10x49xf32>
    %198 = arith.divf %196, %197 : vector<10x49xf32>
    %cst_73 = arith.constant dense<0.000000e+00> : vector<10xf32>
    %199 = vector.multi_reduction <add>, %198, %cst_73 [1] : vector<10x49xf32> to vector<10xf32>
    %200 = vector.shape_cast %199 : vector<10xf32> to vector<10x1xf32>
    %cst_74 = arith.constant 9.99999993E-9 : f32
    %201 = vector.broadcast %cst_74 : f32 to vector<10x1xf32>
    %202 = arith.addf %200, %201 : vector<10x1xf32>
    %203 = vector.broadcast %202 : vector<10x1xf32> to vector<10x49xf32>
    %204 = arith.divf %198, %203 : vector<10x49xf32>
    %cst_75 = arith.constant dense<0.000000e+00> : vector<10x32xf32>
    %205 = tpu.matmul %204, %167, %cst_75 {dimension_numbers = #tpu.dot_dimension_numbers<[1], [0], [0], [1], [0, 0, 1, 1], [], []>} : vector<10x49xf32>, vector<49x32xf32>, vector<10x32xf32> -> vector<10x32xf32>
    %cst_76 = arith.constant dense<0.000000e+00> : vector<10x49xf32>
    %206 = tpu.matmul %205, %174, %cst_76 {dimension_numbers = #tpu.dot_dimension_numbers<[1], [0], [0], [1], [0, 0, 1, 1], [], []>} : vector<10x32xf32>, vector<32x49xf32>, vector<10x49xf32> -> vector<10x49xf32>
    %207 = vector.broadcast %175 : vector<1x49xf32> to vector<10x49xf32>
    %208 = arith.addf %206, %207 : vector<10x49xf32>
    %209 = arith.negf %208 : vector<10x49xf32>
    %210 = math.exp %209 : vector<10x49xf32>
    %cst_77 = arith.constant 1.000000e+00 : f32
    %211 = vector.broadcast %cst_77 : f32 to vector<10x49xf32>
    %212 = arith.addf %211, %210 : vector<10x49xf32>
    %213 = arith.divf %211, %212 : vector<10x49xf32>
    %cst_78 = arith.constant dense<0.000000e+00> : vector<10xf32>
    %214 = vector.multi_reduction <add>, %213, %cst_78 [1] : vector<10x49xf32> to vector<10xf32>
    %215 = vector.shape_cast %214 : vector<10xf32> to vector<10x1xf32>
    %cst_79 = arith.constant 9.99999993E-9 : f32
    %216 = vector.broadcast %cst_79 : f32 to vector<10x1xf32>
    %217 = arith.addf %215, %216 : vector<10x1xf32>
    %218 = vector.broadcast %217 : vector<10x1xf32> to vector<10x49xf32>
    %219 = arith.divf %213, %218 : vector<10x49xf32>
    %cst_80 = arith.constant dense<0.000000e+00> : vector<10x32xf32>
    %220 = tpu.matmul %219, %167, %cst_80 {dimension_numbers = #tpu.dot_dimension_numbers<[1], [0], [0], [1], [0, 0, 1, 1], [], []>} : vector<10x49xf32>, vector<49x32xf32>, vector<10x32xf32> -> vector<10x32xf32>
    %c1 = arith.constant 1 : index
    %c0_81 = arith.constant 0 : index
    %c0_82 = arith.constant 0 : index
    %221 = vector.load %arg7[%c1, %c0_81, %c0_82] : memref<2x10x49xf32, #tpu.memory_space<vmem>>, vector<1x10x49xf32>
    %222 = vector.shape_cast %221 : vector<1x10x49xf32> to vector<10x49xf32>
    %223 = vector.shape_cast %213 : vector<10x49xf32> to vector<1x10x49xf32>
    tpu.vector_store %arg7[%c1, %c0_81, %c0_82], %223 {strides = array<i32>} : memref<2x10x49xf32, #tpu.memory_space<vmem>>, vector<1x10x49xf32>,
    %c1_83 = arith.constant 1 : index
    %c0_84 = arith.constant 0 : index
    %c0_85 = arith.constant 0 : index
    %224 = vector.load %arg8[%c1_83, %c0_84, %c0_85] : memref<2x10x32xf32, #tpu.memory_space<vmem>>, vector<1x10x32xf32>
    %225 = vector.shape_cast %224 : vector<1x10x32xf32> to vector<10x32xf32>
    %226 = vector.shape_cast %220 : vector<10x32xf32> to vector<1x10x32xf32>
    tpu.vector_store %arg8[%c1_83, %c0_84, %c0_85], %226 {strides = array<i32>} : memref<2x10x32xf32, #tpu.memory_space<vmem>>, vector<1x10x32xf32>,
    %cst_86 = arith.constant dense<0.000000e+00> : vector<10xf32>
    %227 = vector.multi_reduction <add>, %213, %cst_86 [1] : vector<10x49xf32> to vector<10xf32>
    %228 = math.tanh %227 : vector<10xf32>
    %229 = vector.shape_cast %228 : vector<10xf32> to vector<1x10xf32>
    %c1_87 = arith.constant 1 : index
    %c0_88 = arith.constant 0 : index
    %230 = vector.load %arg9[%c1_87, %c0_88] : memref<2x10xf32, #tpu.memory_space<vmem>>, vector<1x10xf32>
    tpu.vector_store %arg9[%c1_87, %c0_88], %229 {strides = array<i32>} : memref<2x10xf32, #tpu.memory_space<vmem>>, vector<1x10xf32>,
    %c0_89 = arith.constant 0 : index
    %c0_90 = arith.constant 0 : index
    %231 = vector.load %arg9[%c0_89, %c0_90] : memref<2x10xf32, #tpu.memory_space<vmem>>, vector<2x10xf32>
    %c328 = arith.constant 328 : index
    %c0_91 = arith.constant 0 : index
    %232 = vector.load %arg3[%c328, %c0_91] : memref<376x32xf32, #tpu.memory_space<vmem>>, vector<10x10xf32>
    %cst_92 = arith.constant dense<0.000000e+00> : vector<2x10xf32>
    %233 = tpu.matmul %231, %232, %cst_92 {dimension_numbers = #tpu.dot_dimension_numbers<[1], [0], [0], [1], [0, 0, 1, 1], [], []>} : vector<2x10xf32>, vector<10x10xf32>, vector<2x10xf32> -> vector<2x10xf32>
    %c344 = arith.constant 344 : index
    %c0_93 = arith.constant 0 : index
    %234 = vector.load %arg3[%c344, %c0_93] : memref<376x32xf32, #tpu.memory_space<vmem>>, vector<1x10xf32>
    %235 = vector.broadcast %234 : vector<1x10xf32> to vector<2x10xf32>
    %236 = arith.addf %233, %235 : vector<2x10xf32>
    %cst_94 = arith.constant 0.000000e+00 : f32
    %237 = vector.broadcast %cst_94 : f32 to vector<2x10xf32>
    %238 = arith.maximumf %236, %237 : vector<2x10xf32>
    %c352 = arith.constant 352 : index
    %c0_95 = arith.constant 0 : index
    %239 = vector.load %arg3[%c352, %c0_95] : memref<376x32xf32, #tpu.memory_space<vmem>>, vector<10x3xf32>
    %cst_96 = arith.constant dense<0.000000e+00> : vector<2x3xf32>
    %240 = tpu.matmul %238, %239, %cst_96 {dimension_numbers = #tpu.dot_dimension_numbers<[1], [0], [0], [1], [0, 0, 1, 1], [], []>} : vector<2x10xf32>, vector<10x3xf32>, vector<2x3xf32> -> vector<2x3xf32>
    %c368 = arith.constant 368 : index
    %c0_97 = arith.constant 0 : index
    %241 = vector.load %arg3[%c368, %c0_97] : memref<376x32xf32, #tpu.memory_space<vmem>>, vector<1x3xf32>
    %242 = vector.broadcast %241 : vector<1x3xf32> to vector<2x3xf32>
    %243 = arith.addf %240, %242 : vector<2x3xf32>
    %c0_98 = arith.constant 0 : index
    %c0_99 = arith.constant 0 : index
    %244 = vector.load %arg4[%c0_98, %c0_99] : memref<32x784xf32, #tpu.memory_space<vmem>>, vector<10x400xf32>
    %c16_100 = arith.constant 16 : index
    %c0_101 = arith.constant 0 : index
    %245 = vector.load %arg4[%c16_100, %c0_101] : memref<32x784xf32, #tpu.memory_space<vmem>>, vector<1x400xf32>
    %c24_102 = arith.constant 24 : index
    %c0_103 = arith.constant 0 : index
    %246 = vector.load %arg4[%c24_102, %c0_103] : memref<32x784xf32, #tpu.memory_space<vmem>>, vector<1x784xf32>
    %cst_104 = arith.constant dense<0.000000e+00> : vector<2x400xf32>
    %247 = tpu.matmul %231, %244, %cst_104 {dimension_numbers = #tpu.dot_dimension_numbers<[1], [0], [0], [1], [0, 0, 1, 1], [], []>} : vector<2x10xf32>, vector<10x400xf32>, vector<2x400xf32> -> vector<2x400xf32>
    %248 = vector.broadcast %245 : vector<1x400xf32> to vector<2x400xf32>
    %249 = arith.addf %247, %248 : vector<2x400xf32>
    %cst_105 = arith.constant 0.000000e+00 : f32
    %250 = vector.broadcast %cst_105 : f32 to vector<2x400xf32>
    %251 = arith.maximumf %249, %250 : vector<2x400xf32>
    %c0_106 = arith.constant 0 : index
    %c0_107 = arith.constant 0 : index
    %252 = vector.load %arg5[%c0_106, %c0_107] : memref<400x784xbf16, #tpu.memory_space<vmem>>, vector<400x784xbf16>
    %253 = arith.truncf %251 : vector<2x400xf32> to vector<2x400xbf16>
    %cst_108 = arith.constant dense<0.000000e+00> : vector<2x784xf32>
    %254 = tpu.matmul %253, %252, %cst_108 {dimension_numbers = #tpu.dot_dimension_numbers<[1], [0], [0], [1], [0, 0, 1, 1], [], []>} : vector<2x400xbf16>, vector<400x784xbf16>, vector<2x784xf32> -> vector<2x784xf32>
    %255 = vector.broadcast %246 : vector<1x784xf32> to vector<2x784xf32>
    %256 = arith.addf %254, %255 : vector<2x784xf32>
    %257 = math.tanh %256 : vector<2x784xf32>
    %c0_109 = arith.constant 0 : index
    %c0_110 = arith.constant 0 : index
    %258 = vector.load %arg6[%c0_109, %c0_110] : memref<2x1027xf32, #tpu.memory_space<vmem>>, vector<2x784xf32>
    tpu.vector_store %arg6[%c0_109, %c0_110], %257 {strides = array<i32>} : memref<2x1027xf32, #tpu.memory_space<vmem>>, vector<2x784xf32>,
    %cst_111 = arith.constant 5.000000e-01 : f32
    %259 = vector.broadcast %cst_111 : f32 to vector<2x10xf32>
    %260 = arith.subf %231, %259 : vector<2x10xf32>
    %cst_112 = arith.constant 2.000000e+00 : f32
    %261 = vector.broadcast %cst_112 : f32 to vector<2x10xf32>
    %262 = arith.mulf %260, %261 : vector<2x10xf32>
    %c0_113 = arith.constant 0 : index
    %c896 = arith.constant 896 : index
    %263 = vector.load %arg6[%c0_113, %c896] : memref<2x1027xf32, #tpu.memory_space<vmem>>, vector<2x10xf32>
    tpu.vector_store %arg6[%c0_113, %c896], %262 {strides = array<i32>} : memref<2x1027xf32, #tpu.memory_space<vmem>>, vector<2x10xf32>,
    %c0_114 = arith.constant 0 : index
    %c1024 = arith.constant 1024 : index
    %264 = vector.load %arg6[%c0_114, %c1024] : memref<2x1027xf32, #tpu.memory_space<vmem>>, vector<2x3xf32>
    tpu.vector_store %arg6[%c0_114, %c1024], %243 {strides = array<i32>} : memref<2x1027xf32, #tpu.memory_space<vmem>>, vector<2x3xf32>,
    return
  }
  func.func @transform_0(%arg0: i32) -> (i32, i32) {
    %c0_i32 = arith.constant 0 : i32
    %c0_i32_0 = arith.constant 0 : i32
    %c0_i32_1 = arith.constant 0 : i32
    return %c0_i32, %c0_i32_0 : i32, i32
  }
  func.func @transform_1(%arg0: i32) -> (i32, i32) {
    %c0_i32 = arith.constant 0 : i32
    %c0_i32_0 = arith.constant 0 : i32
    %c0_i32_1 = arith.constant 0 : i32
    return %c0_i32, %c0_i32_0 : i32, i32
  }
  func.func @transform_2(%arg0: i32) -> (i32, i32) {
    %c0_i32 = arith.constant 0 : i32
    %c0_i32_0 = arith.constant 0 : i32
    %c0_i32_1 = arith.constant 0 : i32
    return %c0_i32, %c0_i32_0 : i32, i32
  }
  func.func @transform_3(%arg0: i32) -> (i32, i32) {
    %c0_i32 = arith.constant 0 : i32
    %c0_i32_0 = arith.constant 0 : i32
    %c0_i32_1 = arith.constant 0 : i32
    return %c0_i32, %c0_i32_0 : i32, i32
  }
  func.func @transform_4(%arg0: i32) -> (i32, i32) {
    %c0_i32 = arith.constant 0 : i32
    %c0_i32_0 = arith.constant 0 : i32
    %c0_i32_1 = arith.constant 0 : i32
    return %c0_i32, %c0_i32_0 : i32, i32
  }
  func.func @transform_5(%arg0: i32) -> (i32, i32) {
    %c0_i32 = arith.constant 0 : i32
    %c0_i32_0 = arith.constant 0 : i32
    %c0_i32_1 = arith.constant 0 : i32
    return %c0_i32, %c0_i32_0 : i32, i32
  }
  func.func @transform_6(%arg0: i32) -> (i32, i32, i32) {
    %c0_i32 = arith.constant 0 : i32
    %c0_i32_0 = arith.constant 0 : i32
    %c0_i32_1 = arith.constant 0 : i32
    %c0_i32_2 = arith.constant 0 : i32
    return %c0_i32, %c0_i32_0, %c0_i32_1 : i32, i32, i32
  }
  func.func @transform_7(%arg0: i32) -> (i32, i32, i32) {
    %c0_i32 = arith.constant 0 : i32
    %c0_i32_0 = arith.constant 0 : i32
    %c0_i32_1 = arith.constant 0 : i32
    %c0_i32_2 = arith.constant 0 : i32
    return %c0_i32, %c0_i32_0, %c0_i32_1 : i32, i32, i32
  }
}

</mosaic_0001>

<bundles_post_ra>
// kernel: concept_autoencoder_forward.1
= control target key start
LH: loop header
LB: loop body
LE: loop exit
PB: predicated region body
PF: predicated region fallthrough
CT: control target
= control target key end

     0   :  { %vm459_vm0 = vcmask 1040384   ;;  %vm308_vm1 = vcmask 72704   ;;  %v13294_v28 = vmov 0.0   ;;  %vm828_vm2 = vcmask 556032   ;;  %s13185_s2 = inlined_call_operand.vmem [shape: f32[376,32], index: 2, kind: input, shape index: {}]   ;;  %s13186_s0 = inlined_call_operand.vmem [shape: f32[400,9], index: 0, kind: input, shape index: {}]   ;;  %s13187_s1 = inlined_call_operand.vmem [shape: bf16[504,196], index: 1, kind: input, shape index: {}]   ;;  %s13188_s6 = inlined_call_operand.vmem [shape: f32[2,10,49], index: 6, kind: output, shape index: {1}]   ;;  %s13189_s7 = inlined_call_operand.vmem [shape: f32[2,10,32], index: 7, kind: output, shape index: {2}]   ;;  %s13190_s5 = inlined_call_operand.vmem [shape: f32[2,1027], index: 5, kind: output, shape index: {0}]   ;;  %s13191_s3 = inlined_call_operand.vmem [shape: f32[32,784], index: 3, kind: input, shape index: {}]   ;;  %s13192_s4 = inlined_call_operand.vmem [shape: bf16[400,784], index: 4, kind: input, shape index: {}]  }
   0x1   :  { %v25_v0 = vld [vmem:[%s13185_s2 + $0x8] sm:$0x1]  ;;  %v24_v1 = vld [vmem:[%s13185_s2] sm:$0xff]  ;;  %v256_v4 = vld [vmem:[%s13186_s0 + $0x10] sm:$0xff]  ;;  %1022 = vmatprep.subr.mxu1 %v13294_v28  ;;  %vm1018_vm3 = vcmask 1043456   ;;  %vm9848_vm4 = vmmov 0  }
   0x2   :  { %v254_v2 = vld [vmem:[%s13186_s0] sm:$0xff]  ;;  %8634 = vmatprep.subr.msk.mxu0 %vm459_vm0, %v25_v0  ;;  %v255_v3 = vld [vmem:[%s13186_s0 + $0x8] sm:$0xff]  ;;  %v257_v5 = vld [vmem:[%s13186_s0 + $0x18] sm:$0xff]  ;;  %vm1402_vm5 = vcmask 130048   ;;  %vm2570_vm6 = vcmask 261120   ;;  %vm2915_vm7 = vcmask 400384  }
   0x3   :  { %8638 = vmatprep.mubr.msk.f32.mxu0 %vm308_vm1, %v254_v2  ;;  %8635 = vmatpush3.msk.msra.mxu0 %vm459_vm0, %v25_v0  ;;  %v258_v6 = vld [vmem:[%s13186_s0 + $0x20] sm:$0xff]  ;;  %v259_v7 = vld [vmem:[%s13186_s0 + $0x28] sm:$0xff]  ;;  %v260_v8 = vld [vmem:[%s13186_s0 + $0x30] sm:$0xff]  ;;  %vm2919_vm8 = vcmask 394240   ;;  %vm3405_vm9 = vcmask 130112   ;;  %vm3408_vm10 = vcmask 73728  }
   0x4   :  { %8636 = vmatprep.subr.mxu0 %v24_v1  ;;  %v261_v9 = vld [vmem:[%s13186_s0 + $0x38] sm:$0xff]  ;;  %v262_v10 = vld [vmem:[%s13186_s0 + $0x40] sm:$0xff]  ;;  %v263_v11 = vld [vmem:[%s13186_s0 + $0x48] sm:$0xff]  ;;  %vm3388_vm11 = vcmask 254976   ;;  %vm5776_vm12 = vcmask 1041408   ;;  %vm5772_vm13 = vcmask 80896  }
   0x5   :  { %8637 = vmatpush3.msra.mxu0 %v24_v1  ;;  %v264_v12 = vld [vmem:[%s13186_s0 + $0x50] sm:$0xff]  ;;  %v265_v13 = vld [vmem:[%s13186_s0 + $0x58] sm:$0xff]  ;;  %v266_v14 = vld [vmem:[%s13186_s0 + $0x60] sm:$0xff]  ;;  %vm7653_vm14 = vcmask 74752   ;;  %vm7655_vm15 = vcmask 17408  }
   0x6   :  { %8639 = vmatmul.mubr.msk.f32.vlgmr.msra.gmra.mxu0 %vm308_vm1, %v255_v3  ;;  %v267_v15 = vld [vmem:[%s13186_s0 + $0x68] sm:$0xff]  ;;  %v268_v16 = vld [vmem:[%s13186_s0 + $0x70] sm:$0xff]  ;;  %v269_v17 = vld [vmem:[%s13186_s0 + $0x78] sm:$0xff]  ;;  %8713 = vmatprep.subr.mxu0 %v13294_v28 }
   0x7   :  { %8641 = vmatprep.mubr.msk.f32.mxu0 %vm308_vm1, %v256_v4  ;;  %v270_v18 = vld [vmem:[%s13186_s0 + $0x80] sm:$0xff]  ;;  %v271_v19 = vld [vmem:[%s13186_s0 + $0x88] sm:$0xff]  ;;  %v272_v20 = vld [vmem:[%s13186_s0 + $0x90] sm:$0xff] }
   0x8   :  { %v273_v21 = vld [vmem:[%s13186_s0 + $0x98] sm:$0xff]  ;;  %v274_v22 = vld [vmem:[%s13186_s0 + $0xa0] sm:$0xff]  ;;  %v275_v23 = vld [vmem:[%s13186_s0 + $0xa8] sm:$0xff] }
   0x9   :  { %v276_v24 = vld [vmem:[%s13186_s0 + $0xb0] sm:$0xff]  ;;  %v277_v25 = vld [vmem:[%s13186_s0 + $0xb8] sm:$0xff]  ;;  %v278_v26 = vld [vmem:[%s13186_s0 + $0xc0] sm:$0xff] }
   0xa   :  { %8642 = vmatmul.mubr.msk.f32.gmra.mxu0 %vm308_vm1, %v257_v5  ;;  %v279_v27 = vld [vmem:[%s13186_s0 + $0xc8] sm:$0xff]  ;;  %v10008_v29 = vld [vmem:[%s13187_s1] sm:$0xff]  ;;  %v10025_v45 = vld [vmem:[%s13185_s2 + $0x10] ss:$0 sm:$0xff] }
   0xb   :  { %8644 = vmatprep.mubr.msk.f32.mxu0 %vm308_vm1, %v258_v6  ;;  %v13293_v30 = vunpack.c.h.bf16 %v10008_v29 }
   0xd   :  { %7722 = vmatprep.mubr.msk.f32.mxu1 %vm828_vm2, %v13293_v30 }
   0xe   :  { %8645 = vmatmul.mubr.msk.f32.gmra.mxu0 %vm308_vm1, %v259_v7 }
   0xf   :  { %8647 = vmatprep.mubr.msk.f32.mxu0 %vm308_vm1, %v260_v8 }
  0x12   :  { %8648 = vmatmul.mubr.msk.f32.gmra.mxu0 %vm308_vm1, %v261_v9 }
  0x13   :  { %8650 = vmatprep.mubr.msk.f32.mxu0 %vm308_vm1, %v262_v10 }
  0x16   :  { %8651 = vmatmul.mubr.msk.f32.gmra.mxu0 %vm308_vm1, %v263_v11 }
  0x17   :  { %8653 = vmatprep.mubr.msk.f32.mxu0 %vm308_vm1, %v264_v12 }
  0x1a   :  { %8654 = vmatmul.mubr.msk.f32.gmra.mxu0 %vm308_vm1, %v265_v13 }
  0x1b   :  { %8656 = vmatprep.mubr.msk.f32.mxu0 %vm308_vm1, %v266_v14 }
  0x1e   :  { %8657 = vmatmul.mubr.msk.f32.gmra.mxu0 %vm308_vm1, %v267_v15 }
  0x1f   :  { %8659 = vmatprep.mubr.msk.f32.mxu0 %vm308_vm1, %v268_v16 }
  0x22   :  { %8660 = vmatmul.mubr.msk.f32.gmra.mxu0 %vm308_vm1, %v269_v17 }
  0x23   :  { %8662 = vmatprep.mubr.msk.f32.mxu0 %vm308_vm1, %v270_v18 }
  0x26   :  { %8663 = vmatmul.mubr.msk.f32.gmra.mxu0 %vm308_vm1, %v271_v19 }
  0x27   :  { %8665 = vmatprep.mubr.msk.f32.mxu0 %vm308_vm1, %v272_v20 }
  0x2a   :  { %8666 = vmatmul.mubr.msk.f32.gmra.mxu0 %vm308_vm1, %v273_v21 }
  0x2b   :  { %8668 = vmatprep.mubr.msk.f32.mxu0 %vm308_vm1, %v274_v22 }
  0x2e   :  { %8669 = vmatmul.mubr.msk.f32.gmra.mxu0 %vm308_vm1, %v275_v23 }
  0x2f   :  { %8671 = vmatprep.mubr.msk.f32.mxu0 %vm308_vm1, %v276_v24 }
  0x32   :  { %8672 = vmatmul.mubr.msk.f32.gmra.mxu0 %vm308_vm1, %v277_v25 }
  0x33   :  { %8674 = vmatprep.mubr.msk.f32.mxu0 %vm308_vm1, %v278_v26 }
  0x36   :  { %8675 = vmatmul.mubr.msk.f32.gmra.mxu0 %vm308_vm1, %v279_v27 }
  0xc6   :  { %v10014_v31 = vpop.f32.mrf.mxu0 }
  0xc7   :  { %v535_v19 = vadd.f32 %v10014_v31, %v10025_v45 }
  0xc8   :  { %v10016_v32 = vpop.f32.mrf.mxu0 }
  0xc9   :  { %v530_v22 = vadd.f32 %v10025_v45, %v10016_v32  ;;  %v779_v24 = vmax.f32 %v535_v19, 0.0  ;;  %v280_v19 = vld [vmem:[%s13186_s0 + $0xd0] sm:$0xff] }
  0xca   :  { %v10018_v33 = vpop.f32.mrf.mxu0  ;;  %8677 = vmatprep.mubr.msk.f32.mxu0 %vm308_vm1, %v280_v19  ;;  %v290_v19 = vld [vmem:[%s13186_s0 + $0x120] sm:$0xff] }
  0xcb   :  { %v545_v14 = vadd.f32 %v10018_v33, %v10025_v45  ;;  %v778_v26 = vmax.f32 %v530_v22, 0.0  ;;  %v10245_v22 = vld [vmem:[%s13187_s1 + $0x68] sm:$0xff] }
  0xcc   :  { %v10020_v34 = vpop.f32.mrf.mxu0  ;;  %13454 = vst [vmem:[#allocation14_spill] sm:$0xff] %v10245_v22 }
  0xcd   :  { %v540_v17 = vadd.f32 %v10025_v45, %v10020_v34  ;;  %v781_v20 = vmax.f32 %v545_v14, 0.0 }
  0xce   :  { %v8646_v35 = vpop.f32.mrf.mxu0 }
  0xcf   :  { %v555_v9 = vadd.f32 %v8646_v35, %v10025_v45  ;;  %v780_v23 = vmax.f32 %v540_v17, 0.0  ;;  %v10226_v17 = vld [vmem:[%s13187_s1 + $0x60] sm:$0xff] }
  0xd0   :  { %v549_v36 = vpop.f32.mrf.mxu0  ;;  %13453 = vst [vmem:[#allocation13_spill] sm:$0xff] %v10226_v17 }
  0xd1   :  { %v550_v12 = vadd.f32 %v10025_v45, %v549_v36  ;;  %v783_v15 = vmax.f32 %v555_v9, 0.0 }
  0xd2   :  { %v8649_v37 = vpop.f32.mrf.mxu0 }
  0xd3   :  { %v565_v4 = vadd.f32 %v8649_v37, %v10025_v45  ;;  %v782_v18 = vmax.f32 %v550_v12, 0.0 }
  0xd4   :  { %v559_v38 = vpop.f32.mrf.mxu0 }
  0xd5   :  { %v560_v7 = vadd.f32 %v10025_v45, %v559_v38  ;;  %v785_v10 = vmax.f32 %v565_v4, 0.0  ;;  %v10178_v4 = vld [vmem:[%s13187_s1 + $0x40] sm:$0xff] }
  0xd6   :  { %v8652_v39 = vpop.f32.mrf.mxu0  ;;  %13449 = vst [vmem:[#allocation9_spill] sm:$0xff] %v10178_v4 }
  0xd7   :  { %v575_v62 = vadd.f32 %v8652_v39, %v10025_v45  ;;  %v784_v13 = vmax.f32 %v560_v7, 0.0  ;;  %v10190_v7 = vld [vmem:[%s13187_s1 + $0x48] sm:$0xff] }
  0xd8   :  { %v569_v40 = vpop.f32.mrf.mxu0  ;;  %13450 = vst [vmem:[#allocation10_spill] sm:$0xff] %v10190_v7  ;;  %v13245_v9 = vunpack.c.h.bf16 %v10190_v7 }
  0xd9   :  { %v570_v1 = vadd.f32 %v10025_v45, %v569_v40  ;;  %v787_v5 = vmax.f32 %v575_v62, 0.0  ;;  %v10154_v62 = vld [vmem:[%s13187_s1 + $0x30] sm:$0xff] }
  0xda   :  { %v8655_v41 = vpop.f32.mrf.mxu0  ;;  %13447 = vst [vmem:[#allocation7_spill] sm:$0xff] %v10154_v62 }
  0xdb   :  { %v585_v56 = vadd.f32 %v8655_v41, %v10025_v45  ;;  %v786_v8 = vmax.f32 %v570_v1, 0.0  ;;  %v10166_v1 = vld [vmem:[%s13187_s1 + $0x38] sm:$0xff] }
  0xdc   :  { %v579_v42 = vpop.f32.mrf.mxu0  ;;  %13448 = vst [vmem:[#allocation8_spill] sm:$0xff] %v10166_v1 }
  0xdd   :  { %v580_v59 = vadd.f32 %v10025_v45, %v579_v42  ;;  %v789_v63 = vmax.f32 %v585_v56, 0.0  ;;  %v10130_v56 = vld [vmem:[%s13187_s1 + $0x20] sm:$0xff] }
  0xde   :  { %v8658_v43 = vpop.f32.mrf.mxu0  ;;  %13445 = vst [vmem:[#allocation5_spill] sm:$0xff] %v10130_v56 }
  0xdf   :  { %v595_v49 = vadd.f32 %v8658_v43, %v10025_v45  ;;  %v788_v2 = vmax.f32 %v580_v59, 0.0  ;;  %v10142_v59 = vld [vmem:[%s13187_s1 + $0x28] sm:$0xff] }
  0xe0   :  { %v589_v44 = vpop.f32.mrf.mxu0  ;;  %13446 = vst [vmem:[#allocation6_spill] sm:$0xff] %v10142_v59 }
  0xe1   :  { %v590_v53 = vadd.f32 %v10025_v45, %v589_v44  ;;  %v791_v57 = vmax.f32 %v595_v49, 0.0 }
  0xe2   :  { %v8661_v46 = vpop.f32.mrf.mxu0 }
  0xe3   :  { %v605_v47 = vadd.f32 %v8661_v46, %v10025_v45  ;;  %v790_v60 = vmax.f32 %v590_v53, 0.0  ;;  %v10096_v46 = vld [vmem:[%s13187_s1 + $0x8] sm:$0xff]  ;;  %v10118_v53 = vld [vmem:[%s13187_s1 + $0x18] sm:$0xff] }
  0xe4   :  { %v599_v48 = vpop.f32.mrf.mxu0  ;;  %13444 = vst [vmem:[#allocation4_spill] sm:$0xff] %v10118_v53 }
  0xe5   :  { %v793_v50 = vmax.f32 %v605_v47, 0.0  ;;  %v600_v51 = vadd.f32 %v10025_v45, %v599_v48  ;;  %v13290_v48 = vunpack.c.l.bf16 %v10008_v29 }
  0xe6   :  { %v10030_v52 = vpop.f32.mrf.mxu0 }
  0xe7   :  { %v792_v54 = vmax.f32 %v600_v51, 0.0  ;;  %1023 = vmatpush1.msra.mxu1 %v793_v50  ;;  %v615_v41 = vadd.f32 %v10030_v52, %v10025_v45  ;;  %v13289_v50 = vunpack.c.h.bf16 %v10096_v46  ;;  %v13286_v51 = vunpack.c.l.bf16 %v10096_v46 }
  0xe8   :  { %1024 = vmatprep.subr.mxu1 %v13294_v28  ;;  %v10034_v55 = vpop.f32.mrf.mxu0 }
  0xe9   :  { %1025 = vmatpush1.msra.mxu1 %v792_v54  ;;  %v610_v43 = vadd.f32 %v10025_v45, %v10034_v55  ;;  %v795_v47 = vmax.f32 %v615_v41, 0.0  ;;  %v13281_v55 = vunpack.c.h.bf16 %v10118_v53 }
  0xea   :  { %1026 = vmatprep.subr.mxu1 %v13294_v28  ;;  %v10038_v58 = vpop.f32.mrf.mxu0 }
  0xeb   :  { %1027 = vmatpush1.msra.mxu1 %v791_v57  ;;  %v625_v37 = vadd.f32 %v10038_v58, %v10025_v45  ;;  %v794_v49 = vmax.f32 %v610_v43, 0.0  ;;  %v13278_v57 = vunpack.c.l.bf16 %v10118_v53  ;;  %v13275_v58 = vunpack.c.h.bf16 %v10130_v56  ;;  %v289_v43 = vld [vmem:[%s13186_s0 + $0x118] sm:$0xff] }
  0xec   :  { %1028 = vmatprep.subr.mxu1 %v13294_v28  ;;  %v10042_v61 = vpop.f32.mrf.mxu0 }
  0xed   :  { %1029 = vmatpush1.msra.mxu1 %v790_v60  ;;  %v620_v39 = vadd.f32 %v10025_v45, %v10042_v61  ;;  %v797_v42 = vmax.f32 %v625_v37, 0.0  ;;  %v13272_v60 = vunpack.c.l.bf16 %v10130_v56  ;;  %v13269_v61 = vunpack.c.h.bf16 %v10142_v59  ;;  %v286_v37 = vld [vmem:[%s13186_s0 + $0x100] sm:$0xff] }
  0xee   :  { %1030 = vmatprep.subr.mxu1 %v13294_v28  ;;  %v8670_v0 = vpop.f32.mrf.mxu0 }
  0xef   :  { %1031 = vmatpush1.msra.mxu1 %v789_v63  ;;  %v635_v33 = vadd.f32 %v8670_v0, %v10025_v45  ;;  %v796_v44 = vmax.f32 %v620_v39, 0.0  ;;  %v13266_v63 = vunpack.c.l.bf16 %v10142_v59  ;;  %v13263_v0 = vunpack.c.h.bf16 %v10154_v62 }
  0xf0   :  { %1032 = vmatprep.subr.mxu1 %v13294_v28  ;;  %v629_v3 = vpop.f32.mrf.mxu0 }
  0xf1   :  { %1033 = vmatpush1.msra.mxu1 %v788_v2  ;;  %v630_v35 = vadd.f32 %v10025_v45, %v629_v3  ;;  %v799_v38 = vmax.f32 %v635_v33, 0.0  ;;  %v13260_v2 = vunpack.c.l.bf16 %v10154_v62  ;;  %v13257_v3 = vunpack.c.h.bf16 %v10166_v1  ;;  %v285_v33 = vld [vmem:[%s13186_s0 + $0xf8] sm:$0xff] }
  0xf2   :  { %1034 = vmatprep.subr.mxu1 %v13294_v28  ;;  %v8673_v6 = vpop.f32.mrf.mxu0 }
  0xf3   :  { %1035 = vmatpush1.msra.mxu1 %v787_v5  ;;  %v645_v27 = vadd.f32 %v8673_v6, %v10025_v45  ;;  %v798_v40 = vmax.f32 %v630_v35, 0.0  ;;  %v13254_v5 = vunpack.c.l.bf16 %v10166_v1  ;;  %v13251_v6 = vunpack.c.h.bf16 %v10178_v4  ;;  %v10285_v35 = vld [vmem:[%s13187_s1 + $0x78] sm:$0xff] }
  0xf4   :  { %1036 = vmatprep.subr.mxu1 %v13294_v28  ;;  %v639_v11 = vpop.f32.mrf.mxu0  ;;  %13456 = vst [vmem:[#allocation16_spill] sm:$0xff] %v10285_v35  ;;  %v13207_v39 = vunpack.c.h.bf16 %v10285_v35  ;;  %v13206_v41 = vunpack.c.l.bf16 %v10285_v35 }
  0xf5   :  { %1037 = vmatpush1.msra.mxu1 %v786_v8  ;;  %v640_v31 = vadd.f32 %v10025_v45, %v639_v11  ;;  %v801_v34 = vmax.f32 %v645_v27, 0.0  ;;  %v13248_v8 = vunpack.c.l.bf16 %v10178_v4  ;;  %v13242_v11 = vunpack.c.l.bf16 %v10190_v7  ;;  %v10265_v27 = vld [vmem:[%s13187_s1 + $0x70] sm:$0xff] }
  0xf6   :  { %1038 = vmatprep.subr.mxu1 %v13294_v28  ;;  %v10059_v16 = vpop.f32.mrf.mxu0  ;;  %13455 = vst [vmem:[#allocation15_spill] sm:$0xff] %v10265_v27 }
  0xf7   :  { %1039 = vmatpush1.msra.mxu1 %v785_v10  ;;  %v800_v36 = vmax.f32 %v640_v31, 0.0  ;;  %v10202_v10 = vld [vmem:[%s13187_s1 + $0x50] sm:$0xff]  ;;  %v13218_v31 = vunpack.c.l.bf16 %v10245_v22 }
  0xf8   :  { %1040 = vmatprep.subr.mxu1 %v13294_v28  ;;  %v649_v21 = vpop.f32.mrf.mxu0  ;;  %13451 = vst [vmem:[#allocation11_spill] sm:$0xff] %v10202_v10  ;;  %v13239_v12 = vunpack.c.h.bf16 %v10202_v10  ;;  %v13236_v14 = vunpack.c.l.bf16 %v10202_v10 }
  0xf9   :  { %1041 = vmatpush1.msra.mxu1 %v784_v13  ;;  %v650_v25 = vadd.f32 %v10025_v45, %v649_v21  ;;  %v10105_v45 = vld [vmem:[%s13187_s1 + $0x10] sm:$0xff]  ;;  %v10214_v13 = vld [vmem:[%s13187_s1 + $0x58] sm:$0xff]  ;;  %v13227_v21 = vunpack.c.h.bf16 %v10226_v17 }
  0xfa   :  { %1042 = vmatprep.subr.mxu1 %v13294_v28  ;;  %13443 = vst [vmem:[#allocation3_spill] sm:$0xff] %v10105_v45  ;;  %v13285_v52 = vunpack.c.h.bf16 %v10105_v45  ;;  %v13284_v54 = vunpack.c.l.bf16 %v10105_v45  ;;  %13452 = vst [vmem:[#allocation12_spill] sm:$0xff] %v10214_v13 }
  0xfb   :  { %1043 = vmatpush1.msra.mxu1 %v783_v15  ;;  %v802_v32 = vmax.f32 %v650_v25, 0.0  ;;  %v13233_v15 = vunpack.c.h.bf16 %v10214_v13  ;;  %v283_v25 = vld [vmem:[%s13186_s0 + $0xe8] sm:$0xff] }
  0xfc   :  { %1044 = vmatprep.subr.mxu1 %v13294_v28 }
  0xfd   :  { %1045 = vmatpush1.msra.mxu1 %v782_v18  ;;  %v13230_v18 = vunpack.c.l.bf16 %v10214_v13 }
  0xfe   :  { %1046 = vmatprep.subr.mxu1 %v13294_v28 }
  0xff   :  { %1047 = vmatpush1.msra.mxu1 %v781_v20  ;;  %v281_v20 = vld [vmem:[%s13186_s0 + $0xd8] sm:$0xff] }
 0x100   :  { %1048 = vmatprep.subr.mxu1 %v13294_v28  ;;  %8678 = vmatmul.mubr.msk.f32.gmra.mxu0 %vm308_vm1, %v281_v20  ;;  %v291_v20 = vld [vmem:[%s13186_s0 + $0x128] sm:$0xff] }
 0x101   :  { %1049 = vmatpush1.msra.mxu1 %v780_v23  ;;  %v13224_v23 = vunpack.c.l.bf16 %v10226_v17 }
 0x102   :  { %1050 = vmatprep.subr.mxu1 %v13294_v28 }
 0x103   :  { %1051 = vmatpush1.msra.mxu1 %v779_v24  ;;  %v282_v24 = vld [vmem:[%s13186_s0 + $0xe0] sm:$0xff] }
 0x104   :  { %1052 = vmatprep.subr.mxu1 %v13294_v28  ;;  %8680 = vmatprep.mubr.msk.f32.mxu0 %vm308_vm1, %v282_v24 }
 0x105   :  { %1053 = vmatpush1.msra.mxu1 %v778_v26  ;;  %v13221_v26 = vunpack.c.h.bf16 %v10245_v22  ;;  %8681 = vmatmul.mubr.msk.f32.gmra.mxu0 %vm308_vm1, %v283_v25  ;;  %v10345_v25 = vld [vmem:[%s13187_s1 + $0x90] sm:$0xff] }
 0x106   :  { %1068 = vmatprep.subr.mxu1 %v13294_v28  ;;  %13459 = vst [vmem:[#allocation19_spill] sm:$0xff] %v10345_v25 }
 0x107   :  { %7721 = vmatpush2.msk.msra.mxu1 %vm1018_vm3, %v802_v32  ;;  %v284_v32 = vld [vmem:[%s13186_s0 + $0xf0] sm:$0xff] }
 0x108   :  { %1070 = vmatprep.subr.mxu1 %v13294_v28  ;;  %8683 = vmatprep.mubr.msk.f32.mxu0 %vm308_vm1, %v284_v32 }
 0x109   :  { %1071 = vmatpush2.msra.mxu1 %v801_v34  ;;  %v13215_v34 = vunpack.c.h.bf16 %v10265_v27  ;;  %8684 = vmatmul.mubr.msk.f32.gmra.mxu0 %vm308_vm1, %v285_v33  ;;  %v292_v33 = vld [vmem:[%s13186_s0 + $0x130] sm:$0xff] }
 0x10a   :  { %1072 = vmatprep.subr.mxu1 %v13294_v28  ;;  %8686 = vmatprep.mubr.msk.f32.mxu0 %vm308_vm1, %v286_v37  ;;  %v13193_v37 = vunpack.c.h.bf16 %v10345_v25 }
 0x10b   :  { %1073 = vmatpush2.msra.mxu1 %v800_v36  ;;  %v13212_v36 = vunpack.c.l.bf16 %v10265_v27 }
 0x10c   :  { %1074 = vmatprep.subr.mxu1 %v13294_v28 }
 0x10d   :  { %1075 = vmatpush2.msra.mxu1 %v799_v38  ;;  %v287_v38 = vld [vmem:[%s13186_s0 + $0x108] sm:$0xff] }
 0x10e   :  { %1076 = vmatprep.subr.mxu1 %v13294_v28  ;;  %8687 = vmatmul.mubr.msk.f32.gmra.mxu0 %vm308_vm1, %v287_v38  ;;  %v10362_v38 = vld [vmem:[%s13187_s1 + $0x98] sm:$0xff] }
 0x10f   :  { %1077 = vmatpush2.msra.mxu1 %v798_v40  ;;  %v10305_v40 = vld [vmem:[%s13187_s1 + $0x80] sm:$0xff]  ;;  %13460 = vst [vmem:[#allocation20_spill] sm:$0xff] %v10362_v38 }
 0x110   :  { %1078 = vmatprep.subr.mxu1 %v13294_v28  ;;  %13457 = vst [vmem:[#allocation17_spill] sm:$0xff] %v10305_v40 }
 0x111   :  { %1079 = vmatpush2.msra.mxu1 %v797_v42  ;;  %v288_v42 = vld [vmem:[%s13186_s0 + $0x110] sm:$0xff] }
 0x112   :  { %1080 = vmatprep.subr.mxu1 %v13294_v28  ;;  %8689 = vmatprep.mubr.msk.f32.mxu0 %vm308_vm1, %v288_v42  ;;  %v293_v42 = vld [vmem:[%s13186_s0 + $0x138] sm:$0xff] }
 0x113   :  { %1081 = vmatpush2.msra.mxu1 %v796_v44  ;;  %v13203_v44 = vunpack.c.h.bf16 %v10305_v40  ;;  %8690 = vmatmul.mubr.msk.f32.gmra.mxu0 %vm308_vm1, %v289_v43  ;;  %v13195_v43 = vunpack.c.l.bf16 %v10345_v25 }
 0x114   :  { %1082 = vmatprep.subr.mxu1 %v13294_v28  ;;  %8692 = vmatprep.mubr.msk.f32.mxu0 %vm308_vm1, %v290_v19  ;;  %v294_v19 = vld [vmem:[%s13186_s0 + $0x140] sm:$0xff] }
 0x115   :  { %1083 = vmatpush2.msra.mxu1 %v795_v47  ;;  %v10325_v47 = vld [vmem:[%s13187_s1 + $0x88] sm:$0xff] }
 0x116   :  { %1084 = vmatprep.subr.mxu1 %v13294_v28  ;;  %13458 = vst [vmem:[#allocation18_spill] sm:$0xff] %v10325_v47  ;;  %v13197_v24 = vunpack.c.h.bf16 %v10325_v47  ;;  %v13194_v32 = vunpack.c.l.bf16 %v10325_v47 }
 0x117   :  { %1085 = vmatpush2.msra.mxu1 %v794_v49  ;;  %v13200_v49 = vunpack.c.l.bf16 %v10305_v40  ;;  %8693 = vmatmul.mubr.msk.f32.gmra.mxu0 %vm308_vm1, %v291_v20  ;;  %v13196_v20 = vunpack.c.h.bf16 %v10362_v38 }
 0x118   :  { %1087 = vmatmul.mubr.f32.vlgmr.msra.gmra.mxu1 %v13290_v48  ;;  %8913 = vmatprep.subr.mxu1 %v13294_v28 }
 0x119   :  { %7723 = vmatprep.mubr.msk.f32.mxu1 %vm828_vm2, %v13289_v50  ;;  %8695 = vmatprep.mubr.msk.f32.mxu0 %vm308_vm1, %v292_v33  ;;  %v10382_v33 = vld [vmem:[%s13187_s1 + $0xa0] sm:$0xff] }
 0x11a   :  { %13461 = vst [vmem:[#allocation21_spill] sm:$0xff] %v10382_v33 }
 0x11b   :  { %8696 = vmatmul.mubr.msk.f32.gmra.mxu0 %vm308_vm1, %v293_v42  ;;  %v295_v42 = vld [vmem:[%s13186_s0 + $0x148] sm:$0xff] }
 0x11c   :  { %1092 = vmatmul.mubr.f32.gmra.mxu1 %v13286_v51  ;;  %8698 = vmatprep.mubr.msk.f32.mxu0 %vm308_vm1, %v294_v19  ;;  %v296_v19 = vld [vmem:[%s13186_s0 + $0x150] sm:$0xff] }
 0x11d   :  { %7724 = vmatprep.mubr.msk.f32.mxu1 %vm828_vm2, %v13285_v52  ;;  %v10802_v52 = vld [vmem:[%s13187_s1 + $0x198] sm:$0xff] }
 0x11e   :  { %13492 = vst [vmem:[#allocation52_spill] sm:$0xff] %v10802_v52 }
 0x11f   :  { %8699 = vmatmul.mubr.msk.f32.gmra.mxu0 %vm308_vm1, %v295_v42  ;;  %v10402_v42 = vld [vmem:[%s13187_s1 + $0xa8] sm:$0xff] }
 0x120   :  { %1097 = vmatmul.mubr.f32.gmra.mxu1 %v13284_v54  ;;  %8701 = vmatprep.mubr.msk.f32.mxu0 %vm308_vm1, %v296_v19  ;;  %13462 = vst [vmem:[#allocation22_spill] sm:$0xff] %v10402_v42  ;;  %v298_v19 = vld [vmem:[%s13186_s0 + $0x160] sm:$0xff] }
 0x121   :  { %7725 = vmatprep.mubr.msk.f32.mxu1 %vm828_vm2, %v13281_v55 }
 0x124   :  { %1102 = vmatmul.mubr.f32.gmra.mxu1 %v13278_v57 }
 0x125   :  { %7726 = vmatprep.mubr.msk.f32.mxu1 %vm828_vm2, %v13275_v58 }
 0x128   :  { %1107 = vmatmul.mubr.f32.gmra.mxu1 %v13272_v60 }
 0x129   :  { %7727 = vmatprep.mubr.msk.f32.mxu1 %vm828_vm2, %v13269_v61 }
 0x12c   :  { %1112 = vmatmul.mubr.f32.gmra.mxu1 %v13266_v63 }
 0x12d   :  { %7728 = vmatprep.mubr.msk.f32.mxu1 %vm828_vm2, %v13263_v0 }
 0x130   :  { %1117 = vmatmul.mubr.f32.gmra.mxu1 %v13260_v2 }
 0x131   :  { %7729 = vmatprep.mubr.msk.f32.mxu1 %vm828_vm2, %v13257_v3 }
 0x134   :  { %1122 = vmatmul.mubr.f32.gmra.mxu1 %v13254_v5 }
 0x135   :  { %7730 = vmatprep.mubr.msk.f32.mxu1 %vm828_vm2, %v13251_v6 }
 0x138   :  { %1127 = vmatmul.mubr.f32.gmra.mxu1 %v13248_v8 }
 0x139   :  { %7731 = vmatprep.mubr.msk.f32.mxu1 %vm828_vm2, %v13245_v9 }
 0x13c   :  { %1132 = vmatmul.mubr.f32.gmra.mxu1 %v13242_v11 }
 0x13d   :  { %7732 = vmatprep.mubr.msk.f32.mxu1 %vm828_vm2, %v13239_v12 }
 0x140   :  { %1137 = vmatmul.mubr.f32.gmra.mxu1 %v13236_v14 }
 0x141   :  { %7733 = vmatprep.mubr.msk.f32.mxu1 %vm828_vm2, %v13233_v15 }
 0x144   :  { %1142 = vmatmul.mubr.f32.gmra.mxu1 %v13230_v18 }
 0x145   :  { %7734 = vmatprep.mubr.msk.f32.mxu1 %vm828_vm2, %v13227_v21 }
 0x148   :  { %1147 = vmatmul.mubr.f32.gmra.mxu1 %v13224_v23 }
 0x149   :  { %7735 = vmatprep.mubr.msk.f32.mxu1 %vm828_vm2, %v13221_v26 }
 0x14c   :  { %1152 = vmatmul.mubr.f32.gmra.mxu1 %v13218_v31 }
 0x14d   :  { %7736 = vmatprep.mubr.msk.f32.mxu1 %vm828_vm2, %v13215_v34 }
 0x150   :  { %1157 = vmatmul.mubr.f32.gmra.mxu1 %v13212_v36 }
 0x151   :  { %7737 = vmatprep.mubr.msk.f32.mxu1 %vm828_vm2, %v13207_v39  ;;  %v10481_v39 = vld [vmem:[%s13187_s1 + $0xc8] sm:$0xff] }
 0x152   :  { %13466 = vst [vmem:[#allocation26_spill] sm:$0xff] %v10481_v39 }
 0x154   :  { %1162 = vmatmul.mubr.f32.gmra.mxu1 %v13206_v41  ;;  %v30_v41 = vld [vmem:[%s13185_s2 + $0x30] sm:$0xff] }
 0x155   :  { %7738 = vmatprep.mubr.msk.f32.mxu1 %vm828_vm2, %v13203_v44  ;;  %8714 = vmatpush3.msra.mxu0 %v30_v41  ;;  %v10499_v41 = vld [vmem:[%s13187_s1 + $0xd0] sm:$0xff] }
 0x156   :  { %8715 = vmatprep.subr.mxu0 %v13294_v28  ;;  %13467 = vst [vmem:[#allocation27_spill] sm:$0xff] %v10499_v41  ;;  %v13219_v36 = vunpack.c.l.bf16 %v10499_v41 }
 0x158   :  { %1167 = vmatmul.mubr.f32.gmra.mxu1 %v13200_v49 }
 0x159   :  { %7739 = vmatprep.mubr.msk.f32.mxu1 %vm828_vm2, %v13197_v24  ;;  %v13202_v24 = vunpack.c.h.bf16 %v10402_v42 }
 0x15c   :  { %1172 = vmatmul.mubr.f32.gmra.mxu1 %v13194_v32  ;;  %v13199_v32 = vunpack.c.h.bf16 %v10382_v33 }
 0x15d   :  { %7740 = vmatprep.mubr.msk.f32.mxu1 %vm828_vm2, %v13193_v37  ;;  %v13198_v37 = vunpack.c.l.bf16 %v10362_v38 }
 0x160   :  { %1177 = vmatmul.mubr.f32.gmra.mxu1 %v13195_v43  ;;  %v297_v43 = vld [vmem:[%s13186_s0 + $0x158] sm:$0xff] }
 0x161   :  { %7741 = vmatprep.mubr.msk.f32.mxu1 %vm828_vm2, %v13196_v20  ;;  %8702 = vmatmul.mubr.msk.f32.gmra.mxu0 %vm308_vm1, %v297_v43  ;;  %v13201_v20 = vunpack.c.l.bf16 %v10382_v33  ;;  %v10422_v43 = vld [vmem:[%s13187_s1 + $0xb0] sm:$0xff] }
 0x162   :  { %8704 = vmatprep.mubr.msk.f32.mxu0 %vm308_vm1, %v298_v19  ;;  %13463 = vst [vmem:[#allocation23_spill] sm:$0xff] %v10422_v43  ;;  %v300_v19 = vld [vmem:[%s13186_s0 + $0x170] sm:$0xff]  ;;  %v13205_v49 = vunpack.c.h.bf16 %v10422_v43 }
 0x164   :  { %1182 = vmatmul.mubr.f32.gmra.mxu1 %v13198_v37  ;;  %v299_v37 = vld [vmem:[%s13186_s0 + $0x168] sm:$0xff] }
 0x165   :  { %7742 = vmatprep.mubr.msk.f32.mxu1 %vm828_vm2, %v13199_v32  ;;  %8705 = vmatmul.mubr.msk.f32.gmra.mxu0 %vm308_vm1, %v299_v37  ;;  %v13204_v32 = vunpack.c.l.bf16 %v10402_v42  ;;  %v10442_v37 = vld [vmem:[%s13187_s1 + $0xb8] sm:$0xff] }
 0x166   :  { %8707 = vmatprep.mubr.msk.f32.mxu0 %vm308_vm1, %v300_v19  ;;  %13464 = vst [vmem:[#allocation24_spill] sm:$0xff] %v10442_v37  ;;  %v302_v19 = vld [vmem:[%s13186_s0 + $0x180] sm:$0xff]  ;;  %v13208_v44 = vunpack.c.h.bf16 %v10442_v37 }
 0x168   :  { %1187 = vmatmul.mubr.f32.gmra.mxu1 %v13201_v20  ;;  %v301_v20 = vld [vmem:[%s13186_s0 + $0x178] sm:$0xff] }
 0x169   :  { %7743 = vmatprep.mubr.msk.f32.mxu1 %vm828_vm2, %v13202_v24  ;;  %8708 = vmatmul.mubr.msk.f32.gmra.mxu0 %vm308_vm1, %v301_v20  ;;  %v13209_v24 = vunpack.c.l.bf16 %v10422_v43  ;;  %v10462_v20 = vld [vmem:[%s13187_s1 + $0xc0] sm:$0xff] }
 0x16a   :  { %8710 = vmatprep.mubr.msk.f32.mxu0 %vm308_vm1, %v302_v19  ;;  %13465 = vst [vmem:[#allocation25_spill] sm:$0xff] %v10462_v20  ;;  %v13210_v19 = vunpack.c.h.bf16 %v10462_v20 }
 0x16c   :  { %1192 = vmatmul.mubr.f32.gmra.mxu1 %v13204_v32  ;;  %v303_v32 = vld [vmem:[%s13186_s0 + $0x188] sm:$0xff] }
 0x16d   :  { %7744 = vmatprep.mubr.msk.f32.mxu1 %vm828_vm2, %v13205_v49  ;;  %8711 = vmatmul.mubr.msk.f32.gmra.mxu0 %vm308_vm1, %v303_v32  ;;  %v13211_v49 = vunpack.c.l.bf16 %v10442_v37  ;;  %v29_v32 = vld [vmem:[%s13185_s2 + $0x28] sm:$0xff] }
 0x16e   :  { %8716 = vmatpush3.msra.mxu0 %v29_v32  ;;  %8717 = vmatprep.mubr.msk.f32.mxu0 %vm9848_vm4, %v13294_v28  ;;  %v13216_v32 = vunpack.c.l.bf16 %v10481_v39 }
 0x16f   :  { %8738 = vmatprep.subr.mxu0 %v13294_v28 }
 0x170   :  { %1197 = vmatmul.mubr.f32.gmra.mxu1 %v13209_v24  ;;  %v13214_v24 = vunpack.c.h.bf16 %v10481_v39 }
 0x171   :  { %7745 = vmatprep.mubr.msk.f32.mxu1 %vm828_vm2, %v13208_v44  ;;  %v13213_v44 = vunpack.c.l.bf16 %v10462_v20 }
 0x174   :  { %1202 = vmatmul.mubr.f32.gmra.mxu1 %v13211_v49  ;;  %v10512_v49 = vld [vmem:[%s13187_s1 + $0xd8] sm:$0xff] }
 0x175   :  { %7746 = vmatprep.mubr.msk.f32.mxu1 %vm828_vm2, %v13210_v19  ;;  %v13217_v19 = vunpack.c.h.bf16 %v10499_v41  ;;  %13468 = vst [vmem:[#allocation28_spill] sm:$0xff] %v10512_v49  ;;  %v13222_v34 = vunpack.c.l.bf16 %v10512_v49 }
 0x178   :  { %1207 = vmatmul.mubr.f32.gmra.mxu1 %v13213_v44  ;;  %v13220_v44 = vunpack.c.h.bf16 %v10512_v49 }
 0x179   :  { %7747 = vmatprep.mubr.msk.f32.mxu1 %vm828_vm2, %v13214_v24  ;;  %v10524_v24 = vld [vmem:[%s13187_s1 + $0xe0] sm:$0xff] }
 0x17a   :  { %13469 = vst [vmem:[#allocation29_spill] sm:$0xff] %v10524_v24  ;;  %v13225_v31 = vunpack.c.l.bf16 %v10524_v24 }
 0x17c   :  { %1212 = vmatmul.mubr.f32.gmra.mxu1 %v13216_v32  ;;  %v13223_v32 = vunpack.c.h.bf16 %v10524_v24 }
 0x17d   :  { %7748 = vmatprep.mubr.msk.f32.mxu1 %vm828_vm2, %v13217_v19  ;;  %v10536_v19 = vld [vmem:[%s13187_s1 + $0xe8] sm:$0xff] }
 0x17e   :  { %13470 = vst [vmem:[#allocation30_spill] sm:$0xff] %v10536_v19  ;;  %v13228_v26 = vunpack.c.l.bf16 %v10536_v19 }
 0x180   :  { %1217 = vmatmul.mubr.f32.gmra.mxu1 %v13219_v36  ;;  %v13226_v36 = vunpack.c.h.bf16 %v10536_v19 }
 0x181   :  { %7749 = vmatprep.mubr.msk.f32.mxu1 %vm828_vm2, %v13220_v44  ;;  %v10548_v44 = vld [vmem:[%s13187_s1 + $0xf0] sm:$0xff] }
 0x182   :  { %13471 = vst [vmem:[#allocation31_spill] sm:$0xff] %v10548_v44  ;;  %v13231_v23 = vunpack.c.l.bf16 %v10548_v44 }
 0x184   :  { %1222 = vmatmul.mubr.f32.gmra.mxu1 %v13222_v34  ;;  %v13229_v34 = vunpack.c.h.bf16 %v10548_v44 }
 0x185   :  { %7750 = vmatprep.mubr.msk.f32.mxu1 %vm828_vm2, %v13223_v32  ;;  %v10560_v32 = vld [vmem:[%s13187_s1 + $0xf8] sm:$0xff] }
 0x186   :  { %13472 = vst [vmem:[#allocation32_spill] sm:$0xff] %v10560_v32  ;;  %v13234_v21 = vunpack.c.l.bf16 %v10560_v32 }
 0x188   :  { %1227 = vmatmul.mubr.f32.gmra.mxu1 %v13225_v31  ;;  %v13232_v31 = vunpack.c.h.bf16 %v10560_v32 }
 0x189   :  { %7751 = vmatprep.mubr.msk.f32.mxu1 %vm828_vm2, %v13226_v36  ;;  %v10572_v36 = vld [vmem:[%s13187_s1 + $0x100] sm:$0xff] }
 0x18a   :  { %13473 = vst [vmem:[#allocation33_spill] sm:$0xff] %v10572_v36  ;;  %v13237_v18 = vunpack.c.l.bf16 %v10572_v36 }
 0x18c   :  { %1232 = vmatmul.mubr.f32.gmra.mxu1 %v13228_v26  ;;  %v13235_v26 = vunpack.c.h.bf16 %v10572_v36 }
 0x18d   :  { %7752 = vmatprep.mubr.msk.f32.mxu1 %vm828_vm2, %v13229_v34  ;;  %v10584_v34 = vld [vmem:[%s13187_s1 + $0x108] sm:$0xff] }
 0x18e   :  { %13474 = vst [vmem:[#allocation34_spill] sm:$0xff] %v10584_v34  ;;  %v13240_v15 = vunpack.c.l.bf16 %v10584_v34 }
 0x190   :  { %1237 = vmatmul.mubr.f32.gmra.mxu1 %v13231_v23  ;;  %v13238_v23 = vunpack.c.h.bf16 %v10584_v34 }
 0x191   :  { %7753 = vmatprep.mubr.msk.f32.mxu1 %vm828_vm2, %v13232_v31  ;;  %v10596_v31 = vld [vmem:[%s13187_s1 + $0x110] sm:$0xff] }
 0x192   :  { %13475 = vst [vmem:[#allocation35_spill] sm:$0xff] %v10596_v31  ;;  %v13243_v14 = vunpack.c.l.bf16 %v10596_v31 }
 0x194   :  { %1242 = vmatmul.mubr.f32.gmra.mxu1 %v13234_v21  ;;  %v13241_v21 = vunpack.c.h.bf16 %v10596_v31 }
 0x195   :  { %7754 = vmatprep.mubr.msk.f32.mxu1 %vm828_vm2, %v13235_v26  ;;  %v10608_v26 = vld [vmem:[%s13187_s1 + $0x118] sm:$0xff] }
 0x196   :  { %13476 = vst [vmem:[#allocation36_spill] sm:$0xff] %v10608_v26  ;;  %v13246_v12 = vunpack.c.l.bf16 %v10608_v26 }
 0x198   :  { %1247 = vmatmul.mubr.f32.gmra.mxu1 %v13237_v18  ;;  %v13244_v18 = vunpack.c.h.bf16 %v10608_v26 }
 0x199   :  { %7755 = vmatprep.mubr.msk.f32.mxu1 %vm828_vm2, %v13238_v23  ;;  %v10620_v23 = vld [vmem:[%s13187_s1 + $0x120] sm:$0xff] }
 0x19a   :  { %13477 = vst [vmem:[#allocation37_spill] sm:$0xff] %v10620_v23  ;;  %v13249_v11 = vunpack.c.l.bf16 %v10620_v23 }
 0x19c   :  { %1252 = vmatmul.mubr.f32.gmra.mxu1 %v13240_v15  ;;  %v13247_v15 = vunpack.c.h.bf16 %v10620_v23 }
 0x19d   :  { %7756 = vmatprep.mubr.msk.f32.mxu1 %vm828_vm2, %v13241_v21  ;;  %v10632_v21 = vld [vmem:[%s13187_s1 + $0x128] sm:$0xff] }
 0x19e   :  { %13478 = vst [vmem:[#allocation38_spill] sm:$0xff] %v10632_v21  ;;  %v13252_v9 = vunpack.c.l.bf16 %v10632_v21 }
 0x1a0   :  { %1257 = vmatmul.mubr.f32.gmra.mxu1 %v13243_v14  ;;  %v13250_v14 = vunpack.c.h.bf16 %v10632_v21 }
 0x1a1   :  { %7757 = vmatprep.mubr.msk.f32.mxu1 %vm828_vm2, %v13244_v18  ;;  %v10644_v18 = vld [vmem:[%s13187_s1 + $0x130] sm:$0xff] }
 0x1a2   :  { %13479 = vst [vmem:[#allocation39_spill] sm:$0xff] %v10644_v18  ;;  %v13255_v8 = vunpack.c.l.bf16 %v10644_v18 }
 0x1a4   :  { %1262 = vmatmul.mubr.f32.gmra.mxu1 %v13246_v12  ;;  %v13253_v12 = vunpack.c.h.bf16 %v10644_v18 }
 0x1a5   :  { %7758 = vmatprep.mubr.msk.f32.mxu1 %vm828_vm2, %v13247_v15  ;;  %v10656_v15 = vld [vmem:[%s13187_s1 + $0x138] sm:$0xff] }
 0x1a6   :  { %13480 = vst [vmem:[#allocation40_spill] sm:$0xff] %v10656_v15  ;;  %v13258_v6 = vunpack.c.l.bf16 %v10656_v15 }
 0x1a8   :  { %1267 = vmatmul.mubr.f32.gmra.mxu1 %v13249_v11  ;;  %v13256_v11 = vunpack.c.h.bf16 %v10656_v15 }
 0x1a9   :  { %7759 = vmatprep.mubr.msk.f32.mxu1 %vm828_vm2, %v13250_v14  ;;  %v10668_v14 = vld [vmem:[%s13187_s1 + $0x140] sm:$0xff] }
 0x1aa   :  { %13481 = vst [vmem:[#allocation41_spill] sm:$0xff] %v10668_v14  ;;  %v13261_v5 = vunpack.c.l.bf16 %v10668_v14 }
 0x1ac   :  { %1272 = vmatmul.mubr.f32.gmra.mxu1 %v13252_v9  ;;  %v13259_v9 = vunpack.c.h.bf16 %v10668_v14 }
 0x1ad   :  { %7760 = vmatprep.mubr.msk.f32.mxu1 %vm828_vm2, %v13253_v12  ;;  %v10680_v12 = vld [vmem:[%s13187_s1 + $0x148] sm:$0xff] }
 0x1ae   :  { %13482 = vst [vmem:[#allocation42_spill] sm:$0xff] %v10680_v12  ;;  %v13264_v3 = vunpack.c.l.bf16 %v10680_v12 }
 0x1b0   :  { %1277 = vmatmul.mubr.f32.gmra.mxu1 %v13255_v8  ;;  %v13262_v8 = vunpack.c.h.bf16 %v10680_v12 }
 0x1b1   :  { %7761 = vmatprep.mubr.msk.f32.mxu1 %vm828_vm2, %v13256_v11  ;;  %v10692_v11 = vld [vmem:[%s13187_s1 + $0x150] sm:$0xff] }
 0x1b2   :  { %13483 = vst [vmem:[#allocation43_spill] sm:$0xff] %v10692_v11  ;;  %v13267_v2 = vunpack.c.l.bf16 %v10692_v11 }
 0x1b4   :  { %1282 = vmatmul.mubr.f32.gmra.mxu1 %v13258_v6  ;;  %v13265_v6 = vunpack.c.h.bf16 %v10692_v11 }
 0x1b5   :  { %7762 = vmatprep.mubr.msk.f32.mxu1 %vm828_vm2, %v13259_v9  ;;  %v10704_v9 = vld [vmem:[%s13187_s1 + $0x158] sm:$0xff] }
 0x1b6   :  { %13484 = vst [vmem:[#allocation44_spill] sm:$0xff] %v10704_v9  ;;  %v13270_v0 = vunpack.c.l.bf16 %v10704_v9 }
 0x1b8   :  { %1287 = vmatmul.mubr.f32.gmra.mxu1 %v13261_v5  ;;  %v13268_v5 = vunpack.c.h.bf16 %v10704_v9 }
 0x1b9   :  { %7763 = vmatprep.mubr.msk.f32.mxu1 %vm828_vm2, %v13262_v8  ;;  %v10716_v8 = vld [vmem:[%s13187_s1 + $0x160] sm:$0xff] }
 0x1ba   :  { %13485 = vst [vmem:[#allocation45_spill] sm:$0xff] %v10716_v8  ;;  %v13273_v63 = vunpack.c.l.bf16 %v10716_v8 }
 0x1bc   :  { %1292 = vmatmul.mubr.f32.gmra.mxu1 %v13264_v3  ;;  %v13271_v3 = vunpack.c.h.bf16 %v10716_v8  ;;  %v13499_v8 = vmov 0.0  }
 0x1bd   :  { %7764 = vmatprep.mubr.msk.f32.mxu1 %vm828_vm2, %v13265_v6  ;;  %v10728_v6 = vld [vmem:[%s13187_s1 + $0x168] sm:$0xff] }
 0x1be   :  { %13486 = vst [vmem:[#allocation46_spill] sm:$0xff] %v10728_v6  ;;  %v13276_v61 = vunpack.c.l.bf16 %v10728_v6 }
 0x1c0   :  { %1297 = vmatmul.mubr.f32.gmra.mxu1 %v13267_v2  ;;  %v13274_v2 = vunpack.c.h.bf16 %v10728_v6 }
 0x1c1   :  { %7765 = vmatprep.mubr.msk.f32.mxu1 %vm828_vm2, %v13268_v5  ;;  %v10740_v5 = vld [vmem:[%s13187_s1 + $0x170] sm:$0xff] }
 0x1c2   :  { %13487 = vst [vmem:[#allocation47_spill] sm:$0xff] %v10740_v5  ;;  %v13279_v60 = vunpack.c.l.bf16 %v10740_v5 }
 0x1c4   :  { %1302 = vmatmul.mubr.f32.gmra.mxu1 %v13270_v0  ;;  %v13277_v0 = vunpack.c.h.bf16 %v10740_v5 }
 0x1c5   :  { %7766 = vmatprep.mubr.msk.f32.mxu1 %vm828_vm2, %v13271_v3  ;;  %v10752_v3 = vld [vmem:[%s13187_s1 + $0x178] sm:$0xff] }
 0x1c6   :  { %13488 = vst [vmem:[#allocation48_spill] sm:$0xff] %v10752_v3  ;;  %v13282_v58 = vunpack.c.l.bf16 %v10752_v3 }
 0x1c8   :  { %1307 = vmatmul.mubr.f32.gmra.mxu1 %v13273_v63  ;;  %v13280_v63 = vunpack.c.h.bf16 %v10752_v3 }
 0x1c9   :  { %7767 = vmatprep.mubr.msk.f32.mxu1 %vm828_vm2, %v13274_v2  ;;  %v10764_v2 = vld [vmem:[%s13187_s1 + $0x180] sm:$0xff] }
 0x1ca   :  { %13489 = vst [vmem:[#allocation49_spill] sm:$0xff] %v10764_v2  ;;  %v13287_v57 = vunpack.c.l.bf16 %v10764_v2 }
 0x1cc   :  { %1312 = vmatmul.mubr.f32.gmra.mxu1 %v13276_v61  ;;  %v13283_v61 = vunpack.c.h.bf16 %v10764_v2 }
 0x1cd   :  { %7768 = vmatprep.mubr.msk.f32.mxu1 %vm828_vm2, %v13277_v0  ;;  %v10776_v0 = vld [vmem:[%s13187_s1 + $0x188] sm:$0xff] }
 0x1ce   :  { %13490 = vst [vmem:[#allocation50_spill] sm:$0xff] %v10776_v0 }
 0x1d0   :  { %1317 = vmatmul.mubr.f32.gmra.mxu1 %v13279_v60  ;;  %v13288_v60 = vunpack.c.h.bf16 %v10776_v0 }
 0x1d1   :  { %7769 = vmatprep.mubr.msk.f32.mxu1 %vm828_vm2, %v13280_v63  ;;  %v10788_v63 = vld [vmem:[%s13187_s1 + $0x190] sm:$0xff] }
 0x1d2   :  { %13491 = vst [vmem:[#allocation51_spill] sm:$0xff] %v10788_v63 }
 0x1d4   :  { %1322 = vmatmul.mubr.f32.gmra.mxu1 %v13282_v58  ;;  %v13291_v58 = vunpack.c.l.bf16 %v10776_v0 }
 0x1d5   :  { %7770 = vmatprep.mubr.msk.f32.mxu1 %vm828_vm2, %v13283_v61  ;;  %v13292_v61 = vunpack.c.h.bf16 %v10788_v63 }
 0x1d8   :  { %v10790_v55 = vpop.f32.mrf.mxu1  ;;  %1327 = vmatmul.mubr.f32.gmra.mxu1 %v13287_v57  ;;  %v13296_v57 = vunpack.c.l.bf16 %v10788_v63 }
 0x1d9   :  { %7771 = vmatprep.mubr.msk.f32.mxu1 %vm828_vm2, %v13288_v60  ;;  %v13297_v60 = vunpack.c.h.bf16 %v10802_v52 }
 0x1da   :  { %v1090_v54 = vpop.f32.mrf.mxu1 }
 0x1db   :  { %v10816_v54 = vld [vmem:[%s13187_s1 + $0x1a0] sm:$0xff] }
 0x1dc   :  { %v10804_v51 = vpop.f32.mrf.mxu1  ;;  %1332 = vmatmul.mubr.f32.gmra.mxu1 %v13291_v58  ;;  %13493 = vst [vmem:[#allocation53_spill] sm:$0xff] %v10816_v54  ;;  %v13302_v58 = vunpack.c.l.bf16 %v10802_v52 }
 0x1dd   :  { %7772 = vmatprep.mubr.msk.f32.mxu1 %vm828_vm2, %v13292_v61  ;;  %v13303_v61 = vunpack.c.h.bf16 %v10816_v54 }
 0x1de   :  { %v1095_v50 = vpop.f32.mrf.mxu1 }
 0x1df   :  { %v10830_v50 = vld [vmem:[%s13187_s1 + $0x1a8] sm:$0xff] }
 0x1e0   :  { %v10818_v48 = vpop.f32.mrf.mxu1  ;;  %1337 = vmatmul.mubr.f32.gmra.mxu1 %v13296_v57  ;;  %13494 = vst [vmem:[#allocation54_spill] sm:$0xff] %v10830_v50  ;;  %v13308_v57 = vunpack.c.l.bf16 %v10816_v54 }
 0x1e1   :  { %7773 = vmatprep.mubr.msk.f32.mxu1 %vm828_vm2, %v13297_v60  ;;  %v13309_v60 = vunpack.c.h.bf16 %v10830_v50 }
 0x1e2   :  { %v1100_v30 = vpop.f32.mrf.mxu1 }
 0x1e3   :  { %v10844_v30 = vld [vmem:[%s13187_s1 + $0x1b0] sm:$0xff] }
 0x1e4   :  { %v10832_v28 = vpop.f32.mrf.mxu1  ;;  %1342 = vmatmul.mubr.f32.gmra.mxu1 %v13302_v58  ;;  %13495 = vst [vmem:[#allocation55_spill] sm:$0xff] %v10844_v30  ;;  %v13314_v58 = vunpack.c.l.bf16 %v10830_v50 }
 0x1e5   :  { %7774 = vmatprep.mubr.msk.f32.mxu1 %vm828_vm2, %v13303_v61  ;;  %v13315_v61 = vunpack.c.h.bf16 %v10844_v30 }
 0x1e6   :  { %v1105_v63 = vpop.f32.mrf.mxu1 }
 0x1e7   :  { %v10858_v63 = vld [vmem:[%s13187_s1 + $0x1b8] sm:$0xff] }
 0x1e8   :  { %v10846_v0 = vpop.f32.mrf.mxu1  ;;  %1347 = vmatmul.mubr.f32.gmra.mxu1 %v13308_v57  ;;  %13496 = vst [vmem:[#allocation56_spill] sm:$0xff] %v10858_v63  ;;  %v13320_v57 = vunpack.c.l.bf16 %v10844_v30  ;;  %v28_v30 = vld [vmem:[%s13185_s2 + $0x20] sm:$0xff] }
 0x1e9   :  { %7775 = vmatprep.mubr.msk.f32.mxu1 %vm828_vm2, %v13309_v60  ;;  %v13323_v60 = vunpack.c.h.bf16 %v10858_v63 }
 0x1ea   :  { %v1110_v52 = vpop.f32.mrf.mxu1 }
 0x1eb   :  { %v10872_v52 = vld [vmem:[%s13187_s1 + $0x1c0] sm:$0xff] }
 0x1ec   :  { %v10860_v2 = vpop.f32.mrf.mxu1  ;;  %1352 = vmatmul.mubr.f32.gmra.mxu1 %v13314_v58  ;;  %13497 = vst [vmem:[#allocation57_spill] sm:$0xff] %v10872_v52  ;;  %v13328_v58 = vunpack.c.l.bf16 %v10858_v63  ;;  %v13333_v5 = vunpack.c.l.bf16 %v10872_v52 }
 0x1ed   :  { %7776 = vmatprep.mubr.msk.f32.mxu1 %vm828_vm2, %v13315_v61  ;;  %v13329_v61 = vunpack.c.h.bf16 %v10872_v52 }
 0x1ee   :  { %v1115_v54 = vpop.f32.mrf.mxu1 }
 0x1ef   :  { %v10886_v54 = vld [vmem:[%s13187_s1 + $0x1c8] sm:$0xff] }
 0x1f0   :  { %v10874_v3 = vpop.f32.mrf.mxu1  ;;  %1357 = vmatmul.mubr.f32.gmra.mxu1 %v13320_v57  ;;  %13498 = vst [vmem:[#allocation58_spill] sm:$0xff] %v10886_v54 }
 0x1f1   :  { %7777 = vmatprep.mubr.msk.f32.mxu1 %vm828_vm2, %v13323_v60  ;;  %v27_v60 = vld [vmem:[%s13185_s2 + $0x18] sm:$0xff] }
 0x1f2   :  { %v1120_v50 = vpop.f32.mrf.mxu1 }
 0x1f3   :  { %v13332_v50 = vunpack.c.h.bf16 %v10886_v54 }
 0x1f4   :  { %v1123_v57 = vpop.f32.mrf.mxu1  ;;  %1362 = vmatmul.mubr.f32.gmra.mxu1 %v13328_v58  ;;  %v10907_v58 = vld [vmem:[%s13187_s1 + $0x1d0] sm:$0xff] }
 0x1f5   :  { %8718 = vmatmul.mubr.msk.f32.vlgmr.msra.gmra.mxu0 %vm1402_vm5, %v1123_v57  ;;  %7778 = vmatprep.mubr.msk.f32.mxu1 %vm828_vm2, %v13329_v61  ;;  %13500 = vst [vmem:[#allocation59_spill] sm:$0xff] %v10907_v58  ;;  %v13334_v61 = vunpack.c.l.bf16 %v10886_v54  ;;  %v10954_v54 = vld [vmem:[%s13187_s1 + $0x1e8] sm:$0xff] }
 0x1f6   :  { %v1125_v6 = vpop.f32.mrf.mxu1  ;;  %8720 = vmatprep.mubr.msk.f32.mxu0 %vm9848_vm4, %v13499_v8  ;;  %8739 = vmatpush3.msra.mxu0 %v28_v30  ;;  %v10923_v30 = vld [vmem:[%s13187_s1 + $0x1d8] sm:$0xff]  ;;  %13503 = vst [vmem:[#allocation62_spill] sm:$0xff] %v10954_v54 }
 0x1f7   :  { %8740 = vmatprep.subr.mxu0 %v13499_v8  ;;  %v13335_v6 = vunpack.c.h.bf16 %v10907_v58  ;;  %13501 = vst [vmem:[#allocation60_spill] sm:$0xff] %v10923_v30 }
 0x1f8   :  { %v1128_v57 = vpop.f32.mrf.mxu1  ;;  %1367 = vmatmul.mubr.f32.gmra.mxu1 %v13333_v5  ;;  %8741 = vmatpush3.msra.mxu0 %v27_v60  ;;  %v10939_v5 = vld [vmem:[%s13187_s1 + $0x1e0] sm:$0xff] }
 0x1f9   :  { %8721 = vmatmul.mubr.msk.f32.gmra.mxu0 %vm1402_vm5, %v1128_v57  ;;  %7779 = vmatprep.mubr.msk.f32.mxu1 %vm828_vm2, %v13332_v50  ;;  %v13338_v57 = vunpack.c.l.bf16 %v10907_v58  ;;  %13502 = vst [vmem:[#allocation61_spill] sm:$0xff] %v10939_v5  ;;  %v10969_v58 = vld [vmem:[%s13187_s1 + $0x1f0] sm:$0xff] }
 0x1fa   :  { %v1130_v63 = vpop.f32.mrf.mxu1  ;;  %8723 = vmatprep.mubr.msk.f32.mxu0 %vm9848_vm4, %v13499_v8  ;;  %8763 = vmatprep.subr.mxu0 %v13499_v8  ;;  %13504 = vst [vmem:[#allocation63_spill] sm:$0xff] %v10969_v58 }
 0x1fb   :  { %v13339_v63 = vunpack.c.h.bf16 %v10923_v30 }
 0x1fc   :  { %v1133_v60 = vpop.f32.mrf.mxu1  ;;  %1372 = vmatmul.mubr.f32.gmra.mxu1 %v13334_v61 }
 0x1fd   :  { %8724 = vmatmul.mubr.msk.f32.gmra.mxu0 %vm1402_vm5, %v1133_v60  ;;  %7780 = vmatprep.mubr.msk.f32.mxu1 %vm828_vm2, %v13335_v6  ;;  %v13342_v60 = vunpack.c.l.bf16 %v10923_v30 }
 0x1fe   :  { %v1135_v50 = vpop.f32.mrf.mxu1  ;;  %8726 = vmatprep.mubr.msk.f32.mxu0 %vm9848_vm4, %v13499_v8 }
 0x1ff   :  { %v13343_v50 = vunpack.c.h.bf16 %v10939_v5 }
 0x200   :  { %v1138_v61 = vpop.f32.mrf.mxu1  ;;  %1377 = vmatmul.mubr.f32.gmra.mxu1 %v13338_v57 }
 0x201   :  { %8727 = vmatmul.mubr.msk.f32.gmra.mxu0 %vm1402_vm5, %v1138_v61  ;;  %7781 = vmatprep.mubr.msk.f32.mxu1 %vm828_vm2, %v13339_v63  ;;  %v13346_v61 = vunpack.c.l.bf16 %v10939_v5 }
 0x202   :  { %v1140_v6 = vpop.f32.mrf.mxu1  ;;  %8729 = vmatprep.mubr.msk.f32.mxu0 %vm9848_vm4, %v13499_v8 }
 0x203   :  { %v13347_v6 = vunpack.c.h.bf16 %v10954_v54 }
 0x204   :  { %v1143_v57 = vpop.f32.mrf.mxu1  ;;  %1382 = vmatmul.mubr.f32.gmra.mxu1 %v13342_v60 }
 0x205   :  { %8730 = vmatmul.mubr.msk.f32.gmra.mxu0 %vm1402_vm5, %v1143_v57  ;;  %7782 = vmatprep.mubr.msk.f32.mxu1 %vm828_vm2, %v13343_v50  ;;  %v13350_v57 = vunpack.c.l.bf16 %v10954_v54 }
 0x206   :  { %v1145_v63 = vpop.f32.mrf.mxu1  ;;  %8732 = vmatprep.mubr.msk.f32.mxu0 %vm9848_vm4, %v13499_v8 }
 0x207   :  { %v13348_v63 = vunpack.c.h.bf16 %v10969_v58 }
 0x208   :  { %v1148_v60 = vpop.f32.mrf.mxu1  ;;  %1387 = vmatmul.mubr.f32.gmra.mxu1 %v13346_v61  ;;  %v13349_v61 = vunpack.c.l.bf16 %v10969_v58 }
 0x209   :  { %8733 = vmatmul.mubr.msk.f32.gmra.mxu0 %vm1402_vm5, %v1148_v60  ;;  %7783 = vmatprep.mubr.msk.f32.mxu1 %vm828_vm2, %v13347_v6 }
 0x20a   :  { %v1150_v50 = vpop.f32.mrf.mxu1  ;;  %8735 = vmatprep.mubr.msk.f32.mxu0 %vm9848_vm4, %v13499_v8 }
 0x20b   :  { %v32_v50 = vld [vmem:[%s13185_s2 + $0x40] sm:$0xff] }
 0x20c   :  { %v1153_v30 = vpop.f32.mrf.mxu1  ;;  %1392 = vmatmul.mubr.f32.gmra.mxu1 %v13350_v57 }
 0x20d   :  { %8736 = vmatmul.mubr.msk.f32.gmra.mxu0 %vm1402_vm5, %v1153_v30  ;;  %7784 = vmatprep.mubr.msk.f32.mxu1 %vm828_vm2, %v13348_v63  ;;  %v31_v30 = vld [vmem:[%s13185_s2 + $0x38] sm:$0xff] }
 0x20e   :  { %v1155_v60 = vpop.f32.mrf.mxu1  ;;  %8742 = vmatprep.mubr.msk.f32.mxu0 %vm9848_vm4, %v13499_v8 }
 0x210   :  { %v1158_v6 = vpop.f32.mrf.mxu1  ;;  %1397 = vmatmul.mubr.f32.gmra.mxu1 %v13349_v61 }
 0x211   :  { %8743 = vmatmul.mubr.msk.f32.vlgmr.msra.gmra.mxu0 %vm1402_vm5, %v10790_v55  ;;  %8917 = vmatprep.mubr.msk.f32.mxu1 %vm9848_vm4, %v13499_v8 }
 0x212   :  { %v1160_v60 = vpop.f32.mrf.mxu1  ;;  %8745 = vmatprep.mubr.msk.f32.mxu0 %vm9848_vm4, %v13499_v8  ;;  %8764 = vmatpush3.msra.mxu0 %v32_v50 }
 0x213   :  { %8765 = vmatprep.subr.mxu0 %v13499_v8 }
 0x214   :  { %v1163_v63 = vpop.f32.mrf.mxu1  ;;  %8766 = vmatpush3.msra.mxu0 %v31_v30 }
 0x215   :  { %8746 = vmatmul.mubr.msk.f32.gmra.mxu0 %vm1402_vm5, %v10804_v51  ;;  %8788 = vmatprep.subr.mxu0 %v13499_v8 }
 0x216   :  { %v1165_v55 = vpop.f32.mrf.mxu1  ;;  %8748 = vmatprep.mubr.msk.f32.mxu0 %vm9848_vm4, %v13499_v8 }
 0x218   :  { %v1168_v61 = vpop.f32.mrf.mxu1 }
 0x219   :  { %8749 = vmatmul.mubr.msk.f32.gmra.mxu0 %vm1402_vm5, %v10818_v48 }
 0x21a   :  { %v1170_v60 = vpop.f32.mrf.mxu1  ;;  %8751 = vmatprep.mubr.msk.f32.mxu0 %vm9848_vm4, %v13499_v8 }
 0x21c   :  { %v1173_v50 = vpop.f32.mrf.mxu1 }
 0x21d   :  { %8752 = vmatmul.mubr.msk.f32.gmra.mxu0 %vm1402_vm5, %v10832_v28 }
 0x21e   :  { %v1175_v30 = vpop.f32.mrf.mxu1  ;;  %8754 = vmatprep.mubr.msk.f32.mxu0 %vm9848_vm4, %v13499_v8 }
 0x220   :  { %v1178_v51 = vpop.f32.mrf.mxu1 }
 0x221   :  { %8755 = vmatmul.mubr.msk.f32.gmra.mxu0 %vm1402_vm5, %v10846_v0  ;;  %v34_v0 = vld [vmem:[%s13185_s2 + $0x50] sm:$0xff] }
 0x222   :  { %v1180_v55 = vpop.f32.mrf.mxu1  ;;  %8757 = vmatprep.mubr.msk.f32.mxu0 %vm9848_vm4, %v13499_v8 }
 0x224   :  { %v1183_v48 = vpop.f32.mrf.mxu1 }
 0x225   :  { %8758 = vmatmul.mubr.msk.f32.gmra.mxu0 %vm1402_vm5, %v10860_v2  ;;  %v33_v2 = vld [vmem:[%s13185_s2 + $0x48] sm:$0xff] }
 0x226   :  { %v1185_v60 = vpop.f32.mrf.mxu1  ;;  %8760 = vmatprep.mubr.msk.f32.mxu0 %vm9848_vm4, %v13499_v8 }
 0x228   :  { %v1188_v28 = vpop.f32.mrf.mxu1 }
 0x229   :  { %8761 = vmatmul.mubr.msk.f32.gmra.mxu0 %vm1402_vm5, %v10874_v3 }
 0x22a   :  { %v1190_v30 = vpop.f32.mrf.mxu1  ;;  %8767 = vmatprep.mubr.msk.f32.mxu0 %vm9848_vm4, %v13499_v8 }
 0x22c   :  { %v1193_v55 = vpop.f32.mrf.mxu1 }
 0x22d   :  { %8768 = vmatmul.mubr.msk.f32.vlgmr.msra.gmra.mxu0 %vm1402_vm5, %v1158_v6 }
 0x22e   :  { %v1195_v60 = vpop.f32.mrf.mxu1  ;;  %8770 = vmatprep.mubr.msk.f32.mxu0 %vm9848_vm4, %v13499_v8  ;;  %8789 = vmatpush3.msra.mxu0 %v34_v0 }
 0x22f   :  { %8790 = vmatprep.subr.mxu0 %v13499_v8  ;;  %v44_v60 = vld [vmem:[%s13185_s2 + $0xa0] sm:$0xff] }
 0x230   :  { %v1198_v3 = vpop.f32.mrf.mxu1  ;;  %8791 = vmatpush3.msra.mxu0 %v33_v2  ;;  %8914 = vmatpush3.msra.mxu1 %v44_v60 }
 0x231   :  { %8771 = vmatmul.mubr.msk.f32.gmra.mxu0 %vm1402_vm5, %v1163_v63  ;;  %8813 = vmatprep.subr.mxu0 %v13499_v8  ;;  %v43_v63 = vld [vmem:[%s13185_s2 + $0x98] sm:$0xff] }
 0x232   :  { %v1200_v30 = vpop.f32.mrf.mxu1  ;;  %8773 = vmatprep.mubr.msk.f32.mxu0 %vm9848_vm4, %v13499_v8  ;;  %8915 = vmatprep.subr.mxu1 %v13499_v8 }
 0x233   :  { %8916 = vmatpush3.msra.mxu1 %v43_v63 }
 0x234   :  { %v1203_v6 = vpop.f32.mrf.mxu1  ;;  %8967 = vmatprep.subr.mxu1 %v13499_v8 }
 0x235   :  { %8774 = vmatmul.mubr.msk.f32.gmra.mxu0 %vm1402_vm5, %v1168_v61 }
 0x236   :  { %v1205_v0 = vpop.f32.mrf.mxu1  ;;  %8776 = vmatprep.mubr.msk.f32.mxu0 %vm9848_vm4, %v13499_v8 }
 0x238   :  { %v1208_v2 = vpop.f32.mrf.mxu1 }
 0x239   :  { %8777 = vmatmul.mubr.msk.f32.gmra.mxu0 %vm1402_vm5, %v1173_v50 }
 0x23a   :  { %v1210_v30 = vpop.f32.mrf.mxu1  ;;  %8779 = vmatprep.mubr.msk.f32.mxu0 %vm9848_vm4, %v13499_v8 }
 0x23c   :  { %v1213_v61 = vpop.f32.mrf.mxu1 }
 0x23d   :  { %8780 = vmatmul.mubr.msk.f32.gmra.mxu0 %vm1402_vm5, %v1178_v51  ;;  %v36_v51 = vld [vmem:[%s13185_s2 + $0x60] sm:$0xff] }
 0x23e   :  { %v1215_v60 = vpop.f32.mrf.mxu1  ;;  %8782 = vmatprep.mubr.msk.f32.mxu0 %vm9848_vm4, %v13499_v8 }
 0x240   :  { %v1218_v0 = vpop.f32.mrf.mxu1 }
 0x241   :  { %8783 = vmatmul.mubr.msk.f32.gmra.mxu0 %vm1402_vm5, %v1183_v48 }
 0x242   :  { %v1220_v57 = vpop.f32.mrf.mxu1  ;;  %8785 = vmatprep.mubr.msk.f32.mxu0 %vm9848_vm4, %v13499_v8 }
 0x243   :  { %v35_v57 = vld [vmem:[%s13185_s2 + $0x58] sm:$0xff] }
 0x244   :  { %v1223_v50 = vpop.f32.mrf.mxu1 }
 0x245   :  { %8786 = vmatmul.mubr.msk.f32.gmra.mxu0 %vm1402_vm5, %v1188_v28 }
 0x246   :  { %v1225_v63 = vpop.f32.mrf.mxu1  ;;  %8792 = vmatprep.mubr.msk.f32.mxu0 %vm9848_vm4, %v13499_v8 }
 0x248   :  { %v1228_v30 = vpop.f32.mrf.mxu1 }
 0x249   :  { %8793 = vmatmul.mubr.msk.f32.vlgmr.msra.gmra.mxu0 %vm1402_vm5, %v1193_v55 }
 0x24a   :  { %v1230_v48 = vpop.f32.mrf.mxu1  ;;  %8795 = vmatprep.mubr.msk.f32.mxu0 %vm9848_vm4, %v13499_v8  ;;  %8814 = vmatpush3.msra.mxu0 %v36_v51 }
 0x24b   :  { %8815 = vmatprep.subr.mxu0 %v13499_v8 }
 0x24c   :  { %v1233_v28 = vpop.f32.mrf.mxu1  ;;  %8816 = vmatpush3.msra.mxu0 %v35_v57 }
 0x24d   :  { %8796 = vmatmul.mubr.msk.f32.gmra.mxu0 %vm1402_vm5, %v1198_v3  ;;  %8838 = vmatprep.subr.mxu0 %v13499_v8  ;;  %v11087_v3 = vpop.f32.mrf.mxu0 }
 0x24e   :  { %v1235_v60 = vpop.f32.mrf.mxu1  ;;  %8798 = vmatprep.mubr.msk.f32.mxu0 %vm9848_vm4, %v13499_v8 }
 0x250   :  { %v1238_v55 = vpop.f32.mrf.mxu1 }
 0x251   :  { %8799 = vmatmul.mubr.msk.f32.gmra.mxu0 %vm1402_vm5, %v1203_v6  ;;  %v11092_v6 = vpop.f32.mrf.mxu0 }
 0x252   :  { %v1240_v63 = vpop.f32.mrf.mxu1  ;;  %8801 = vmatprep.mubr.msk.f32.mxu0 %vm9848_vm4, %v13499_v8 }
 0x254   :  { %v1243_v51 = vpop.f32.mrf.mxu1 }
 0x255   :  { %8802 = vmatmul.mubr.msk.f32.gmra.mxu0 %vm1402_vm5, %v1208_v2  ;;  %v11097_v2 = vpop.f32.mrf.mxu0 }
 0x256   :  { %v1245_v48 = vpop.f32.mrf.mxu1  ;;  %8804 = vmatprep.mubr.msk.f32.mxu0 %vm9848_vm4, %v13499_v8 }
 0x258   :  { %v1248_v57 = vpop.f32.mrf.mxu1 }
 0x259   :  { %8805 = vmatmul.mubr.msk.f32.gmra.mxu0 %vm1402_vm5, %v1213_v61  ;;  %v38_v61 = vld [vmem:[%s13185_s2 + $0x70] sm:$0xff] }
 0x25a   :  { %v1250_v60 = vpop.f32.mrf.mxu1  ;;  %8807 = vmatprep.mubr.msk.f32.mxu0 %vm9848_vm4, %v13499_v8 }
 0x25b   :  { %v11105_v60 = vpop.f32.mrf.mxu0 }
 0x25c   :  { %v1253_v63 = vpop.f32.mrf.mxu1 }
 0x25d   :  { %8808 = vmatmul.mubr.msk.f32.gmra.mxu0 %vm1402_vm5, %v1218_v0 }
 0x25e   :  { %v1255_v58 = vpop.f32.mrf.mxu1  ;;  %8810 = vmatprep.mubr.msk.f32.mxu0 %vm9848_vm4, %v13499_v8 }
 0x25f   :  { %v37_v58 = vld [vmem:[%s13185_s2 + $0x68] sm:$0xff] }
 0x260   :  { %v1258_v48 = vpop.f32.mrf.mxu1 }
 0x261   :  { %8811 = vmatmul.mubr.msk.f32.gmra.mxu0 %vm1402_vm5, %v1223_v50 }
 0x262   :  { %v1260_v54 = vpop.f32.mrf.mxu1  ;;  %8817 = vmatprep.mubr.msk.f32.mxu0 %vm9848_vm4, %v13499_v8 }
 0x263   :  { %v11114_v54 = vpop.f32.mrf.mxu0 }
 0x264   :  { %v1263_v0 = vpop.f32.mrf.mxu1 }
 0x265   :  { %8818 = vmatmul.mubr.msk.f32.vlgmr.msra.gmra.mxu0 %vm1402_vm5, %v1228_v30  ;;  %v11120_v52 = vpop.f32.mrf.mxu0 }
 0x266   :  { %v1265_v5 = vpop.f32.mrf.mxu1  ;;  %8820 = vmatprep.mubr.msk.f32.mxu0 %vm9848_vm4, %v13499_v8  ;;  %8839 = vmatpush3.msra.mxu0 %v38_v61 }
 0x267   :  { %8840 = vmatprep.subr.mxu0 %v13499_v8  ;;  %v11125_v9 = vpop.f32.mrf.mxu0 }
 0x268   :  { %v1268_v50 = vpop.f32.mrf.mxu1  ;;  %8841 = vmatpush3.msra.mxu0 %v37_v58 }
 0x269   :  { %8821 = vmatmul.mubr.msk.f32.gmra.mxu0 %vm1402_vm5, %v1233_v28  ;;  %8863 = vmatprep.subr.mxu0 %v13499_v8 }
 0x26a   :  { %v1270_v30 = vpop.f32.mrf.mxu1  ;;  %8823 = vmatprep.mubr.msk.f32.mxu0 %vm9848_vm4, %v13499_v8 }
 0x26b   :  { %v11130_v30 = vpop.f32.mrf.mxu0 }
 0x26c   :  { %v1273_v5 = vpop.f32.mrf.mxu1 }
 0x26d   :  { %8824 = vmatmul.mubr.msk.f32.gmra.mxu0 %vm1402_vm5, %v1238_v55  ;;  %v11135_v55 = vpop.f32.mrf.mxu0 }
 0x26e   :  { %v1275_v61 = vpop.f32.mrf.mxu1  ;;  %8826 = vmatprep.mubr.msk.f32.mxu0 %vm9848_vm4, %v13499_v8 }
 0x270   :  { %v1278_v58 = vpop.f32.mrf.mxu1 }
 0x271   :  { %8827 = vmatmul.mubr.msk.f32.gmra.mxu0 %vm1402_vm5, %v1243_v51  ;;  %v11140_v51 = vpop.f32.mrf.mxu0 }
 0x272   :  { %v1280_v28 = vpop.f32.mrf.mxu1  ;;  %8829 = vmatprep.mubr.msk.f32.mxu0 %vm9848_vm4, %v13499_v8 }
 0x274   :  { %v1283_v11 = vpop.f32.mrf.mxu1 }
 0x275   :  { %8830 = vmatmul.mubr.msk.f32.gmra.mxu0 %vm1402_vm5, %v1248_v57  ;;  %v40_v57 = vld [vmem:[%s13185_s2 + $0x80] sm:$0xff] }
 0x276   :  { %v1285_v12 = vpop.f32.mrf.mxu1  ;;  %8832 = vmatprep.mubr.msk.f32.mxu0 %vm9848_vm4, %v13499_v8 }
 0x277   :  { %v11145_v12 = vpop.f32.mrf.mxu0 }
 0x278   :  { %v1288_v61 = vpop.f32.mrf.mxu1 }
 0x279   :  { %8833 = vmatmul.mubr.msk.f32.gmra.mxu0 %vm1402_vm5, %v1253_v63 }
 0x27a   :  { %v1290_v14 = vpop.f32.mrf.mxu1  ;;  %8835 = vmatprep.mubr.msk.f32.mxu0 %vm9848_vm4, %v13499_v8 }
 0x27b   :  { %v39_v14 = vld [vmem:[%s13185_s2 + $0x78] sm:$0xff] }
 0x27c   :  { %v1293_v28 = vpop.f32.mrf.mxu1 }
 0x27d   :  { %8836 = vmatmul.mubr.msk.f32.gmra.mxu0 %vm1402_vm5, %v1258_v48 }
 0x27e   :  { %v1295_v15 = vpop.f32.mrf.mxu1  ;;  %8842 = vmatprep.mubr.msk.f32.mxu0 %vm9848_vm4, %v13499_v8 }
 0x27f   :  { %v11156_v15 = vpop.f32.mrf.mxu0 }
 0x280   :  { %v1298_v63 = vpop.f32.mrf.mxu1 }
 0x281   :  { %8843 = vmatmul.mubr.msk.f32.vlgmr.msra.gmra.mxu0 %vm1402_vm5, %v1263_v0  ;;  %v11163_v21 = vpop.f32.mrf.mxu0 }
 0x282   :  { %v1300_v18 = vpop.f32.mrf.mxu1  ;;  %8845 = vmatprep.mubr.msk.f32.mxu0 %vm9848_vm4, %v13499_v8  ;;  %8864 = vmatpush3.msra.mxu0 %v40_v57 }
 0x283   :  { %8865 = vmatprep.subr.mxu0 %v13499_v8  ;;  %v11168_v23 = vpop.f32.mrf.mxu0 }
 0x284   :  { %v1303_v48 = vpop.f32.mrf.mxu1  ;;  %8866 = vmatpush3.msra.mxu0 %v39_v14 }
 0x285   :  { %8846 = vmatmul.mubr.msk.f32.gmra.mxu0 %vm1402_vm5, %v1268_v50  ;;  %8888 = vmatprep.subr.mxu0 %v13499_v8 }
 0x286   :  { %v1305_v0 = vpop.f32.mrf.mxu1  ;;  %8848 = vmatprep.mubr.msk.f32.mxu0 %vm9848_vm4, %v13499_v8 }
 0x287   :  { %v11173_v0 = vpop.f32.mrf.mxu0 }
 0x288   :  { %v1308_v18 = vpop.f32.mrf.mxu1 }
 0x289   :  { %8849 = vmatmul.mubr.msk.f32.gmra.mxu0 %vm1402_vm5, %v1273_v5  ;;  %v11178_v5 = vpop.f32.mrf.mxu0 }
 0x28a   :  { %v1310_v57 = vpop.f32.mrf.mxu1  ;;  %8851 = vmatprep.mubr.msk.f32.mxu0 %vm9848_vm4, %v13499_v8 }
 0x28c   :  { %v1313_v14 = vpop.f32.mrf.mxu1 }
 0x28d   :  { %8852 = vmatmul.mubr.msk.f32.gmra.mxu0 %vm1402_vm5, %v1278_v58  ;;  %v11183_v58 = vpop.f32.mrf.mxu0 }
 0x28e   :  { %v1315_v50 = vpop.f32.mrf.mxu1  ;;  %8854 = vmatprep.mubr.msk.f32.mxu0 %vm9848_vm4, %v13499_v8 }
 0x290   :  { %v1318_v26 = vpop.f32.mrf.mxu1 }
 0x291   :  { %8855 = vmatmul.mubr.msk.f32.gmra.mxu0 %vm1402_vm5, %v1283_v11  ;;  %v11188_v11 = vpop.f32.mrf.mxu0 }
 0x292   :  { %v1320_v31 = vpop.f32.mrf.mxu1  ;;  %8857 = vmatprep.mubr.msk.f32.mxu0 %vm9848_vm4, %v13499_v8 }
 0x293   :  { %v42_v31 = vld [vmem:[%s13185_s2 + $0x90] sm:$0xff] }
 0x294   :  { %v1323_v57 = vpop.f32.mrf.mxu1 }
 0x295   :  { %8858 = vmatmul.mubr.msk.f32.gmra.mxu0 %vm1402_vm5, %v1288_v61 }
 0x296   :  { %v1325_v34 = vpop.f32.mrf.mxu1  ;;  %8860 = vmatprep.mubr.msk.f32.mxu0 %vm9848_vm4, %v13499_v8 }
 0x297   :  { %v41_v34 = vld [vmem:[%s13185_s2 + $0x88] sm:$0xff] }
 0x298   :  { %v1328_v50 = vpop.f32.mrf.mxu1 }
 0x299   :  { %8861 = vmatmul.mubr.msk.f32.gmra.mxu0 %vm1402_vm5, %v1293_v28 }
 0x29a   :  { %v1330_v36 = vpop.f32.mrf.mxu1  ;;  %8867 = vmatprep.mubr.msk.f32.mxu0 %vm9848_vm4, %v13499_v8 }
 0x29b   :  { %v11199_v36 = vpop.f32.mrf.mxu0 }
 0x29c   :  { %v1333_v61 = vpop.f32.mrf.mxu1 }
 0x29d   :  { %8868 = vmatmul.mubr.msk.f32.vlgmr.msra.gmra.mxu0 %vm1402_vm5, %v1298_v63  ;;  %v11206_v44 = vpop.f32.mrf.mxu0 }
 0x29e   :  { %v1335_v32 = vpop.f32.mrf.mxu1  ;;  %8870 = vmatprep.mubr.msk.f32.mxu0 %vm9848_vm4, %v13499_v8  ;;  %8889 = vmatpush3.msra.mxu0 %v42_v31 }
 0x29f   :  { %8890 = vmatprep.subr.mxu0 %v13499_v8  ;;  %v11211_v19 = vpop.f32.mrf.mxu0 }
 0x2a0   :  { %v1338_v28 = vpop.f32.mrf.mxu1  ;;  %8891 = vmatpush3.msra.mxu0 %v41_v34 }
 0x2a1   :  { %8871 = vmatmul.mubr.msk.f32.gmra.mxu0 %vm1402_vm5, %v1303_v48  ;;  %8938 = vmatprep.subr.mxu0 %v13499_v8 }
 0x2a2   :  { %v1340_v63 = vpop.f32.mrf.mxu1  ;;  %8873 = vmatprep.mubr.msk.f32.mxu0 %vm9848_vm4, %v13499_v8 }
 0x2a3   :  { %v11216_v63 = vpop.f32.mrf.mxu0 }
 0x2a4   :  { %v1343_v32 = vpop.f32.mrf.mxu1 }
 0x2a5   :  { %8874 = vmatmul.mubr.msk.f32.gmra.mxu0 %vm1402_vm5, %v1308_v18  ;;  %v11221_v18 = vpop.f32.mrf.mxu0 }
 0x2a6   :  { %v1345_v31 = vpop.f32.mrf.mxu1  ;;  %8876 = vmatprep.mubr.msk.f32.mxu0 %vm9848_vm4, %v13499_v8 }
 0x2a8   :  { %v1348_v34 = vpop.f32.mrf.mxu1 }
 0x2a9   :  { %8877 = vmatmul.mubr.msk.f32.gmra.mxu0 %vm1402_vm5, %v1313_v14  ;;  %v11226_v14 = vpop.f32.mrf.mxu0 }
 0x2aa   :  { %v1350_v48 = vpop.f32.mrf.mxu1  ;;  %8879 = vmatprep.mubr.msk.f32.mxu0 %vm9848_vm4, %v13499_v8 }
 0x2ac   :  { %v1353_v24 = vpop.f32.mrf.mxu1 }
 0x2ad   :  { %8880 = vmatmul.mubr.msk.f32.gmra.mxu0 %vm1402_vm5, %v1318_v26 }
 0x2ae   :  { %v1355_v49 = vpop.f32.mrf.mxu1  ;;  %8882 = vmatprep.mubr.msk.f32.mxu0 %vm9848_vm4, %v13499_v8 }
 0x2b0   :  { %v1358_v31 = vpop.f32.mrf.mxu1 }
 0x2b1   :  { %8883 = vmatmul.mubr.msk.f32.gmra.mxu0 %vm1402_vm5, %v1323_v57 }
 0x2b2   :  { %v1360_v41 = vpop.f32.mrf.mxu1  ;;  %8885 = vmatprep.mubr.msk.f32.mxu0 %vm9848_vm4, %v13499_v8 }
 0x2b4   :  { %v1363_v48 = vpop.f32.mrf.mxu1 }
 0x2b5   :  { %v1490_v39 = vpop.f32.mrf.mxu0  ;;  %8886 = vmatmul.mubr.msk.f32.gmra.mxu0 %vm1402_vm5, %v1328_v50 }
 0x2b6   :  { %v1365_v26 = vpop.f32.mrf.mxu1  ;;  %8892 = vmatprep.mubr.msk.f32.mxu0 %vm9848_vm4, %v13499_v8 }
 0x2b7   :  { %v8719_v49 = vpop.f32.mrf.mxu0 }
 0x2b8   :  { %v1368_v20 = vpop.f32.mrf.mxu1 }
 0x2b9   :  { %v1495_v37 = vpop.f32.mrf.mxu0  ;;  %8893 = vmatmul.mubr.msk.f32.vlgmr.msra.gmra.mxu0 %vm1402_vm5, %v1333_v61  ;;  %8918 = vmatmul.mubr.msk.f32.vlgmr.msra.gmra.mxu1 %vm1402_vm5, %v1368_v20 }
 0x2ba   :  { %v1370_v41 = vpop.f32.mrf.mxu1  ;;  %8895 = vmatprep.mubr.msk.f32.mxu0 %vm9848_vm4, %v13499_v8  ;;  %8920 = vmatprep.mubr.msk.f32.mxu1 %vm9848_vm4, %v13499_v8 }
 0x2bb   :  { %v8722_v57 = vpop.f32.mrf.mxu0 }
 0x2bc   :  { %v1373_v50 = vpop.f32.mrf.mxu1 }
 0x2bd   :  { %v1500_v26 = vpop.f32.mrf.mxu0  ;;  %8896 = vmatmul.mubr.msk.f32.gmra.mxu0 %vm1402_vm5, %v1338_v28  ;;  %8921 = vmatmul.mubr.msk.f32.gmra.mxu1 %vm1402_vm5, %v1373_v50 }
 0x2be   :  { %v1375_v49 = vpop.f32.mrf.mxu1  ;;  %8898 = vmatprep.mubr.msk.f32.mxu0 %vm9848_vm4, %v13499_v8  ;;  %8923 = vmatprep.mubr.msk.f32.mxu1 %vm9848_vm4, %v13499_v8 }
 0x2bf   :  { %v8725_v20 = vpop.f32.mrf.mxu0 }
 0x2c0   :  { %v1378_v61 = vpop.f32.mrf.mxu1 }
 0x2c1   :  { %v1505_v41 = vpop.f32.mrf.mxu0  ;;  %8899 = vmatmul.mubr.msk.f32.gmra.mxu0 %vm1402_vm5, %v1343_v32  ;;  %8924 = vmatmul.mubr.msk.f32.gmra.mxu1 %vm1402_vm5, %v1378_v61 }
 0x2c2   :  { %v1380_v57 = vpop.f32.mrf.mxu1  ;;  %8901 = vmatprep.mubr.msk.f32.mxu0 %vm9848_vm4, %v13499_v8  ;;  %8926 = vmatprep.mubr.msk.f32.mxu1 %vm9848_vm4, %v13499_v8 }
 0x2c3   :  { %v8728_v28 = vpop.f32.mrf.mxu0 }
 0x2c4   :  { %v1383_v50 = vpop.f32.mrf.mxu1 }
 0x2c5   :  { %v1510_v49 = vpop.f32.mrf.mxu0  ;;  %8902 = vmatmul.mubr.msk.f32.gmra.mxu0 %vm1402_vm5, %v1348_v34  ;;  %8927 = vmatmul.mubr.msk.f32.gmra.mxu1 %vm1402_vm5, %v1383_v50 }
 0x2c6   :  { %v1385_v20 = vpop.f32.mrf.mxu1  ;;  %8904 = vmatprep.mubr.msk.f32.mxu0 %vm9848_vm4, %v13499_v8  ;;  %8929 = vmatprep.mubr.msk.f32.mxu1 %vm9848_vm4, %v13499_v8 }
 0x2c7   :  { %v8731_v32 = vpop.f32.mrf.mxu0 }
 0x2c8   :  { %v1388_v61 = vpop.f32.mrf.mxu1 }
 0x2c9   :  { %v1515_v57 = vpop.f32.mrf.mxu0  ;;  %8905 = vmatmul.mubr.msk.f32.gmra.mxu0 %vm1402_vm5, %v1353_v24  ;;  %8930 = vmatmul.mubr.msk.f32.gmra.mxu1 %vm1402_vm5, %v1388_v61 }
 0x2ca   :  { %v1390_v28 = vpop.f32.mrf.mxu1  ;;  %8907 = vmatprep.mubr.msk.f32.mxu0 %vm9848_vm4, %v13499_v8  ;;  %8932 = vmatprep.mubr.msk.f32.mxu1 %vm9848_vm4, %v13499_v8 }
 0x2cb   :  { %v8734_v34 = vpop.f32.mrf.mxu0 }
 0x2cc   :  { %v1393_v50 = vpop.f32.mrf.mxu1 }
 0x2cd   :  { %v1520_v20 = vpop.f32.mrf.mxu0  ;;  %8908 = vmatmul.mubr.msk.f32.gmra.mxu0 %vm1402_vm5, %v1358_v31  ;;  %8933 = vmatmul.mubr.msk.f32.gmra.mxu1 %vm1402_vm5, %v1393_v50 }
 0x2ce   :  { %v1395_v32 = vpop.f32.mrf.mxu1  ;;  %8910 = vmatprep.mubr.msk.f32.mxu0 %vm9848_vm4, %v13499_v8  ;;  %8935 = vmatprep.mubr.msk.f32.mxu1 %vm9848_vm4, %v13499_v8 }
 0x2cf   :  { %v8737_v24 = vpop.f32.mrf.mxu0 }
 0x2d0   :  { %v1398_v61 = vpop.f32.mrf.mxu1 }
 0x2d1   :  { %v1611_v28 = vpop.f32.mrf.mxu0  ;;  %8911 = vmatmul.mubr.msk.f32.gmra.mxu0 %vm1402_vm5, %v1363_v48  ;;  %8936 = vmatmul.mubr.msk.f32.gmra.mxu1 %vm1402_vm5, %v1398_v61 }
 0x2d2   :  { %v1612_v34 = vadd.f32 %v1611_v28, %v1490_v39  ;;  %v1400_v43 = vpop.f32.mrf.mxu1  ;;  %8946 = vmatprep.mubr.msk.f32.mxu0 %vm9848_vm4, %v13499_v8  ;;  %8981 = vmatprep.mubr.msk.f32.mxu1 %vm9848_vm4, %v13499_v8 }
 0x2d3   :  { %v8744_v31 = vpop.f32.mrf.mxu0 }
 0x2d5   :  { %v1616_v50 = vpop.f32.mrf.mxu0 }
 0x2d6   :  { %v1617_v32 = vadd.f32 %v1616_v50, %v1495_v37 }
 0x2d7   :  { %v8747_v42 = vpop.f32.mrf.mxu0 }
 0x2d9   :  { %v1621_v33 = vpop.f32.mrf.mxu0 }
 0x2da   :  { %v1622_v24 = vadd.f32 %v1621_v33, %v1500_v26 }
 0x2db   :  { %v8750_v38 = vpop.f32.mrf.mxu0 }
 0x2dd   :  { %v1626_v25 = vpop.f32.mrf.mxu0 }
 0x2de   :  { %v1627_v47 = vadd.f32 %v1626_v25, %v1505_v41 }
 0x2df   :  { %v8753_v48 = vpop.f32.mrf.mxu0 }
 0x2e1   :  { %v1631_v40 = vpop.f32.mrf.mxu0 }
 0x2e2   :  { %v1632_v61 = vadd.f32 %v1631_v40, %v1510_v49  ;;  %v56_v40 = vld [vmem:[%s13185_s2 + $0x100] sm:$0xff] }
 0x2e3   :  { %v8756_v39 = vpop.f32.mrf.mxu0  ;;  %8939 = vmatpush3.msra.mxu0 %v56_v40 }
 0x2e4   :  { %8940 = vmatprep.subr.mxu0 %v13499_v8 }
 0x2e5   :  { %v1636_v43 = vpop.f32.mrf.mxu0 }
 0x2e6   :  { %v1637_v28 = vadd.f32 %v1636_v43, %v1515_v57  ;;  %v53_v57 = vld [vmem:[%s13185_s2 + $0xe8] sm:$0xff] }
 0x2e7   :  { %v8759_v35 = vpop.f32.mrf.mxu0 }
 0x2e9   :  { %v1641_v27 = vpop.f32.mrf.mxu0 }
 0x2ea   :  { %v1642_v22 = vadd.f32 %v1641_v27, %v1520_v20 }
 0x2eb   :  { %v8762_v17 = vpop.f32.mrf.mxu0 }
 0x2ec   :  { %v54_v17 = vld [vmem:[%s13185_s2 + $0xf0] sm:$0xff] }
 0x2ed   :  { %v1732_v13 = vpop.f32.mrf.mxu0 }
 0x2ee   :  { %v1766_v31 = vadd.f32 %v1732_v13, %v1612_v34 }
 0x2ef   :  { %v8769_v10 = vpop.f32.mrf.mxu0 }
 0x2f0   :  { %v55_v10 = vld [vmem:[%s13185_s2 + $0xf8] sm:$0xff] }
 0x2f1   :  { %v1737_v37 = vpop.f32.mrf.mxu0  ;;  %8941 = vmatpush3.msra.mxu0 %v55_v10 }
 0x2f2   :  { %v1767_v42 = vadd.f32 %v1737_v37, %v1617_v32  ;;  %8942 = vmatprep.subr.mxu0 %v13499_v8 }
 0x2f3   :  { %v8772_v50 = vpop.f32.mrf.mxu0  ;;  %8943 = vmatpush3.msra.mxu0 %v54_v17 }
 0x2f4   :  { %8944 = vmatprep.subr.mxu0 %v13499_v8 }
 0x2f5   :  { %v1742_v33 = vpop.f32.mrf.mxu0  ;;  %8945 = vmatpush3.msra.mxu0 %v53_v57 }
 0x2f6   :  { %v1768_v38 = vadd.f32 %v1742_v33, %v1622_v24 }
 0x2f7   :  { %v8775_v26 = vpop.f32.mrf.mxu0 }
 0x2f9   :  { %v1747_v25 = vpop.f32.mrf.mxu0 }
 0x2fa   :  { %v1769_v41 = vadd.f32 %v1747_v25, %v1627_v47 }
 0x2fb   :  { %v8778_v48 = vpop.f32.mrf.mxu0 }
 0x2fd   :  { %v1752_v35 = vpop.f32.mrf.mxu0 }
 0x2fe   :  { %v1770_v27 = vadd.f32 %v1752_v35, %v1632_v61 }
 0x2ff   :  { %v8781_v13 = vpop.f32.mrf.mxu0 }
 0x301   :  { %v1757_v47 = vpop.f32.mrf.mxu0 }
 0x302   :  { %v1771_v49 = vadd.f32 %v1757_v47, %v1637_v28 }
 0x303   :  { %v8784_v20 = vpop.f32.mrf.mxu0 }
 0x305   :  { %v1762_v34 = vpop.f32.mrf.mxu0 }
 0x306   :  { %v1772_v32 = vadd.f32 %v1762_v34, %v1642_v22 }
 0x307   :  { %v8787_v24 = vpop.f32.mrf.mxu0 }
 0x309   :  { %v1860_v61 = vpop.f32.mrf.mxu0 }
 0x30a   :  { %v1894_v39 = vadd.f32 %v1860_v61, %v1766_v31 }
 0x30b   :  { %v8794_v43 = vpop.f32.mrf.mxu0 }
 0x30d   :  { %v1865_v37 = vpop.f32.mrf.mxu0 }
 0x30e   :  { %v1895_v50 = vadd.f32 %v1865_v37, %v1767_v42 }
 0x30f   :  { %v8797_v33 = vpop.f32.mrf.mxu0 }
 0x311   :  { %v1870_v26 = vpop.f32.mrf.mxu0 }
 0x312   :  { %v1896_v25 = vadd.f32 %v1870_v26, %v1768_v38 }
 0x313   :  { %v8800_v28 = vpop.f32.mrf.mxu0 }
 0x315   :  { %v1875_v48 = vpop.f32.mrf.mxu0 }
 0x316   :  { %v1897_v40 = vadd.f32 %v1875_v48, %v1769_v41 }
 0x317   :  { %v8803_v35 = vpop.f32.mrf.mxu0 }
 0x319   :  { %v1880_v10 = vpop.f32.mrf.mxu0 }
 0x31a   :  { %v1898_v13 = vadd.f32 %v1880_v10, %v1770_v27 }
 0x31b   :  { %v8806_v17 = vpop.f32.mrf.mxu0 }
 0x31d   :  { %v1885_v47 = vpop.f32.mrf.mxu0 }
 0x31e   :  { %v1899_v57 = vadd.f32 %v1885_v47, %v1771_v49 }
 0x31f   :  { %v8809_v20 = vpop.f32.mrf.mxu0 }
 0x321   :  { %v1890_v22 = vpop.f32.mrf.mxu0 }
 0x322   :  { %v1900_v34 = vadd.f32 %v1890_v22, %v1772_v32 }
 0x323   :  { %v8812_v24 = vpop.f32.mrf.mxu0 }
 0x325   :  { %v1988_v31 = vpop.f32.mrf.mxu0 }
 0x326   :  { %v2022_v61 = vadd.f32 %v1988_v31, %v1894_v39 }
 0x327   :  { %v8819_v43 = vpop.f32.mrf.mxu0 }
 0x329   :  { %v1993_v42 = vpop.f32.mrf.mxu0 }
 0x32a   :  { %v2023_v37 = vadd.f32 %v1993_v42, %v1895_v50 }
 0x32b   :  { %v8822_v33 = vpop.f32.mrf.mxu0 }
 0x32d   :  { %v1998_v38 = vpop.f32.mrf.mxu0 }
 0x32e   :  { %v2024_v26 = vadd.f32 %v1998_v38, %v1896_v25 }
 0x32f   :  { %v8825_v28 = vpop.f32.mrf.mxu0 }
 0x331   :  { %v2003_v41 = vpop.f32.mrf.mxu0 }
 0x332   :  { %v11288_v48 = vadd.f32 %v2003_v41, %v1897_v40 }
 0x333   :  { %v8828_v27 = vpop.f32.mrf.mxu0 }
 0x335   :  { %v2008_v35 = vpop.f32.mrf.mxu0 }
 0x336   :  { %v11290_v10 = vadd.f32 %v2008_v35, %v1898_v13 }
 0x337   :  { %v8831_v49 = vpop.f32.mrf.mxu0 }
 0x339   :  { %v2013_v17 = vpop.f32.mrf.mxu0 }
 0x33a   :  { %v11292_v32 = vadd.f32 %v2013_v17, %v1899_v57 }
 0x33b   :  { %v8834_v47 = vpop.f32.mrf.mxu0 }
 0x33d   :  { %v2018_v39 = vpop.f32.mrf.mxu0 }
 0x33e   :  { %v11294_v20 = vadd.f32 %v2018_v39, %v1900_v34 }
 0x33f   :  { %v8837_v50 = vpop.f32.mrf.mxu0 }
 0x341   :  { %v2116_v22 = vpop.f32.mrf.mxu0 }
 0x342   :  { %v2150_v4 = vadd.f32 %v2116_v22, %v2022_v61 }
 0x343   :  { %v8844_v24 = vpop.f32.mrf.mxu0 }
 0x345   :  { %v2121_v25 = vpop.f32.mrf.mxu0 }
 0x346   :  { %v2151_v59 = vadd.f32 %v2121_v25, %v2023_v37 }
 0x347   :  { %v8847_v31 = vpop.f32.mrf.mxu0 }
 0x349   :  { %v2126_v43 = vpop.f32.mrf.mxu0 }
 0x34a   :  { %v2152_v45 = vadd.f32 %v2126_v43, %v2024_v26 }
 0x34b   :  { %v8850_v40 = vpop.f32.mrf.mxu0 }
 0x34d   :  { %v2131_v42 = vpop.f32.mrf.mxu0 }
 0x34f   :  { %v8853_v33 = vpop.f32.mrf.mxu0 }
 0x351   :  { %v2136_v38 = vpop.f32.mrf.mxu0 }
 0x353   :  { %v8856_v13 = vpop.f32.mrf.mxu0 }
 0x355   :  { %v11296_v28 = vpop.f32.mrf.mxu0 }
 0x357   :  { %v8859_v41 = vpop.f32.mrf.mxu0 }
 0x359   :  { %v11298_v57 = vpop.f32.mrf.mxu0 }
 0x35b   :  { %v8862_v27 = vpop.f32.mrf.mxu0 }
 0x35d   :  { %v2244_v35 = vpop.f32.mrf.mxu0 }
 0x35e   :  { %v2278_v1 = vadd.f32 %v2244_v35, %v2150_v4 }
 0x35f   :  { %v8869_v34 = vpop.f32.mrf.mxu0 }
 0x361   :  { %v2249_v49 = vpop.f32.mrf.mxu0 }
 0x363   :  { %v8872_v17 = vpop.f32.mrf.mxu0 }
 0x364   :  { %v11307_v17 = vld [vmem:[%s13185_s2 + $0xa8] ss:$0 sm:$0xff] }
 0x365   :  { %v2254_v47 = vpop.f32.mrf.mxu0 }
 0x367   :  { %v8875_v39 = vpop.f32.mrf.mxu0 }
 0x369   :  { %v2259_v50 = vpop.f32.mrf.mxu0 }
 0x36b   :  { %v8878_v24 = vpop.f32.mrf.mxu0 }
 0x36d   :  { %v2264_v31 = vpop.f32.mrf.mxu0 }
 0x36f   :  { %v8881_v40 = vpop.f32.mrf.mxu0 }
 0x370   :  { %v2279_v40 = vadd.f32 %v2249_v49, %v2151_v59  ;;  %v2153_v59 = vadd.f32 %v2131_v42, %v11288_v48  ;;  %v2154_v48 = vadd.f32 %v2136_v38, %v11290_v10  ;;  %v2155_v10 = vadd.f32 %v11296_v28, %v11292_v32 }
 0x371   :  { %v11300_v7 = vpop.f32.mrf.mxu0  ;;  %v2156_v28 = vadd.f32 %v11298_v57, %v11294_v20 }
 0x373   :  { %v8884_v33 = vpop.f32.mrf.mxu0 }
 0x375   :  { %v11302_v13 = vpop.f32.mrf.mxu0 }
 0x377   :  { %v8887_v41 = vpop.f32.mrf.mxu0 }
 0x379   :  { %v2372_v62 = vpop.f32.mrf.mxu0  ;;  %v2500_v27 = vpop.f32.mrf.mxu1 }
 0x37a   :  { %v2406_v34 = vadd.f32 %v2372_v62, %v2278_v1  ;;  %v46_v62 = vld [vmem:[%s13185_s2 + $0xb0] sm:$0xff]  ;;  %v2280_v1 = vadd.f32 %v2254_v47, %v2152_v45  ;;  %v2281_v45 = vadd.f32 %v2259_v50, %v2153_v59  ;;  %v48_v50 = vld [vmem:[%s13185_s2 + $0xc0] sm:$0xff] }
 0x37b   :  { %v8894_v39 = vpop.f32.mrf.mxu0  ;;  %v8919_v24 = vpop.f32.mrf.mxu1 }
 0x37c   :  { %v2534_v56 = vadd.f32 %v2500_v27, %v2406_v34  ;;  %v47_v27 = vld [vmem:[%s13185_s2 + $0xb8] sm:$0xff] }
 0x37d   :  { %v2377_v53 = vpop.f32.mrf.mxu0  ;;  %v2505_v33 = vpop.f32.mrf.mxu1 }
 0x37e   :  { %v2545_v61 = vadd.f32 %v11307_v17, %v2534_v56  ;;  %v2407_v22 = vadd.f32 %v2377_v53, %v2279_v40 }
 0x37f   :  { %v8897_v4 = vpop.f32.mrf.mxu0  ;;  %v8922_v35 = vpop.f32.mrf.mxu1 }
 0x380   :  { %v11313_v37 = vmax.f32 %v2545_v61, 0.0  ;;  %v2535_v25 = vadd.f32 %v2505_v33, %v2407_v22  ;;  %v2282_v35 = vadd.f32 %v2264_v31, %v2154_v48  ;;  %v50_v48 = vld [vmem:[%s13185_s2 + $0xd0] sm:$0xff] }
 0x381   :  { %v2382_v41 = vpop.f32.mrf.mxu0  ;;  %v2510_v39 = vpop.f32.mrf.mxu1 }
 0x382   :  { %v2546_v26 = vadd.f32 %v11307_v17, %v2535_v25  ;;  %v2408_v43 = vadd.f32 %v2382_v41, %v2280_v1  ;;  %v2559_v53 = vadd.f32 %v11313_v37, %v46_v62 }
 0x383   :  { %v8900_v56 = vpop.f32.mrf.mxu0  ;;  %v8925_v49 = vpop.f32.mrf.mxu1 }
 0x384   :  { %v11321_v47 = vmax.f32 %v2546_v26, 0.0  ;;  %v2536_v34 = vadd.f32 %v2510_v39, %v2408_v43  ;;  %8947 = vmatmul.mubr.msk.f32.vlgmr.msra.gmra.mxu0 %vm2570_vm6, %v2559_v53  ;;  %v49_v43 = vld [vmem:[%s13185_s2 + $0xc8] sm:$0xff]  ;;  %v2283_v53 = vadd.f32 %v11300_v7, %v2155_v10 }
 0x385   :  { %v2387_v24 = vpop.f32.mrf.mxu0  ;;  %v2515_v40 = vpop.f32.mrf.mxu1  ;;  %8949 = vmatprep.mubr.msk.f32.mxu0 %vm9848_vm4, %v13499_v8 }
 0x386   :  { %v2547_v42 = vadd.f32 %v11307_v17, %v2536_v34  ;;  %v2409_v33 = vadd.f32 %v2387_v24, %v2281_v45  ;;  %v2560_v61 = vadd.f32 %v11321_v47, %v47_v27 }
 0x387   :  { %v8903_v22 = vpop.f32.mrf.mxu0  ;;  %v8928_v4 = vpop.f32.mrf.mxu1 }
 0x388   :  { %v11332_v62 = vmax.f32 %v2547_v42, 0.0  ;;  %v2537_v1 = vadd.f32 %v2515_v40, %v2409_v33  ;;  %8950 = vmatmul.mubr.msk.f32.gmra.mxu0 %vm2570_vm6, %v2560_v61  ;;  %v2284_v42 = vadd.f32 %v11302_v13, %v2156_v28  ;;  %v51_v13 = vld [vmem:[%s13185_s2 + $0xd8] sm:$0xff] }
 0x389   :  { %v2392_v25 = vpop.f32.mrf.mxu0  ;;  %v2520_v41 = vpop.f32.mrf.mxu1  ;;  %8952 = vmatprep.mubr.msk.f32.mxu0 %vm9848_vm4, %v13499_v8 }
 0x38a   :  { %v2548_v38 = vadd.f32 %v11307_v17, %v2537_v1  ;;  %v2410_v39 = vadd.f32 %v2392_v25, %v2282_v35  ;;  %v2561_v59 = vadd.f32 %v11332_v62, %v48_v50 }
 0x38b   :  { %v8906_v26 = vpop.f32.mrf.mxu0  ;;  %v8931_v31 = vpop.f32.mrf.mxu1 }
 0x38c   :  { %v11345_v56 = vmax.f32 %v2548_v38, 0.0  ;;  %v2538_v49 = vadd.f32 %v2520_v41, %v2410_v39  ;;  %8953 = vmatmul.mubr.msk.f32.gmra.mxu0 %vm2570_vm6, %v2561_v59  ;;  %v52_v39 = vld [vmem:[%s13185_s2 + $0xe0] sm:$0x1] }
 0x38d   :  { %v2397_v27 = vpop.f32.mrf.mxu0  ;;  %v2525_v32 = vpop.f32.mrf.mxu1  ;;  %8955 = vmatprep.mubr.msk.f32.mxu0 %vm9848_vm4, %v13499_v8 }
 0x38e   :  { %v2549_v45 = vadd.f32 %v11307_v17, %v2538_v49  ;;  %v2411_v34 = vadd.f32 %v2397_v27, %v2283_v53  ;;  %v2562_v24 = vadd.f32 %v11345_v56, %v49_v43 }
 0x38f   :  { %v8909_v40 = vpop.f32.mrf.mxu0  ;;  %v8934_v7 = vpop.f32.mrf.mxu1 }
 0x390   :  { %v11358_v33 = vmax.f32 %v2549_v45, 0.0  ;;  %v2539_v61 = vadd.f32 %v2525_v32, %v2411_v34  ;;  %8956 = vmatmul.mubr.msk.f32.gmra.mxu0 %vm2570_vm6, %v2562_v24  ;;  %v7849_v7 = vld [vmem:[%s13185_s2 + $0x108] ss:$0 sm:$0xff] }
 0x391   :  { %v2402_v22 = vpop.f32.mrf.mxu0  ;;  %v2530_v20 = vpop.f32.mrf.mxu1  ;;  %8958 = vmatprep.mubr.msk.f32.mxu0 %vm9848_vm4, %v13499_v8 }
 0x392   :  { %v2550_v57 = vadd.f32 %v11307_v17, %v2539_v61  ;;  %v2412_v4 = vadd.f32 %v2402_v22, %v2284_v42  ;;  %v2563_v50 = vadd.f32 %v11358_v33, %v50_v48 }
 0x393   :  { %v8912_v35 = vpop.f32.mrf.mxu0  ;;  %v8937_v1 = vpop.f32.mrf.mxu1 }
 0x394   :  { %v11368_v25 = vmax.f32 %v2550_v57, 0.0  ;;  %v2540_v41 = vadd.f32 %v2530_v20, %v2412_v4  ;;  %8959 = vmatmul.mubr.msk.f32.gmra.mxu0 %vm2570_vm6, %v2563_v50  ;;  %v58_v1 = vld [vmem:[%s13185_s2 + $0x110] sm:$0xff] }
 0x395   :  { %8961 = vmatprep.mubr.msk.f32.mxu0 %vm9848_vm4, %v13499_v8 }
 0x396   :  { %v2551_v10 = vadd.f32 %v11307_v17, %v2540_v41  ;;  %v2564_v38 = vadd.f32 %v11368_v25, %v51_v13  ;;  %v59_v13 = vld [vmem:[%s13185_s2 + $0x118] sm:$0xff]  ;;  %v60_v41 = vld [vmem:[%s13185_s2 + $0x120] sm:$0xff] }
 0x398   :  { %v11378_v59 = vmax.f32 %v2551_v10, 0.0  ;;  %8962 = vmatmul.mubr.msk.f32.gmra.mxu0 %vm2570_vm6, %v2564_v38  ;;  %v61_v10 = vld [vmem:[%s13185_s2 + $0x128] sm:$0xff]  ;;  %v62_v38 = vld [vmem:[%s13185_s2 + $0x130] sm:$0x1] }
 0x399   :  { %8964 = vmatprep.mubr.msk.f32.mxu0 %vm9848_vm4, %v13499_v8 }
 0x39a   :  { %9007 = vmatprep.subr.msk.mxu0 %vm459_vm0, %v11378_v59  ;;  %v2565_v26 = vadd.f32 %v11378_v59, %v52_v39  ;;  %v11450_v39 = vld [vmem:[%s13185_s2 + $0x138] sm:$0xff] }
 0x39b   :  { %9008 = vmatpush3.msk.msra.mxu0 %vm459_vm0, %v11378_v59 }
 0x39c   :  { %8965 = vmatmul.mubr.msk.f32.gmra.mxu0 %vm2570_vm6, %v2565_v26  ;;  %9009 = vmatprep.subr.mxu0 %v11368_v25 }
 0x39d   :  { %9010 = vmatpush3.msra.mxu0 %v11368_v25 }
 0x39e   :  { %9011 = vmatprep.subr.mxu0 %v11358_v33 }
 0x39f   :  { %9012 = vmatpush3.msra.mxu0 %v11358_v33 }
 0x3a0   :  { %9013 = vmatprep.subr.mxu0 %v11345_v56 }
 0x3a1   :  { %9014 = vmatpush3.msra.mxu0 %v11345_v56 }
 0x3a2   :  { %9015 = vmatprep.subr.mxu0 %v11332_v62 }
 0x3a3   :  { %9016 = vmatpush3.msra.mxu0 %v11332_v62 }
 0x3a4   :  { %9017 = vmatprep.subr.mxu0 %v11321_v47 }
 0x3a5   :  { %9018 = vmatpush3.msra.mxu0 %v11321_v47 }
 0x3a6   :  { %9019 = vmatprep.subr.mxu0 %v11313_v37 }
 0x3a7   :  { %9020 = vmatpush3.msra.mxu0 %v11313_v37 }
 0x3a8   :  { %9035 = vmatprep.subr.msk.mxu0 %vm459_vm0, %v11378_v59 }
 0x444   :  { %v2658_v17 = vpop.f32.mrf.mxu0 }
 0x445   :  { %v2659_v35 = vadd.f32 %v7849_v7, %v2658_v17 }
 0x446   :  { %v8948_v31 = vpop.f32.mrf.mxu0 }
 0x448   :  { %v2663_v43 = vpop.f32.mrf.mxu0 }
 0x449   :  { %v2664_v50 = vadd.f32 %v7849_v7, %v2663_v43 }
 0x44a   :  { %v8951_v53 = vpop.f32.mrf.mxu0 }
 0x44c   :  { %v2668_v49 = vpop.f32.mrf.mxu0 }
 0x44d   :  { %v2669_v4 = vadd.f32 %v7849_v7, %v2668_v49 }
 0x44e   :  { %v8954_v27 = vpop.f32.mrf.mxu0 }
 0x450   :  { %v2673_v32 = vpop.f32.mrf.mxu0 }
 0x451   :  { %v2674_v57 = vadd.f32 %v7849_v7, %v2673_v32 }
 0x452   :  { %v8957_v28 = vpop.f32.mrf.mxu0 }
 0x453   :  { %v64_v28 = vld [vmem:[%s13185_s2 + $0x140] sm:$0x3] }
 0x454   :  { %v2678_v45 = vpop.f32.mrf.mxu0 }
 0x455   :  { %v2679_v20 = vadd.f32 %v7849_v7, %v2678_v45 }
 0x456   :  { %v8960_v34 = vpop.f32.mrf.mxu0 }
 0x458   :  { %v2683_v24 = vpop.f32.mrf.mxu0 }
 0x459   :  { %v2684_v22 = vadd.f32 %v7849_v7, %v2683_v24  ;;  %v2818_v24 = vlaneseq }
 0x45a   :  { %v8963_v40 = vpop.f32.mrf.mxu0 }
 0x45b   :  { %v11484_v40 = vshrl.u32 %v2818_v24, 7 }
 0x45c   :  { %v2688_v48 = vpop.f32.mrf.mxu0 }
 0x45d   :  { %v2689_v42 = vadd.f32 %v7849_v7, %v2688_v48  ;;  %v11487_v7 = vsub.s32 0, %v11484_v40 }
 0x45e   :  { %v8966_v61 = vpop.f32.mrf.mxu0 }
 0x45f   :  { %8968 = vmatpush3.xpose.msk.msra.mxu1 %vm2570_vm6, %v2689_v42 }
 0x460   :  { %8969 = vmatprep.subr.mxu1 %v13499_v8 }
 0x463   :  { %8970 = vmatpush3.xpose.msk.msra.mxu1 %vm2570_vm6, %v2684_v22 }
 0x464   :  { %8971 = vmatprep.subr.mxu1 %v13499_v8 }
 0x467   :  { %8972 = vmatpush3.xpose.msk.msra.mxu1 %vm2570_vm6, %v2679_v20 }
 0x468   :  { %8973 = vmatprep.subr.mxu1 %v13499_v8 }
 0x46b   :  { %8974 = vmatpush3.xpose.msk.msra.mxu1 %vm2570_vm6, %v2674_v57 }
 0x46c   :  { %8975 = vmatprep.subr.mxu1 %v13499_v8 }
 0x46f   :  { %8976 = vmatpush3.xpose.msk.msra.mxu1 %vm2570_vm6, %v2669_v4 }
 0x470   :  { %8977 = vmatprep.subr.mxu1 %v13499_v8 }
 0x473   :  { %8978 = vmatpush3.xpose.msk.msra.mxu1 %vm2570_vm6, %v2664_v50 }
 0x474   :  { %8979 = vmatprep.subr.mxu1 %v13499_v8 }
 0x477   :  { %8980 = vmatpush3.xpose.msk.msra.mxu1 %vm2570_vm6, %v2659_v35 }
 0x47a   :  { %8982 = vmatmul.mubr.msk.f32.vlgmr.msra.gmra.mxu1 %vm2570_vm6, %v58_v1 }
 0x47b   :  { %8984 = vmatprep.mubr.msk.f32.mxu1 %vm9848_vm4, %v13499_v8 }
 0x47e   :  { %8985 = vmatmul.mubr.msk.f32.gmra.mxu1 %vm2570_vm6, %v59_v13 }
 0x47f   :  { %8987 = vmatprep.mubr.msk.f32.mxu1 %vm9848_vm4, %v13499_v8 }
 0x482   :  { %8988 = vmatmul.mubr.msk.f32.gmra.mxu1 %vm2570_vm6, %v60_v41 }
 0x483   :  { %8990 = vmatprep.mubr.msk.f32.mxu1 %vm9848_vm4, %v13499_v8 }
 0x486   :  { %8991 = vmatmul.mubr.msk.f32.gmra.mxu1 %vm2570_vm6, %v61_v10 }
 0x487   :  { %8993 = vmatprep.mubr.msk.f32.mxu1 %vm9848_vm4, %v13499_v8 }
 0x48a   :  { %8994 = vmatmul.mubr.msk.f32.gmra.mxu1 %vm2570_vm6, %v62_v38 }
 0x48b   :  { %9004 = vmatprep.mubr.msk.f32.mxu1 %vm2570_vm6, %v11450_v39 }
 0x53a   :  { %v11454_v26 = vpop.f32.mrf.mxu1 }
 0x53c   :  { %v8983_v17 = vpop.f32.mrf.mxu1 }
 0x53e   :  { %v11456_v31 = vpop.f32.mrf.mxu1 }
 0x540   :  { %v8986_v43 = vpop.f32.mrf.mxu1 }
 0x542   :  { %v11458_v53 = vpop.f32.mrf.mxu1 }
 0x544   :  { %v8989_v49 = vpop.f32.mrf.mxu1 }
 0x546   :  { %v11460_v27 = vpop.f32.mrf.mxu1 }
 0x547   :  { %8996 = vmatprep.subr.mxu1 %v11460_v27 }
 0x548   :  { %v8992_v32 = vpop.f32.mrf.mxu1  ;;  %8997 = vmatpush3.msra.mxu1 %v11460_v27 }
 0x549   :  { %8998 = vmatprep.subr.mxu1 %v11458_v53 }
 0x54a   :  { %8999 = vmatpush3.msra.mxu1 %v11458_v53  ;;  %v2814_v45 = vpop.f32.mrf.mxu1 }
 0x54b   :  { %9000 = vmatprep.subr.mxu1 %v11456_v31  ;;  %v11490_v48 = vrot.slane %v2814_v45, %v11487_v7 }
 0x54c   :  { %9001 = vmatpush3.msra.mxu1 %v11456_v31  ;;  %v8995_v34 = vpop.f32.mrf.mxu1 }
 0x54d   :  { %9002 = vmatprep.subr.mxu1 %v11454_v26 }
 0x54e   :  { %9003 = vmatpush3.msra.mxu1 %v11454_v26 }
 0x54f   :  { %9005 = vmatmul.mubr.msk.f32.vlgmr.msra.gmra.mxu1 %vm2570_vm6, %v64_v28  ;;  %9024 = vmatprep.subr.mxu1 %v11460_v27 }
 0x550   :  { %9025 = vmatpush3.msra.mxu1 %v11460_v27 }
 0x551   :  { %9026 = vmatprep.subr.mxu1 %v11458_v53 }
 0x552   :  { %9027 = vmatpush3.msra.mxu1 %v11458_v53 }
 0x553   :  { %9028 = vmatprep.subr.mxu1 %v11456_v31 }
 0x554   :  { %9029 = vmatpush3.msra.mxu1 %v11456_v31 }
 0x555   :  { %9030 = vmatprep.subr.mxu1 %v11454_v26 }
 0x556   :  { %9031 = vmatpush3.msra.mxu1 %v11454_v26 }
 0x557   :  { %9052 = vmatprep.subr.mxu1 %v11460_v27 }
 0x60f   :  { %v9006_v42 = vpop.f32.mrf.mxu1 }
 0x610   :  { %v2900_v61 = vadd.f32 %v9006_v42, %v11490_v48 }
 0x611   :  { %v2894_v22 = vpop.f32.mrf.mxu1 }
 0x612   :  { %v7872_v20 = vmul.f32 -1.442695, %v2900_v61  ;;  %v2895_v57 = vadd.f32 %v2894_v22, %v11490_v48 }
 0x614   :  { %9715 = vpow2.f32 %v7872_v20  ;;  %v7871_v4 = vmul.f32 -1.442695, %v2895_v57 }
 0x616   :  { %9717 = vpow2.f32 %v7871_v4 }
 0x621   :  { %v9716_v50 = vpop.eup %9715 }
 0x622   :  { %v2910_v1 = vadd.f32 1.0, %v9716_v50 }
 0x623   :  { %v9718_v35 = vpop.eup %9717 }
 0x624   :  { %v2909_v13 = vadd.f32 1.0, %v9718_v35 }
 0x626   :  { %9719 = vrcp.f32 %v2909_v13 }
 0x627   :  { %9721 = vrcp.f32 %v2910_v1 }
 0x633   :  { %v9720_v41 = vpop.eup %9719 }
 0x634   :  { %v2916_v10 = vsel %vm2915_vm7, %v9720_v41, 0.0  ;;  %v9722_v38 = vpop.eup %9721 }
 0x635   :  { %2917 = vadd.xlane.f32.xlu0 %v2916_v10  ;;  %v2920_v17 = vsel %vm2919_vm8, %v9722_v38, 0.0 }
 0x639   :  { %2921 = vadd.xlane.f32.xlu0 %v2920_v17 }
 0x6be   :  { %v2918_v43 = vpop.xlane.xlu0 %2917 }
 0x6bf   :  { %v2923_v49 = vadd.f32 1e-08, %v2918_v43 }
 0x6c1   :  { %9723 = vrcp.f32 %v2923_v49 }
 0x6c2   :  { %v2922_v32 = vpop.xlane.xlu0 %2921 }
 0x6c3   :  { %v2924_v28 = vadd.f32 1e-08, %v2922_v32 }
 0x6c5   :  { %9725 = vrcp.f32 %v2924_v28 }
 0x6ce   :  { %v9724_v45 = vpop.eup %9723 }
 0x6cf   :  { %v2926_v34 = vmul.f32 %v9724_v45, %v9720_v41 }
 0x6d1   :  { %9021 = vmatprep.mubr.msk.f32.mxu0 %vm2915_vm7, %v2926_v34 }
 0x6d2   :  { %v9726_v42 = vpop.eup %9725 }
 0x6d3   :  { %v2928_v61 = vmul.f32 %v9726_v42, %v9722_v38 }
 0x6d5   :  { %9022 = vmatmul.mubr.msk.f32.vlgmr.msra.gmra.mxu0 %vm2915_vm7, %v2928_v61 }
 0x6d6   :  { %9036 = vmatpush3.msk.msra.mxu0 %vm459_vm0, %v11378_v59 }
 0x6d7   :  { %9037 = vmatprep.subr.mxu0 %v11368_v25 }
 0x6d8   :  { %9038 = vmatpush3.msra.mxu0 %v11368_v25 }
 0x6d9   :  { %9039 = vmatprep.subr.mxu0 %v11358_v33 }
 0x6da   :  { %9040 = vmatpush3.msra.mxu0 %v11358_v33 }
 0x6db   :  { %9041 = vmatprep.subr.mxu0 %v11345_v56 }
 0x6dc   :  { %9042 = vmatpush3.msra.mxu0 %v11345_v56 }
 0x6dd   :  { %9043 = vmatprep.subr.mxu0 %v11332_v62 }
 0x6de   :  { %9044 = vmatpush3.msra.mxu0 %v11332_v62 }
 0x6df   :  { %9045 = vmatprep.subr.mxu0 %v11321_v47 }
 0x6e0   :  { %9046 = vmatpush3.msra.mxu0 %v11321_v47 }
 0x6e1   :  { %9047 = vmatprep.subr.mxu0 %v11313_v37 }
 0x6e2   :  { %9048 = vmatpush3.msra.mxu0 %v11313_v37 }
 0x6e3   :  { %9063 = vmatprep.subr.msk.mxu0 %vm459_vm0, %v11378_v59 }
 0x795   :  { %v9023_v22 = vpop.f32.mrf.mxu0 }
 0x797   :  { %v3004_v20 = vpop.f32.mrf.mxu0 }
 0x798   :  { %9032 = vmatprep.mubr.msk.f32.mxu1 %vm2570_vm6, %v3004_v20 }
 0x799   :  { %9033 = vmatmul.mubr.msk.f32.vlgmr.msra.gmra.mxu1 %vm2570_vm6, %v9023_v22 }
 0x79a   :  { %9053 = vmatpush3.msra.mxu1 %v11460_v27 }
 0x79b   :  { %9054 = vmatprep.subr.mxu1 %v11458_v53 }
 0x79c   :  { %9055 = vmatpush3.msra.mxu1 %v11458_v53 }
 0x79d   :  { %9056 = vmatprep.subr.mxu1 %v11456_v31 }
 0x79e   :  { %9057 = vmatpush3.msra.mxu1 %v11456_v31 }
 0x79f   :  { %9058 = vmatprep.subr.mxu1 %v11454_v26 }
 0x7a0   :  { %9059 = vmatpush3.msra.mxu1 %v11454_v26 }
 0x7a1   :  { %9080 = vmatprep.subr.mxu1 %v13499_v8 }
 0x859   :  { %v9034_v57 = vpop.f32.mrf.mxu1 }
 0x85a   :  { %v3091_v4 = vadd.f32 %v9034_v57, %v11490_v48 }
 0x85b   :  { %v3085_v50 = vpop.f32.mrf.mxu1 }
 0x85c   :  { %v7879_v35 = vmul.f32 -1.442695, %v3091_v4  ;;  %v3086_v27 = vadd.f32 %v3085_v50, %v11490_v48 }
 0x85e   :  { %9727 = vpow2.f32 %v7879_v35  ;;  %v7878_v1 = vmul.f32 -1.442695, %v3086_v27 }
 0x860   :  { %9729 = vpow2.f32 %v7878_v1 }
 0x86b   :  { %v9728_v53 = vpop.eup %9727 }
 0x86c   :  { %v3101_v41 = vadd.f32 1.0, %v9728_v53 }
 0x86d   :  { %v9730_v13 = vpop.eup %9729 }
 0x86e   :  { %v3100_v31 = vadd.f32 1.0, %v9730_v13 }
 0x870   :  { %9731 = vrcp.f32 %v3100_v31 }
 0x871   :  { %9733 = vrcp.f32 %v3101_v41 }
 0x87d   :  { %v9732_v10 = vpop.eup %9731 }
 0x87e   :  { %v3106_v26 = vsel %vm2915_vm7, %v9732_v10, 0.0  ;;  %v9734_v38 = vpop.eup %9733 }
 0x87f   :  { %3107 = vadd.xlane.f32.xlu1 %v3106_v26  ;;  %v3109_v17 = vsel %vm2919_vm8, %v9734_v38, 0.0 }
 0x883   :  { %3110 = vadd.xlane.f32.xlu1 %v3109_v17 }
 0x908   :  { %v3108_v43 = vpop.xlane.xlu1 %3107 }
 0x909   :  { %v3112_v49 = vadd.f32 1e-08, %v3108_v43 }
 0x90b   :  { %9735 = vrcp.f32 %v3112_v49 }
 0x90c   :  { %v3111_v32 = vpop.xlane.xlu1 %3110 }
 0x90d   :  { %v3113_v28 = vadd.f32 1e-08, %v3111_v32 }
 0x90f   :  { %9737 = vrcp.f32 %v3113_v28 }
 0x918   :  { %v9736_v45 = vpop.eup %9735 }
 0x919   :  { %v3115_v34 = vmul.f32 %v9736_v45, %v9732_v10 }
 0x91b   :  { %9049 = vmatprep.mubr.msk.f32.mxu0 %vm2915_vm7, %v3115_v34  ;;  %v11579_v34 = vld [vmem:[%s13185_s2 + $0x10] ss:$0 sm:$0xff] }
 0x91c   :  { %v9738_v42 = vpop.eup %9737 }
 0x91d   :  { %v3117_v61 = vmul.f32 %v9738_v42, %v9734_v38  ;;  %v3395_v38 = vand.u32 127, %v2818_v24  ;;  %v730_v42 = vadd.f32 %v11579_v34, %v11178_v5  ;;  %v715_v5 = vadd.f32 %v11579_v34, %v11145_v12 }
 0x91e   :  { %v700_v12 = vadd.f32 %v11579_v34, %v11140_v51  ;;  %v685_v51 = vadd.f32 %v11579_v34, %v11114_v54  ;;  %v670_v54 = vadd.f32 %v11579_v34, %v11105_v60  ;;  %v655_v60 = vadd.f32 %v11579_v34, %v10059_v16 }
 0x91f   :  { %9050 = vmatmul.mubr.msk.f32.vlgmr.msra.gmra.mxu0 %vm2915_vm7, %v3117_v61  ;;  %v3400_v17 = vadd.s32 4294967288, %v3395_v38  ;;  %v11574_v49 = vsub.s32 %v3395_v38, %v11484_v40  ;;  %v765_v16 = vadd.f32 %v11579_v34, %v11211_v19  ;;  %v750_v19 = vadd.f32 %v11579_v34, %v11206_v44 }
 0x920   :  { %9064 = vmatpush3.msk.msra.mxu0 %vm459_vm0, %v11378_v59  ;;  %v803_v38 = vmax.f32 %v655_v60, 0.0  ;;  %v735_v44 = vadd.f32 %v11579_v34, %v11173_v0  ;;  %v13508_v0 = vunpack.c.l.bf16 %v10096_v46  ;;  %v13542_v60 = vld [vmem:[#allocation14_spill] sm:$0xff] }
 0x921   :  { %9065 = vmatprep.subr.mxu0 %v11368_v25  ;;  %v11571_v43 = vsub.s32 %v3400_v17, %v11484_v40 }
 0x922   :  { %9066 = vmatpush3.msra.mxu0 %v11368_v25 }
 0x923   :  { %9067 = vmatprep.subr.mxu0 %v11358_v33 }
 0x924   :  { %9068 = vmatpush3.msra.mxu0 %v11358_v33 }
 0x925   :  { %9069 = vmatprep.subr.mxu0 %v11345_v56 }
 0x926   :  { %9070 = vmatpush3.msra.mxu0 %v11345_v56 }
 0x927   :  { %9071 = vmatprep.subr.mxu0 %v11332_v62 }
 0x928   :  { %9072 = vmatpush3.msra.mxu0 %v11332_v62  ;;  %v9809_v62 = vld [vmem:[%s13185_s2 + $0x30] sm:$0xff] }
 0x929   :  { %9073 = vmatprep.subr.mxu0 %v11321_v47 }
 0x92a   :  { %9074 = vmatpush3.msra.mxu0 %v11321_v47 }
 0x92b   :  { %9075 = vmatprep.subr.mxu0 %v11313_v37 }
 0x92c   :  { %9076 = vmatpush3.msra.mxu0 %v11313_v37  ;;  %v9810_v37 = vld [vmem:[%s13185_s2 + $0x28] sm:$0xff] }
 0x92d   :  { %3413 = vmatprep.subr.mxu0 %v13499_v8 }
 0x9df   :  { %v9051_v25 = vpop.f32.mrf.mxu0 }
 0x9e1   :  { %v3190_v33 = vpop.f32.mrf.mxu0 }
 0x9e2   :  { %9060 = vmatprep.mubr.msk.f32.mxu1 %vm2570_vm6, %v3190_v33  ;;  %v725_v33 = vadd.f32 %v11579_v34, %v11163_v21  ;;  %v13505_v21 = vunpack.c.h.bf16 %v10008_v29 }
 0x9e3   :  { %9061 = vmatmul.mubr.msk.f32.vlgmr.msra.gmra.mxu1 %vm2570_vm6, %v9051_v25 }
 0x9e4   :  { %9081 = vmatpush3.msra.mxu1 %v9809_v62  ;;  %9084 = vmatprep.mubr.msk.f32.mxu1 %vm9848_vm4, %v13499_v8 }
 0x9e5   :  { %9082 = vmatprep.subr.mxu1 %v13499_v8 }
 0x9e6   :  { %9083 = vmatpush3.msra.mxu1 %v9810_v37 }
 0x9e7   :  { %9105 = vmatprep.subr.mxu1 %v13499_v8 }
 0xaa3   :  { %v9062_v47 = vpop.f32.mrf.mxu1 }
 0xaa4   :  { %v3277_v56 = vadd.f32 %v9062_v47, %v11490_v48 }
 0xaa5   :  { %v3271_v59 = vpop.f32.mrf.mxu1 }
 0xaa6   :  { %v7886_v22 = vmul.f32 -1.442695, %v3277_v56  ;;  %v3272_v20 = vadd.f32 %v3271_v59, %v11490_v48  ;;  %v720_v56 = vadd.f32 %v11579_v34, %v11168_v23  ;;  %v818_v59 = vmax.f32 %v730_v42, 0.0 }
 0xaa7   :  { %v710_v23 = vadd.f32 %v11579_v34, %v11156_v15  ;;  %v695_v15 = vadd.f32 %v11579_v34, %v11125_v9  ;;  %v680_v9 = vadd.f32 %v11579_v34, %v11120_v52  ;;  %v665_v52 = vadd.f32 %v11579_v34, %v11087_v3 }
 0xaa8   :  { %9739 = vpow2.f32 %v7886_v22  ;;  %v7885_v57 = vmul.f32 -1.442695, %v3272_v20  ;;  %v817_v22 = vmax.f32 %v725_v33, 0.0  ;;  %v816_v20 = vmax.f32 %v720_v56, 0.0 }
 0xaa9   :  { %v775_v3 = vadd.f32 %v11579_v34, %v11221_v18  ;;  %v760_v18 = vadd.f32 %v11579_v34, %v11216_v63  ;;  %v745_v63 = vadd.f32 %v11579_v34, %v11183_v58  ;;  %v819_v58 = vmax.f32 %v735_v44, 0.0  ;;  %v13560_v44 = vld [vmem:[#allocation20_spill] sm:$0xff] }
 0xaaa   :  { %9741 = vpow2.f32 %v7885_v57  ;;  %v705_v57 = vadd.f32 %v11579_v34, %v11135_v55  ;;  %v690_v55 = vadd.f32 %v11579_v34, %v11130_v30  ;;  %v675_v30 = vadd.f32 %v11579_v34, %v11097_v2 }
 0xaab   :  { %v660_v2 = vadd.f32 %v11579_v34, %v11092_v6  ;;  %v770_v6 = vadd.f32 %v11579_v34, %v11226_v14  ;;  %v827_v17 = vmax.f32 %v775_v3, 0.0  ;;  %v755_v14 = vadd.f32 %v11579_v34, %v11199_v36  ;;  %v13545_v3 = vld [vmem:[#allocation15_spill] sm:$0xff] }
 0xaac   :  { %v740_v36 = vadd.f32 %v11579_v34, %v11188_v11  ;;  %v13506_v11 = vunpack.c.l.bf16 %v10008_v29  ;;  %v13507_v33 = vunpack.c.h.bf16 %v10096_v46  ;;  %v13509_v34 = vld [vmem:[#allocation3_spill] sm:$0xff] }
 0xaad   :  { %v823_v42 = vmax.f32 %v755_v14, 0.0 }
 0xab5   :  { %v9740_v4 = vpop.eup %9739 }
 0xab6   :  { %v3287_v50 = vadd.f32 1.0, %v9740_v4  ;;  %v815_v4 = vmax.f32 %v715_v5, 0.0 }
 0xab7   :  { %v9742_v35 = vpop.eup %9741 }
 0xab8   :  { %9743 = vrcp.f32 %v3287_v50  ;;  %v3286_v27 = vadd.f32 1.0, %v9742_v35  ;;  %v814_v50 = vmax.f32 %v710_v23, 0.0  ;;  %v813_v35 = vmax.f32 %v705_v57, 0.0 }
 0xaba   :  { %9745 = vrcp.f32 %v3286_v27  ;;  %v812_v27 = vmax.f32 %v700_v12, 0.0  ;;  %v13524_v12 = vld [vmem:[#allocation8_spill] sm:$0xff] }
 0xac5   :  { %v9744_v1 = vpop.eup %9743 }
 0xac6   :  { %3386 = vst.msk [vmem:[%s13188_s6 + $0x8] sm:$0x3] %vm2919_vm8, %v9744_v1  ;;  %v3295_v53 = vsel %vm2919_vm8, %v9744_v1, 0.0 }
 0xac7   :  { %v9746_v13 = vpop.eup %9745  ;;  %3296 = vadd.xlane.f32.xlu1 %v3295_v53  ;;  %v810_v53 = vmax.f32 %v690_v55, 0.0 }
 0xac8   :  { %3385 = vst.msk [vmem:[%s13188_s6] sm:$0xff] %vm2915_vm7, %v9746_v13  ;;  %v3292_v48 = vsel %vm2915_vm7, %v9746_v13, 0.0 }
 0xac9   :  { %3293 = vadd.xlane.f32.xlu0 %v3292_v48  ;;  %v808_v48 = vmax.f32 %v680_v9, 0.0 }
 0xb50   :  { %v3297_v41 = vpop.xlane.xlu1 %3296 }
 0xb51   :  { %v3299_v31 = vadd.f32 1e-08, %v3297_v41  ;;  %9747 = vtanh.f32 %v3297_v41  ;;  %v807_v41 = vmax.f32 %v675_v30, 0.0 }
 0xb52   :  { %v3294_v10 = vpop.xlane.xlu0 %3293 }
 0xb53   :  { %9749 = vrcp.f32 %v3299_v31  ;;  %v3298_v26 = vadd.f32 1e-08, %v3294_v10  ;;  %v806_v31 = vmax.f32 %v670_v54, 0.0  ;;  %v13536_v54 = vld [vmem:[#allocation12_spill] sm:$0xff] }
 0xb54   :  { %9751 = vtanh.f32 %v3294_v10  ;;  %v805_v10 = vmax.f32 %v665_v52, 0.0  ;;  %v13538_v52 = vunpack.c.l.bf16 %v13536_v54 }
 0xb55   :  { %9753 = vrcp.f32 %v3298_v26  ;;  %v804_v26 = vmax.f32 %v660_v2, 0.0 }
 0xb5e   :  { %v9748_v32 = vpop.eup %9747 }
 0xb5f   :  { %v3404_v61 = vrot.slane %v9748_v32, %v11571_v43  ;;  %v826_v32 = vmax.f32 %v770_v6, 0.0  ;;  %v13547_v6 = vunpack.c.l.bf16 %v13545_v3 }
 0xb60   :  { %v9750_v28 = vpop.eup %9749 }
 0xb61   :  { %v9752_v45 = vpop.eup %9751  ;;  %v3303_v37 = vmul.f32 %v9750_v28, %v9744_v1  ;;  %v811_v1 = vmax.f32 %v695_v15, 0.0  ;;  %v825_v28 = vmax.f32 %v765_v16, 0.0  ;;  %v13526_v15 = vunpack.c.l.bf16 %v13524_v12  ;;  %v13548_v16 = vld [vmem:[#allocation16_spill] sm:$0xff] }
 0xb62   :  { %v9754_v24 = vpop.eup %9753  ;;  %v3399_v25 = vrot.slane %v9752_v45, %v11574_v49  ;;  %v824_v45 = vmax.f32 %v760_v18, 0.0  ;;  %v13550_v18 = vunpack.c.l.bf16 %v13548_v16 }
 0xb63   :  { %v3301_v62 = vmul.f32 %v9754_v24, %v9746_v13  ;;  %v809_v13 = vmax.f32 %v685_v51, 0.0  ;;  %v822_v24 = vmax.f32 %v750_v19, 0.0  ;;  %v13530_v51 = vld [vmem:[#allocation10_spill] sm:$0xff] }
 0xb64   :  { %v3406_v47 = vsel %vm3405_vm9, %v3404_v61, %v3399_v25  ;;  %v821_v61 = vmax.f32 %v745_v63, 0.0  ;;  %v820_v25 = vmax.f32 %v740_v36, 0.0  ;;  %v13532_v9 = vunpack.c.l.bf16 %v13530_v51  ;;  %v13554_v19 = vld [vmem:[#allocation18_spill] sm:$0xff] }
 0xb65   :  { %9077 = vmatprep.mubr.msk.f32.mxu0 %vm2915_vm7, %v3301_v62  ;;  %3409 = vst.msk [vmem:[#allocation2] sm:$0x1] %vm3408_vm10, %v3406_v47  ;;  %v13510_v62 = vunpack.c.h.bf16 %v13509_v34  ;;  %v13512_v47 = vld [vmem:[#allocation4_spill] sm:$0xff]  ;;  %v13556_v63 = vunpack.c.l.bf16 %v13554_v19 }
 0xb66   :  { %9078 = vmatmul.mubr.msk.f32.vlgmr.msra.gmra.mxu0 %vm2915_vm7, %v3303_v37  ;;  %v13511_v37 = vunpack.c.l.bf16 %v13509_v34  ;;  %v13513_v56 = vunpack.c.h.bf16 %v13512_v47  ;;  %v13514_v29 = vunpack.c.l.bf16 %v13512_v47 }
 0xb67   :  { %3414 = vmatpush1.msra.mxu0 %v818_v59  ;;  %7891 = vmatprep.mubr.msk.f32.mxu0 %vm828_vm2, %v13505_v21  ;;  %v13515_v59 = vld [vmem:[#allocation5_spill] sm:$0xff] }
 0xb68   :  { %3415 = vmatprep.subr.mxu0 %v13499_v8  ;;  %v13516_v5 = vunpack.c.h.bf16 %v13515_v59  ;;  %v13517_v46 = vunpack.c.l.bf16 %v13515_v59 }
 0xb69   :  { %3416 = vmatpush1.msra.mxu0 %v817_v22  ;;  %v13518_v22 = vld [vmem:[#allocation6_spill] sm:$0xff] }
 0xb6a   :  { %3417 = vmatprep.subr.mxu0 %v13499_v8  ;;  %v13519_v21 = vunpack.c.h.bf16 %v13518_v22  ;;  %v13520_v23 = vunpack.c.l.bf16 %v13518_v22 }
 0xb6b   :  { %3418 = vmatpush1.msra.mxu0 %v816_v20  ;;  %v13521_v20 = vld [vmem:[#allocation7_spill] sm:$0xff] }
 0xb6c   :  { %3419 = vmatprep.subr.mxu0 %v13499_v8  ;;  %v13522_v57 = vunpack.c.h.bf16 %v13521_v20 }
 0xb6d   :  { %3420 = vmatpush1.msra.mxu0 %v815_v4  ;;  %v13523_v4 = vunpack.c.l.bf16 %v13521_v20 }
 0xb6e   :  { %3421 = vmatprep.subr.mxu0 %v13499_v8 }
 0xb6f   :  { %3422 = vmatpush1.msra.mxu0 %v814_v50  ;;  %v13525_v50 = vunpack.c.h.bf16 %v13524_v12 }
 0xb70   :  { %3423 = vmatprep.subr.mxu0 %v13499_v8 }
 0xb71   :  { %3424 = vmatpush1.msra.mxu0 %v813_v35  ;;  %v13527_v35 = vld [vmem:[#allocation9_spill] sm:$0xff] }
 0xb72   :  { %3425 = vmatprep.subr.mxu0 %v13499_v8  ;;  %v13528_v55 = vunpack.c.h.bf16 %v13527_v35 }
 0xb73   :  { %3426 = vmatpush1.msra.mxu0 %v812_v27  ;;  %v13529_v27 = vunpack.c.l.bf16 %v13527_v35 }
 0xb74   :  { %3427 = vmatprep.subr.mxu0 %v13499_v8 }
 0xb75   :  { %3428 = vmatpush1.msra.mxu0 %v811_v1  ;;  %v13531_v1 = vunpack.c.h.bf16 %v13530_v51 }
 0xb76   :  { %3429 = vmatprep.subr.mxu0 %v13499_v8 }
 0xb77   :  { %3430 = vmatpush1.msra.mxu0 %v810_v53  ;;  %v13533_v53 = vld [vmem:[#allocation11_spill] sm:$0xff] }
 0xb78   :  { %3431 = vmatprep.subr.mxu0 %v13499_v8  ;;  %v13534_v30 = vunpack.c.h.bf16 %v13533_v53 }
 0xb79   :  { %3432 = vmatpush1.msra.mxu0 %v809_v13  ;;  %v13535_v13 = vunpack.c.l.bf16 %v13533_v53 }
 0xb7a   :  { %3433 = vmatprep.subr.mxu0 %v13499_v8 }
 0xb7b   :  { %3434 = vmatpush1.msra.mxu0 %v808_v48  ;;  %v13537_v48 = vunpack.c.h.bf16 %v13536_v54 }
 0xb7c   :  { %3435 = vmatprep.subr.mxu0 %v13499_v8 }
 0xb7d   :  { %3436 = vmatpush1.msra.mxu0 %v807_v41  ;;  %v13539_v41 = vld [vmem:[#allocation13_spill] sm:$0xff] }
 0xb7e   :  { %3437 = vmatprep.subr.mxu0 %v13499_v8  ;;  %v13540_v2 = vunpack.c.h.bf16 %v13539_v41 }
 0xb7f   :  { %3438 = vmatpush1.msra.mxu0 %v806_v31  ;;  %v13541_v31 = vunpack.c.l.bf16 %v13539_v41 }
 0xb80   :  { %3439 = vmatprep.subr.mxu0 %v13499_v8 }
 0xb81   :  { %3440 = vmatpush1.msra.mxu0 %v805_v10  ;;  %v13543_v10 = vunpack.c.h.bf16 %v13542_v60 }
 0xb82   :  { %3441 = vmatprep.subr.mxu0 %v13499_v8 }
 0xb83   :  { %3442 = vmatpush1.msra.mxu0 %v804_v26  ;;  %v13544_v26 = vunpack.c.l.bf16 %v13542_v60 }
 0xb84   :  { %3443 = vmatprep.subr.mxu0 %v13499_v8 }
 0xb85   :  { %3444 = vmatpush1.msra.mxu0 %v803_v38  ;;  %v13546_v38 = vunpack.c.h.bf16 %v13545_v3 }
 0xb86   :  { %3459 = vmatprep.subr.mxu0 %v13499_v8 }
 0xb87   :  { %7890 = vmatpush2.msk.msra.mxu0 %vm1018_vm3, %v827_v17  ;;  %v13549_v17 = vunpack.c.h.bf16 %v13548_v16 }
 0xb88   :  { %3461 = vmatprep.subr.mxu0 %v13499_v8 }
 0xb89   :  { %3462 = vmatpush2.msra.mxu0 %v826_v32  ;;  %v13551_v32 = vld [vmem:[#allocation17_spill] sm:$0xff] }
 0xb8a   :  { %3463 = vmatprep.subr.mxu0 %v13499_v8  ;;  %v13552_v14 = vunpack.c.h.bf16 %v13551_v32 }
 0xb8b   :  { %3464 = vmatpush2.msra.mxu0 %v825_v28  ;;  %v13553_v28 = vunpack.c.l.bf16 %v13551_v32 }
 0xb8c   :  { %3465 = vmatprep.subr.mxu0 %v13499_v8 }
 0xb8d   :  { %3466 = vmatpush2.msra.mxu0 %v824_v45  ;;  %v13555_v45 = vunpack.c.h.bf16 %v13554_v19 }
 0xb8e   :  { %3467 = vmatprep.subr.mxu0 %v13499_v8 }
 0xb8f   :  { %3468 = vmatpush2.msra.mxu0 %v823_v42  ;;  %v13557_v42 = vld [vmem:[#allocation19_spill] sm:$0xff] }
 0xb90   :  { %3469 = vmatprep.subr.mxu0 %v13499_v8  ;;  %v13558_v36 = vunpack.c.h.bf16 %v13557_v42 }
 0xb91   :  { %3470 = vmatpush2.msra.mxu0 %v822_v24  ;;  %v13559_v24 = vunpack.c.l.bf16 %v13557_v42 }
 0xb92   :  { %3471 = vmatprep.subr.mxu0 %v13499_v8 }
 0xb93   :  { %3472 = vmatpush2.msra.mxu0 %v821_v61  ;;  %v13561_v61 = vunpack.c.h.bf16 %v13560_v44 }
 0xb94   :  { %3473 = vmatprep.subr.mxu0 %v13499_v8 }
 0xb95   :  { %3474 = vmatpush2.msra.mxu0 %v820_v25  ;;  %v13562_v25 = vunpack.c.l.bf16 %v13560_v44 }
 0xb96   :  { %3475 = vmatprep.subr.mxu0 %v13499_v8 }
 0xb97   :  { %3476 = vmatpush2.msra.mxu0 %v819_v58  ;;  %v13563_v58 = vld [vmem:[#allocation21_spill] sm:$0xff] }
 0xb98   :  { %3478 = vmatmul.mubr.f32.vlgmr.msra.gmra.mxu0 %v13506_v11  ;;  %v13564_v11 = vunpack.c.h.bf16 %v13563_v58 }
 0xb99   :  { %7892 = vmatprep.mubr.msk.f32.mxu0 %vm828_vm2, %v13507_v33  ;;  %v13565_v33 = vunpack.c.l.bf16 %v13563_v58 }
 0xb9c   :  { %3483 = vmatmul.mubr.f32.gmra.mxu0 %v13508_v0  ;;  %v13566_v0 = vld [vmem:[#allocation22_spill] sm:$0xff] }
 0xb9d   :  { %7893 = vmatprep.mubr.msk.f32.mxu0 %vm828_vm2, %v13510_v62  ;;  %v13567_v34 = vunpack.c.h.bf16 %v13566_v0  ;;  %v13568_v62 = vunpack.c.l.bf16 %v13566_v0 }
 0xba0   :  { %3488 = vmatmul.mubr.f32.gmra.mxu0 %v13511_v37  ;;  %v13569_v37 = vld [vmem:[#allocation23_spill] sm:$0xff] }
 0xba1   :  { %7894 = vmatprep.mubr.msk.f32.mxu0 %vm828_vm2, %v13513_v56  ;;  %v13570_v47 = vunpack.c.h.bf16 %v13569_v37  ;;  %v13571_v56 = vunpack.c.l.bf16 %v13569_v37 }
 0xba4   :  { %3493 = vmatmul.mubr.f32.gmra.mxu0 %v13514_v29  ;;  %v13572_v29 = vld [vmem:[#allocation24_spill] sm:$0xff] }
 0xba5   :  { %7895 = vmatprep.mubr.msk.f32.mxu0 %vm828_vm2, %v13516_v5  ;;  %v13573_v59 = vunpack.c.h.bf16 %v13572_v29  ;;  %v13574_v5 = vunpack.c.l.bf16 %v13572_v29 }
 0xba8   :  { %3498 = vmatmul.mubr.f32.gmra.mxu0 %v13517_v46  ;;  %v13575_v46 = vld [vmem:[#allocation25_spill] sm:$0xff] }
 0xba9   :  { %7896 = vmatprep.mubr.msk.f32.mxu0 %vm828_vm2, %v13519_v21  ;;  %v13576_v22 = vunpack.c.h.bf16 %v13575_v46  ;;  %v13577_v21 = vunpack.c.l.bf16 %v13575_v46 }
 0xbac   :  { %3503 = vmatmul.mubr.f32.gmra.mxu0 %v13520_v23  ;;  %v13578_v23 = vld [vmem:[#allocation26_spill] sm:$0xff] }
 0xbad   :  { %7897 = vmatprep.mubr.msk.f32.mxu0 %vm828_vm2, %v13522_v57  ;;  %v13579_v20 = vunpack.c.h.bf16 %v13578_v23  ;;  %v13580_v57 = vunpack.c.l.bf16 %v13578_v23 }
 0xbb0   :  { %3508 = vmatmul.mubr.f32.gmra.mxu0 %v13523_v4  ;;  %v13581_v4 = vld [vmem:[#allocation27_spill] sm:$0xff] }
 0xbb1   :  { %7898 = vmatprep.mubr.msk.f32.mxu0 %vm828_vm2, %v13525_v50  ;;  %v13582_v12 = vunpack.c.h.bf16 %v13581_v4  ;;  %v13583_v50 = vunpack.c.l.bf16 %v13581_v4 }
 0xbb4   :  { %3513 = vmatmul.mubr.f32.gmra.mxu0 %v13526_v15  ;;  %v13584_v15 = vld [vmem:[#allocation28_spill] sm:$0xff] }
 0xbb5   :  { %7899 = vmatprep.mubr.msk.f32.mxu0 %vm828_vm2, %v13528_v55  ;;  %v13585_v35 = vunpack.c.h.bf16 %v13584_v15  ;;  %v13586_v55 = vunpack.c.l.bf16 %v13584_v15 }
 0xbb8   :  { %3518 = vmatmul.mubr.f32.gmra.mxu0 %v13529_v27  ;;  %v13587_v27 = vld [vmem:[#allocation29_spill] sm:$0xff] }
 0xbb9   :  { %7900 = vmatprep.mubr.msk.f32.mxu0 %vm828_vm2, %v13531_v1  ;;  %v13588_v51 = vunpack.c.h.bf16 %v13587_v27  ;;  %v13589_v1 = vunpack.c.l.bf16 %v13587_v27 }
 0xbbc   :  { %3523 = vmatmul.mubr.f32.gmra.mxu0 %v13532_v9  ;;  %v13590_v9 = vld [vmem:[#allocation30_spill] sm:$0xff] }
 0xbbd   :  { %7901 = vmatprep.mubr.msk.f32.mxu0 %vm828_vm2, %v13534_v30  ;;  %v13591_v53 = vunpack.c.h.bf16 %v13590_v9  ;;  %v13592_v30 = vunpack.c.l.bf16 %v13590_v9 }
 0xbc0   :  { %3528 = vmatmul.mubr.f32.gmra.mxu0 %v13535_v13  ;;  %v13593_v13 = vld [vmem:[#allocation31_spill] sm:$0xff] }
 0xbc1   :  { %7902 = vmatprep.mubr.msk.f32.mxu0 %vm828_vm2, %v13537_v48  ;;  %v13594_v54 = vunpack.c.h.bf16 %v13593_v13  ;;  %v13595_v48 = vunpack.c.l.bf16 %v13593_v13 }
 0xbc4   :  { %3533 = vmatmul.mubr.f32.gmra.mxu0 %v13538_v52  ;;  %v13596_v52 = vld [vmem:[#allocation32_spill] sm:$0xff] }
 0xbc5   :  { %7903 = vmatprep.mubr.msk.f32.mxu0 %vm828_vm2, %v13540_v2  ;;  %v13597_v41 = vunpack.c.h.bf16 %v13596_v52  ;;  %v13598_v2 = vunpack.c.l.bf16 %v13596_v52 }
 0xbc8   :  { %3538 = vmatmul.mubr.f32.gmra.mxu0 %v13541_v31  ;;  %v13599_v31 = vld [vmem:[#allocation33_spill] sm:$0xff] }
 0xbc9   :  { %7904 = vmatprep.mubr.msk.f32.mxu0 %vm828_vm2, %v13543_v10  ;;  %v13600_v60 = vunpack.c.h.bf16 %v13599_v31  ;;  %v13601_v10 = vunpack.c.l.bf16 %v13599_v31 }
 0xbcc   :  { %3543 = vmatmul.mubr.f32.gmra.mxu0 %v13544_v26  ;;  %v13602_v26 = vld [vmem:[#allocation34_spill] sm:$0xff] }
 0xbcd   :  { %7905 = vmatprep.mubr.msk.f32.mxu0 %vm828_vm2, %v13546_v38  ;;  %v13603_v3 = vunpack.c.h.bf16 %v13602_v26  ;;  %v13604_v38 = vunpack.c.l.bf16 %v13602_v26 }
 0xbd0   :  { %3548 = vmatmul.mubr.f32.gmra.mxu0 %v13547_v6  ;;  %v13605_v6 = vld [vmem:[#allocation35_spill] sm:$0xff] }
 0xbd1   :  { %7906 = vmatprep.mubr.msk.f32.mxu0 %vm828_vm2, %v13549_v17  ;;  %v13606_v16 = vunpack.c.h.bf16 %v13605_v6  ;;  %v13607_v17 = vunpack.c.l.bf16 %v13605_v6  ;;  %v13656_v6 = vld [vmem:[#allocation52_spill] sm:$0xff] }
 0xbd4   :  { %3553 = vmatmul.mubr.f32.gmra.mxu0 %v13550_v18  ;;  %v13608_v18 = vld [vmem:[#allocation36_spill] sm:$0xff] }
 0xbd5   :  { %7907 = vmatprep.mubr.msk.f32.mxu0 %vm828_vm2, %v13552_v14  ;;  %v13609_v32 = vunpack.c.h.bf16 %v13608_v18  ;;  %v13610_v14 = vunpack.c.l.bf16 %v13608_v18 }
 0xbd8   :  { %3558 = vmatmul.mubr.f32.gmra.mxu0 %v13553_v28  ;;  %v13611_v28 = vld [vmem:[#allocation37_spill] sm:$0xff] }
 0xbd9   :  { %7908 = vmatprep.mubr.msk.f32.mxu0 %vm828_vm2, %v13555_v45  ;;  %v13612_v19 = vunpack.c.h.bf16 %v13611_v28  ;;  %v13613_v42 = vunpack.c.l.bf16 %v13611_v28 }
 0xbdc   :  { %3563 = vmatmul.mubr.f32.gmra.mxu0 %v13556_v63 }
 0xbdd   :  { %7909 = vmatprep.mubr.msk.f32.mxu0 %vm828_vm2, %v13558_v36  ;;  %v13614_v36 = vld [vmem:[#allocation38_spill] sm:$0xff] }
 0xbde   :  { %v13616_v44 = vunpack.c.l.bf16 %v13614_v36 }
 0xbe0   :  { %3568 = vmatmul.mubr.f32.gmra.mxu0 %v13559_v24  ;;  %v13615_v24 = vunpack.c.h.bf16 %v13614_v36 }
 0xbe1   :  { %7910 = vmatprep.mubr.msk.f32.mxu0 %vm828_vm2, %v13561_v61  ;;  %v13617_v61 = vld [vmem:[#allocation39_spill] sm:$0xff] }
 0xbe2   :  { %v13619_v58 = vunpack.c.l.bf16 %v13617_v61 }
 0xbe4   :  { %3573 = vmatmul.mubr.f32.gmra.mxu0 %v13562_v25  ;;  %v13618_v25 = vunpack.c.h.bf16 %v13617_v61 }
 0xbe5   :  { %7911 = vmatprep.mubr.msk.f32.mxu0 %vm828_vm2, %v13564_v11  ;;  %v13620_v11 = vld [vmem:[#allocation40_spill] sm:$0xff] }
 0xbe6   :  { %v13622_v0 = vunpack.c.l.bf16 %v13620_v11 }
 0xbe8   :  { %3578 = vmatmul.mubr.f32.gmra.mxu0 %v13565_v33  ;;  %v13621_v33 = vunpack.c.h.bf16 %v13620_v11 }
 0xbe9   :  { %7912 = vmatprep.mubr.msk.f32.mxu0 %vm828_vm2, %v13567_v34  ;;  %v13623_v34 = vld [vmem:[#allocation41_spill] sm:$0xff] }
 0xbea   :  { %v13625_v37 = vunpack.c.l.bf16 %v13623_v34 }
 0xbec   :  { %3583 = vmatmul.mubr.f32.gmra.mxu0 %v13568_v62  ;;  %v13624_v62 = vunpack.c.h.bf16 %v13623_v34  ;;  %v13668_v34 = vld [vmem:[#allocation56_spill] sm:$0xff] }
 0xbed   :  { %7913 = vmatprep.mubr.msk.f32.mxu0 %vm828_vm2, %v13570_v47  ;;  %v13626_v47 = vld [vmem:[#allocation42_spill] sm:$0xff] }
 0xbee   :  { %v13628_v29 = vunpack.c.l.bf16 %v13626_v47 }
 0xbf0   :  { %3588 = vmatmul.mubr.f32.gmra.mxu0 %v13571_v56  ;;  %v13627_v56 = vunpack.c.h.bf16 %v13626_v47 }
 0xbf1   :  { %7914 = vmatprep.mubr.msk.f32.mxu0 %vm828_vm2, %v13573_v59  ;;  %v13629_v59 = vld [vmem:[#allocation43_spill] sm:$0xff] }
 0xbf2   :  { %v13631_v46 = vunpack.c.l.bf16 %v13629_v59 }
 0xbf4   :  { %3593 = vmatmul.mubr.f32.gmra.mxu0 %v13574_v5  ;;  %v13630_v5 = vunpack.c.h.bf16 %v13629_v59 }
 0xbf5   :  { %7915 = vmatprep.mubr.msk.f32.mxu0 %vm828_vm2, %v13576_v22  ;;  %v13632_v22 = vld [vmem:[#allocation44_spill] sm:$0xff] }
 0xbf6   :  { %v13634_v23 = vunpack.c.l.bf16 %v13632_v22 }
 0xbf8   :  { %3598 = vmatmul.mubr.f32.gmra.mxu0 %v13577_v21  ;;  %v13633_v21 = vunpack.c.h.bf16 %v13632_v22 }
 0xbf9   :  { %7916 = vmatprep.mubr.msk.f32.mxu0 %vm828_vm2, %v13579_v20  ;;  %v13635_v20 = vld [vmem:[#allocation45_spill] sm:$0xff] }
 0xbfa   :  { %v13637_v4 = vunpack.c.l.bf16 %v13635_v20 }
 0xbfc   :  { %3603 = vmatmul.mubr.f32.gmra.mxu0 %v13580_v57  ;;  %v13636_v57 = vunpack.c.h.bf16 %v13635_v20  ;;  %v13674_v20 = vld [vmem:[#allocation58_spill] sm:$0xff] }
 0xbfd   :  { %7917 = vmatprep.mubr.msk.f32.mxu0 %vm828_vm2, %v13582_v12  ;;  %v13638_v12 = vld [vmem:[#allocation46_spill] sm:$0xff] }
 0xbfe   :  { %v13640_v15 = vunpack.c.l.bf16 %v13638_v12 }
 0xc00   :  { %3608 = vmatmul.mubr.f32.gmra.mxu0 %v13583_v50  ;;  %v13639_v50 = vunpack.c.h.bf16 %v13638_v12 }
 0xc01   :  { %7918 = vmatprep.mubr.msk.f32.mxu0 %vm828_vm2, %v13585_v35  ;;  %v13641_v35 = vld [vmem:[#allocation47_spill] sm:$0xff] }
 0xc02   :  { %v13643_v27 = vunpack.c.l.bf16 %v13641_v35 }
 0xc04   :  { %3613 = vmatmul.mubr.f32.gmra.mxu0 %v13586_v55  ;;  %v13642_v55 = vunpack.c.h.bf16 %v13641_v35 }
 0xc05   :  { %7919 = vmatprep.mubr.msk.f32.mxu0 %vm828_vm2, %v13588_v51  ;;  %v13644_v51 = vld [vmem:[#allocation48_spill] sm:$0xff] }
 0xc06   :  { %v13646_v9 = vunpack.c.l.bf16 %v13644_v51 }
 0xc08   :  { %3618 = vmatmul.mubr.f32.gmra.mxu0 %v13589_v1  ;;  %v13645_v1 = vunpack.c.h.bf16 %v13644_v51 }
 0xc09   :  { %7920 = vmatprep.mubr.msk.f32.mxu0 %vm828_vm2, %v13591_v53  ;;  %v13647_v53 = vld [vmem:[#allocation49_spill] sm:$0xff] }
 0xc0c   :  { %3623 = vmatmul.mubr.f32.gmra.mxu0 %v13592_v30  ;;  %v13648_v30 = vunpack.c.h.bf16 %v13647_v53 }
 0xc0d   :  { %7921 = vmatprep.mubr.msk.f32.mxu0 %vm828_vm2, %v13594_v54  ;;  %v13649_v54 = vunpack.c.l.bf16 %v13647_v53 }
 0xc10   :  { %3628 = vmatmul.mubr.f32.gmra.mxu0 %v13595_v48  ;;  %v13650_v48 = vld [vmem:[#allocation50_spill] sm:$0xff] }
 0xc11   :  { %7922 = vmatprep.mubr.msk.f32.mxu0 %vm828_vm2, %v13597_v41  ;;  %v13651_v52 = vunpack.c.h.bf16 %v13650_v48  ;;  %v13652_v31 = vunpack.c.l.bf16 %v13650_v48  ;;  %v13683_v48 = vld [vmem:[#allocation61_spill] sm:$0xff] }
 0xc14   :  { %3633 = vmatmul.mubr.f32.gmra.mxu0 %v13598_v2 }
 0xc15   :  { %7923 = vmatprep.mubr.msk.f32.mxu0 %vm828_vm2, %v13600_v60  ;;  %v13653_v60 = vld [vmem:[#allocation51_spill] sm:$0xff] }
 0xc18   :  { %3638 = vmatmul.mubr.f32.gmra.mxu0 %v13601_v10  ;;  %v13654_v10 = vunpack.c.h.bf16 %v13653_v60 }
 0xc19   :  { %7924 = vmatprep.mubr.msk.f32.mxu0 %vm828_vm2, %v13603_v3 }
 0xc1c   :  { %3643 = vmatmul.mubr.f32.gmra.mxu0 %v13604_v38  ;;  %v13655_v38 = vunpack.c.l.bf16 %v13653_v60  ;;  %v13685_v60 = vunpack.c.l.bf16 %v13683_v48 }
 0xc1d   :  { %7925 = vmatprep.mubr.msk.f32.mxu0 %vm828_vm2, %v13606_v16  ;;  %v13657_v16 = vunpack.c.h.bf16 %v13656_v6 }
 0xc20   :  { %3648 = vmatmul.mubr.f32.gmra.mxu0 %v13607_v17 }
 0xc21   :  { %7926 = vmatprep.mubr.msk.f32.mxu0 %vm828_vm2, %v13609_v32  ;;  %v13658_v32 = vunpack.c.l.bf16 %v13656_v6 }
 0xc24   :  { %3653 = vmatmul.mubr.f32.gmra.mxu0 %v13610_v14  ;;  %v13659_v14 = vld [vmem:[#allocation53_spill] sm:$0xff] }
 0xc25   :  { %7927 = vmatprep.mubr.msk.f32.mxu0 %vm828_vm2, %v13612_v19  ;;  %v13660_v28 = vunpack.c.h.bf16 %v13659_v14 }
 0xc26   :  { %v9079_v45 = vpop.f32.mrf.mxu0 }
 0xc27   :  { %3389 = vst.msk [vmem:[%s13189_s7 + $0x8] sm:$0x3] %vm3388_vm11, %v9079_v45 }
 0xc28   :  { %v3376_v63 = vpop.f32.mrf.mxu0  ;;  %3658 = vmatmul.mubr.f32.gmra.mxu0 %v13613_v42  ;;  %v13662_v42 = vld [vmem:[#allocation54_spill] sm:$0xff] }
 0xc29   :  { %3387 = vst.msk [vmem:[%s13189_s7] sm:$0xff] %vm2570_vm6, %v3376_v63  ;;  %7928 = vmatprep.mubr.msk.f32.mxu0 %vm828_vm2, %v13615_v24  ;;  %v13661_v63 = vunpack.c.l.bf16 %v13659_v14  ;;  %v13663_v36 = vunpack.c.h.bf16 %v13662_v42  ;;  %v13664_v61 = vunpack.c.l.bf16 %v13662_v42 }
 0xc2c   :  { %3663 = vmatmul.mubr.f32.gmra.mxu0 %v13616_v44 }
 0xc2d   :  { %7929 = vmatprep.mubr.msk.f32.mxu0 %vm828_vm2, %v13618_v25  ;;  %v13665_v25 = vld [vmem:[#allocation55_spill] sm:$0xff] }
 0xc30   :  { %3668 = vmatmul.mubr.f32.gmra.mxu0 %v13619_v58  ;;  %v13666_v58 = vunpack.c.h.bf16 %v13665_v25 }
 0xc31   :  { %7930 = vmatprep.mubr.msk.f32.mxu0 %vm828_vm2, %v13621_v33 }
 0xc34   :  { %3673 = vmatmul.mubr.f32.gmra.mxu0 %v13622_v0  ;;  %v13667_v0 = vunpack.c.l.bf16 %v13665_v25 }
 0xc35   :  { %7931 = vmatprep.mubr.msk.f32.mxu0 %vm828_vm2, %v13624_v62  ;;  %v13669_v62 = vunpack.c.h.bf16 %v13668_v34 }
 0xc38   :  { %3678 = vmatmul.mubr.f32.gmra.mxu0 %v13625_v37 }
 0xc39   :  { %7932 = vmatprep.mubr.msk.f32.mxu0 %vm828_vm2, %v13627_v56  ;;  %v13670_v56 = vunpack.c.l.bf16 %v13668_v34 }
 0xc3c   :  { %3683 = vmatmul.mubr.f32.gmra.mxu0 %v13628_v29  ;;  %v13671_v29 = vld [vmem:[#allocation57_spill] sm:$0xff] }
 0xc3d   :  { %7933 = vmatprep.mubr.msk.f32.mxu0 %vm828_vm2, %v13630_v5  ;;  %v13672_v59 = vunpack.c.h.bf16 %v13671_v29 }
 0xc40   :  { %3688 = vmatmul.mubr.f32.gmra.mxu0 %v13631_v46  ;;  %v9812_v46 = vld [vmem:[%s13185_s2 + $0x20] sm:$0xff] }
 0xc41   :  { %7934 = vmatprep.mubr.msk.f32.mxu0 %vm828_vm2, %v13633_v21  ;;  %v9813_v21 = vld [vmem:[%s13185_s2 + $0x18] sm:$0xff] }
 0xc44   :  { %3693 = vmatmul.mubr.f32.gmra.mxu0 %v13634_v23  ;;  %v13673_v23 = vunpack.c.l.bf16 %v13671_v29 }
 0xc45   :  { %7935 = vmatprep.mubr.msk.f32.mxu0 %vm828_vm2, %v13636_v57  ;;  %v13675_v57 = vunpack.c.h.bf16 %v13674_v20 }
 0xc48   :  { %3698 = vmatmul.mubr.f32.gmra.mxu0 %v13637_v4 }
 0xc49   :  { %7936 = vmatprep.mubr.msk.f32.mxu0 %vm828_vm2, %v13639_v50  ;;  %v13676_v50 = vunpack.c.l.bf16 %v13674_v20 }
 0xc4c   :  { %3703 = vmatmul.mubr.f32.gmra.mxu0 %v13640_v15  ;;  %v13677_v15 = vld [vmem:[#allocation59_spill] sm:$0xff] }
 0xc4d   :  { %7937 = vmatprep.mubr.msk.f32.mxu0 %vm828_vm2, %v13642_v55  ;;  %v13678_v35 = vunpack.c.h.bf16 %v13677_v15  ;;  %v13679_v51 = vunpack.c.l.bf16 %v13677_v15  ;;  %v9819_v15 = vld [vmem:[%s13185_s2 + $0x58] sm:$0xff] }
 0xc50   :  { %3708 = vmatmul.mubr.f32.gmra.mxu0 %v13643_v27 }
 0xc51   :  { %7938 = vmatprep.mubr.msk.f32.mxu0 %vm828_vm2, %v13645_v1  ;;  %v13680_v1 = vld [vmem:[#allocation60_spill] sm:$0xff] }
 0xc54   :  { %3713 = vmatmul.mubr.f32.gmra.mxu0 %v13646_v9  ;;  %v13681_v9 = vunpack.c.h.bf16 %v13680_v1 }
 0xc55   :  { %7939 = vmatprep.mubr.msk.f32.mxu0 %vm828_vm2, %v13648_v30 }
 0xc58   :  { %v11913_v13 = vpop.f32.mrf.mxu0  ;;  %3718 = vmatmul.mubr.f32.gmra.mxu0 %v13649_v54  ;;  %v13682_v54 = vunpack.c.l.bf16 %v13680_v1 }
 0xc59   :  { %7940 = vmatprep.mubr.msk.f32.mxu0 %vm828_vm2, %v13651_v52  ;;  %v13684_v52 = vunpack.c.h.bf16 %v13683_v48 }
 0xc5a   :  { %v3481_v41 = vpop.f32.mrf.mxu0 }
 0xc5c   :  { %v11920_v2 = vpop.f32.mrf.mxu0  ;;  %3723 = vmatmul.mubr.f32.gmra.mxu0 %v13652_v31 }
 0xc5d   :  { %7941 = vmatprep.mubr.msk.f32.mxu0 %vm828_vm2, %v13654_v10  ;;  %v13686_v10 = vld [vmem:[#allocation62_spill] sm:$0xff] }
 0xc5e   :  { %v3486_v26 = vpop.f32.mrf.mxu0 }
 0xc5f   :  { %v13687_v26 = vunpack.c.h.bf16 %v13686_v10 }
 0xc60   :  { %v11927_v3 = vpop.f32.mrf.mxu0  ;;  %3728 = vmatmul.mubr.f32.gmra.mxu0 %v13655_v38 }
 0xc61   :  { %7942 = vmatprep.mubr.msk.f32.mxu0 %vm828_vm2, %v13657_v16  ;;  %v13688_v16 = vunpack.c.l.bf16 %v13686_v10 }
 0xc62   :  { %v3491_v17 = vpop.f32.mrf.mxu0 }
 0xc63   :  { %v13689_v17 = vld [vmem:[#allocation63_spill] sm:$0xff] }
 0xc64   :  { %v11934_v18 = vpop.f32.mrf.mxu0  ;;  %3733 = vmatmul.mubr.f32.gmra.mxu0 %v13658_v32  ;;  %v13690_v32 = vunpack.c.h.bf16 %v13689_v17 }
 0xc65   :  { %7943 = vmatprep.mubr.msk.f32.mxu0 %vm828_vm2, %v13660_v28 }
 0xc66   :  { %v3496_v19 = vpop.f32.mrf.mxu0 }
 0xc67   :  { %v13691_v19 = vunpack.c.l.bf16 %v13689_v17 }
 0xc68   :  { %v11941_v45 = vpop.f32.mrf.mxu0  ;;  %3738 = vmatmul.mubr.f32.gmra.mxu0 %v13661_v63  ;;  %v9814_v63 = vld [vmem:[%s13185_s2 + $0x40] sm:$0xff] }
 0xc69   :  { %7944 = vmatprep.mubr.msk.f32.mxu0 %vm828_vm2, %v13663_v36  ;;  %v9815_v36 = vld [vmem:[%s13185_s2 + $0x38] sm:$0xff] }
 0xc6a   :  { %v3501_v24 = vpop.f32.mrf.mxu0 }
 0xc6c   :  { %v11948_v44 = vpop.f32.mrf.mxu0  ;;  %3743 = vmatmul.mubr.f32.gmra.mxu0 %v13664_v61 }
 0xc6d   :  { %7945 = vmatprep.mubr.msk.f32.mxu0 %vm828_vm2, %v13666_v58 }
 0xc6e   :  { %v3506_v11 = vpop.f32.mrf.mxu0 }
 0xc70   :  { %v11955_v33 = vpop.f32.mrf.mxu0  ;;  %3748 = vmatmul.mubr.f32.gmra.mxu0 %v13667_v0 }
 0xc71   :  { %7946 = vmatprep.mubr.msk.f32.mxu0 %vm828_vm2, %v13669_v62 }
 0xc72   :  { %v3511_v37 = vpop.f32.mrf.mxu0 }
 0xc74   :  { %v3514_v47 = vpop.f32.mrf.mxu0  ;;  %3753 = vmatmul.mubr.f32.gmra.mxu0 %v13670_v56 }
 0xc75   :  { %9085 = vmatmul.mubr.msk.f32.vlgmr.msra.gmra.mxu1 %vm1402_vm5, %v3514_v47  ;;  %7947 = vmatprep.mubr.msk.f32.mxu0 %vm828_vm2, %v13672_v59 }
 0xc76   :  { %v3516_v5 = vpop.f32.mrf.mxu0  ;;  %9087 = vmatprep.mubr.msk.f32.mxu1 %vm9848_vm4, %v13499_v8  ;;  %9106 = vmatpush3.msra.mxu1 %v9812_v46 }
 0xc77   :  { %9107 = vmatprep.subr.mxu1 %v13499_v8 }
 0xc78   :  { %v3519_v22 = vpop.f32.mrf.mxu0  ;;  %9108 = vmatpush3.msra.mxu1 %v9813_v21  ;;  %3758 = vmatmul.mubr.f32.gmra.mxu0 %v13673_v23 }
 0xc79   :  { %9088 = vmatmul.mubr.msk.f32.gmra.mxu1 %vm1402_vm5, %v3519_v22  ;;  %7948 = vmatprep.mubr.msk.f32.mxu0 %vm828_vm2, %v13675_v57 }
 0xc7a   :  { %v3521_v4 = vpop.f32.mrf.mxu0  ;;  %9090 = vmatprep.mubr.msk.f32.mxu1 %vm9848_vm4, %v13499_v8  ;;  %9130 = vmatprep.subr.mxu1 %v13499_v8 }
 0xc7c   :  { %v3524_v12 = vpop.f32.mrf.mxu0  ;;  %3763 = vmatmul.mubr.f32.gmra.mxu0 %v13676_v50 }
 0xc7d   :  { %9091 = vmatmul.mubr.msk.f32.gmra.mxu1 %vm1402_vm5, %v3524_v12  ;;  %7949 = vmatprep.mubr.msk.f32.mxu0 %vm828_vm2, %v13678_v35  ;;  %v9818_v12 = vld [vmem:[%s13185_s2 + $0x60] sm:$0xff] }
 0xc7e   :  { %v3526_v55 = vpop.f32.mrf.mxu0  ;;  %9093 = vmatprep.mubr.msk.f32.mxu1 %vm9848_vm4, %v13499_v8 }
 0xc80   :  { %v3529_v27 = vpop.f32.mrf.mxu0  ;;  %3768 = vmatmul.mubr.f32.gmra.mxu0 %v13679_v51 }
 0xc81   :  { %9094 = vmatmul.mubr.msk.f32.gmra.mxu1 %vm1402_vm5, %v3529_v27  ;;  %7950 = vmatprep.mubr.msk.f32.mxu0 %vm828_vm2, %v13681_v9 }
 0xc82   :  { %v3531_v53 = vpop.f32.mrf.mxu0  ;;  %9096 = vmatprep.mubr.msk.f32.mxu1 %vm9848_vm4, %v13499_v8 }
 0xc84   :  { %v3534_v30 = vpop.f32.mrf.mxu0  ;;  %3773 = vmatmul.mubr.f32.gmra.mxu0 %v13682_v54 }
 0xc85   :  { %9097 = vmatmul.mubr.msk.f32.gmra.mxu1 %vm1402_vm5, %v3534_v30  ;;  %7951 = vmatprep.mubr.msk.f32.mxu0 %vm828_vm2, %v13684_v52 }
 0xc86   :  { %v3536_v41 = vpop.f32.mrf.mxu0  ;;  %9099 = vmatprep.mubr.msk.f32.mxu1 %vm9848_vm4, %v13499_v8 }
 0xc88   :  { %v3539_v31 = vpop.f32.mrf.mxu0  ;;  %3778 = vmatmul.mubr.f32.gmra.mxu0 %v13685_v60  ;;  %v9820_v60 = vld [vmem:[%s13185_s2 + $0x70] sm:$0xff] }
 0xc89   :  { %9100 = vmatmul.mubr.msk.f32.gmra.mxu1 %vm1402_vm5, %v3539_v31  ;;  %7952 = vmatprep.mubr.msk.f32.mxu0 %vm828_vm2, %v13687_v26  ;;  %v9821_v26 = vld [vmem:[%s13185_s2 + $0x68] sm:$0xff] }
 0xc8a   :  { %v3541_v38 = vpop.f32.mrf.mxu0  ;;  %9102 = vmatprep.mubr.msk.f32.mxu1 %vm9848_vm4, %v13499_v8 }
 0xc8c   :  { %v3544_v6 = vpop.f32.mrf.mxu0  ;;  %3783 = vmatmul.mubr.f32.gmra.mxu0 %v13688_v16 }
 0xc8d   :  { %9103 = vmatmul.mubr.msk.f32.gmra.mxu1 %vm1402_vm5, %v3544_v6  ;;  %7953 = vmatprep.mubr.msk.f32.mxu0 %vm828_vm2, %v13690_v32  ;;  %vm7648_vm2 = vcmask 128004  }
 0xc8e   :  { %v3546_v14 = vpop.f32.mrf.mxu0  ;;  %9109 = vmatprep.mubr.msk.f32.mxu1 %vm9848_vm4, %v13499_v8 }
 0xc90   :  { %v3549_v28 = vpop.f32.mrf.mxu0  ;;  %3788 = vmatmul.mubr.f32.gmra.mxu0 %v13691_v19 }
 0xc91   :  { %9110 = vmatmul.mubr.msk.f32.vlgmr.msra.gmra.mxu1 %vm1402_vm5, %v11913_v13  ;;  %9371 = vmatprep.mubr.msk.f32.mxu0 %vm2570_vm6, %v11450_v39 }
 0xc92   :  { %9112 = vmatprep.mubr.msk.f32.mxu1 %vm9848_vm4, %v13499_v8  ;;  %9131 = vmatpush3.msra.mxu1 %v9814_v63  ;;  %v3551_v42 = vpop.f32.mrf.mxu0 }
 0xc93   :  { %9132 = vmatprep.subr.mxu1 %v13499_v8 }
 0xc94   :  { %9133 = vmatpush3.msra.mxu1 %v9815_v36  ;;  %v3554_v13 = vpop.f32.mrf.mxu0 }
 0xc95   :  { %9113 = vmatmul.mubr.msk.f32.gmra.mxu1 %vm1402_vm5, %v11920_v2  ;;  %9155 = vmatprep.subr.mxu1 %v13499_v8 }
 0xc96   :  { %9115 = vmatprep.mubr.msk.f32.mxu1 %vm9848_vm4, %v13499_v8  ;;  %v3556_v39 = vpop.f32.mrf.mxu0 }
 0xc98   :  { %v3559_v24 = vpop.f32.mrf.mxu0 }
 0xc99   :  { %9116 = vmatmul.mubr.msk.f32.gmra.mxu1 %vm1402_vm5, %v11927_v3 }
 0xc9a   :  { %9118 = vmatprep.mubr.msk.f32.mxu1 %vm9848_vm4, %v13499_v8  ;;  %v3561_v61 = vpop.f32.mrf.mxu0 }
 0xc9c   :  { %v3564_v25 = vpop.f32.mrf.mxu0 }
 0xc9d   :  { %9119 = vmatmul.mubr.msk.f32.gmra.mxu1 %vm1402_vm5, %v11934_v18 }
 0xc9e   :  { %9121 = vmatprep.mubr.msk.f32.mxu1 %vm9848_vm4, %v13499_v8  ;;  %v3566_v2 = vpop.f32.mrf.mxu0 }
 0xca0   :  { %v3569_v58 = vpop.f32.mrf.mxu0 }
 0xca1   :  { %9122 = vmatmul.mubr.msk.f32.gmra.mxu1 %vm1402_vm5, %v11941_v45 }
 0xca2   :  { %9124 = vmatprep.mubr.msk.f32.mxu1 %vm9848_vm4, %v13499_v8  ;;  %v3571_v3 = vpop.f32.mrf.mxu0 }
 0xca4   :  { %v3574_v11 = vpop.f32.mrf.mxu0 }
 0xca5   :  { %9125 = vmatmul.mubr.msk.f32.gmra.mxu1 %vm1402_vm5, %v11948_v44  ;;  %v9816_v44 = vld [vmem:[%s13185_s2 + $0x50] sm:$0xff] }
 0xca6   :  { %9127 = vmatprep.mubr.msk.f32.mxu1 %vm9848_vm4, %v13499_v8  ;;  %v3576_v18 = vpop.f32.mrf.mxu0 }
 0xca8   :  { %v3579_v0 = vpop.f32.mrf.mxu0 }
 0xca9   :  { %9128 = vmatmul.mubr.msk.f32.gmra.mxu1 %vm1402_vm5, %v11955_v33  ;;  %v9817_v33 = vld [vmem:[%s13185_s2 + $0x48] sm:$0xff] }
 0xcaa   :  { %9134 = vmatprep.mubr.msk.f32.mxu1 %vm9848_vm4, %v13499_v8  ;;  %v3581_v45 = vpop.f32.mrf.mxu0 }
 0xcac   :  { %v3584_v34 = vpop.f32.mrf.mxu0 }
 0xcad   :  { %9135 = vmatmul.mubr.msk.f32.vlgmr.msra.gmra.mxu1 %vm1402_vm5, %v3549_v28 }
 0xcae   :  { %9137 = vmatprep.mubr.msk.f32.mxu1 %vm9848_vm4, %v13499_v8  ;;  %9156 = vmatpush3.msra.mxu1 %v9816_v44  ;;  %v3586_v62 = vpop.f32.mrf.mxu0 }
 0xcaf   :  { %9157 = vmatprep.subr.mxu1 %v13499_v8 }
 0xcb0   :  { %9158 = vmatpush3.msra.mxu1 %v9817_v33  ;;  %v3589_v37 = vpop.f32.mrf.mxu0 }
 0xcb1   :  { %9138 = vmatmul.mubr.msk.f32.gmra.mxu1 %vm1402_vm5, %v3554_v13  ;;  %9180 = vmatprep.subr.mxu1 %v13499_v8 }
 0xcb2   :  { %9140 = vmatprep.mubr.msk.f32.mxu1 %vm9848_vm4, %v13499_v8  ;;  %v3591_v47 = vpop.f32.mrf.mxu0 }
 0xcb4   :  { %v3594_v56 = vpop.f32.mrf.mxu0 }
 0xcb5   :  { %9141 = vmatmul.mubr.msk.f32.gmra.mxu1 %vm1402_vm5, %v3559_v24  ;;  %v9822_v24 = vld [vmem:[%s13185_s2 + $0x80] sm:$0xff] }
 0xcb6   :  { %9143 = vmatprep.mubr.msk.f32.mxu1 %vm9848_vm4, %v13499_v8  ;;  %v3596_v29 = vpop.f32.mrf.mxu0 }
 0xcb8   :  { %v3599_v59 = vpop.f32.mrf.mxu0 }
 0xcb9   :  { %9144 = vmatmul.mubr.msk.f32.gmra.mxu1 %vm1402_vm5, %v3564_v25  ;;  %v9823_v25 = vld [vmem:[%s13185_s2 + $0x78] sm:$0xff] }
 0xcba   :  { %9146 = vmatprep.mubr.msk.f32.mxu1 %vm9848_vm4, %v13499_v8  ;;  %v3601_v5 = vpop.f32.mrf.mxu0 }
 0xcbc   :  { %v3604_v46 = vpop.f32.mrf.mxu0 }
 0xcbd   :  { %9147 = vmatmul.mubr.msk.f32.gmra.mxu1 %vm1402_vm5, %v3569_v58 }
 0xcbe   :  { %9149 = vmatprep.mubr.msk.f32.mxu1 %vm9848_vm4, %v13499_v8  ;;  %v3606_v22 = vpop.f32.mrf.mxu0 }
 0xcc0   :  { %v3609_v21 = vpop.f32.mrf.mxu0 }
 0xcc1   :  { %9150 = vmatmul.mubr.msk.f32.gmra.mxu1 %vm1402_vm5, %v3574_v11 }
 0xcc2   :  { %9152 = vmatprep.mubr.msk.f32.mxu1 %vm9848_vm4, %v13499_v8  ;;  %v3611_v23 = vpop.f32.mrf.mxu0 }
 0xcc4   :  { %v3614_v20 = vpop.f32.mrf.mxu0 }
 0xcc5   :  { %9153 = vmatmul.mubr.msk.f32.gmra.mxu1 %vm1402_vm5, %v3579_v0 }
 0xcc6   :  { %9159 = vmatprep.mubr.msk.f32.mxu1 %vm9848_vm4, %v13499_v8  ;;  %v3616_v57 = vpop.f32.mrf.mxu0 }
 0xcc8   :  { %v3619_v4 = vpop.f32.mrf.mxu0 }
 0xcc9   :  { %9160 = vmatmul.mubr.msk.f32.vlgmr.msra.gmra.mxu1 %vm1402_vm5, %v3584_v34 }
 0xcca   :  { %9162 = vmatprep.mubr.msk.f32.mxu1 %vm9848_vm4, %v13499_v8  ;;  %9181 = vmatpush3.msra.mxu1 %v9818_v12  ;;  %v3621_v50 = vpop.f32.mrf.mxu0 }
 0xccb   :  { %9182 = vmatprep.subr.mxu1 %v13499_v8 }
 0xccc   :  { %9183 = vmatpush3.msra.mxu1 %v9819_v15  ;;  %v3624_v35 = vpop.f32.mrf.mxu0 }
 0xccd   :  { %9163 = vmatmul.mubr.msk.f32.gmra.mxu1 %vm1402_vm5, %v3589_v37  ;;  %9205 = vmatprep.subr.mxu1 %v13499_v8 }
 0xcce   :  { %9165 = vmatprep.mubr.msk.f32.mxu1 %vm9848_vm4, %v13499_v8  ;;  %v3626_v55 = vpop.f32.mrf.mxu0 }
 0xcd0   :  { %v3629_v27 = vpop.f32.mrf.mxu0 }
 0xcd1   :  { %9166 = vmatmul.mubr.msk.f32.gmra.mxu1 %vm1402_vm5, %v3594_v56  ;;  %v9824_v56 = vld [vmem:[%s13185_s2 + $0x90] sm:$0xff] }
 0xcd2   :  { %9168 = vmatprep.mubr.msk.f32.mxu1 %vm9848_vm4, %v13499_v8  ;;  %v3631_v51 = vpop.f32.mrf.mxu0 }
 0xcd4   :  { %v3634_v1 = vpop.f32.mrf.mxu0 }
 0xcd5   :  { %9169 = vmatmul.mubr.msk.f32.gmra.mxu1 %vm1402_vm5, %v3599_v59  ;;  %v9825_v59 = vld [vmem:[%s13185_s2 + $0x88] sm:$0xff] }
 0xcd6   :  { %9171 = vmatprep.mubr.msk.f32.mxu1 %vm9848_vm4, %v13499_v8  ;;  %v3636_v9 = vpop.f32.mrf.mxu0 }
 0xcd7   :  { %v9826_v9 = vld [vmem:[%s13185_s2 + $0xa0] sm:$0xff] }
 0xcd8   :  { %v3639_v53 = vpop.f32.mrf.mxu0 }
 0xcd9   :  { %9172 = vmatmul.mubr.msk.f32.gmra.mxu1 %vm1402_vm5, %v3604_v46 }
 0xcda   :  { %9174 = vmatprep.mubr.msk.f32.mxu1 %vm9848_vm4, %v13499_v8  ;;  %v3641_v30 = vpop.f32.mrf.mxu0 }
 0xcdc   :  { %v3644_v54 = vpop.f32.mrf.mxu0 }
 0xcdd   :  { %9175 = vmatmul.mubr.msk.f32.gmra.mxu1 %vm1402_vm5, %v3609_v21 }
 0xcde   :  { %9177 = vmatprep.mubr.msk.f32.mxu1 %vm9848_vm4, %v13499_v8  ;;  %v3646_v48 = vpop.f32.mrf.mxu0 }
 0xce0   :  { %v3649_v52 = vpop.f32.mrf.mxu0 }
 0xce1   :  { %9178 = vmatmul.mubr.msk.f32.gmra.mxu1 %vm1402_vm5, %v3614_v20 }
 0xce2   :  { %9184 = vmatprep.mubr.msk.f32.mxu1 %vm9848_vm4, %v13499_v8  ;;  %v3651_v41 = vpop.f32.mrf.mxu0 }
 0xce4   :  { %v3654_v31 = vpop.f32.mrf.mxu0 }
 0xce5   :  { %9185 = vmatmul.mubr.msk.f32.vlgmr.msra.gmra.mxu1 %vm1402_vm5, %v3619_v4 }
 0xce6   :  { %9187 = vmatprep.mubr.msk.f32.mxu1 %vm9848_vm4, %v13499_v8  ;;  %9206 = vmatpush3.msra.mxu1 %v9820_v60  ;;  %v3656_v10 = vpop.f32.mrf.mxu0 }
 0xce7   :  { %9207 = vmatprep.subr.mxu1 %v13499_v8 }
 0xce8   :  { %9208 = vmatpush3.msra.mxu1 %v9821_v26  ;;  %v3659_v38 = vpop.f32.mrf.mxu0 }
 0xce9   :  { %9188 = vmatmul.mubr.msk.f32.gmra.mxu1 %vm1402_vm5, %v3624_v35  ;;  %9230 = vmatprep.subr.mxu1 %v13499_v8 }
 0xcea   :  { %9190 = vmatprep.mubr.msk.f32.mxu1 %vm9848_vm4, %v13499_v8  ;;  %v3661_v6 = vpop.f32.mrf.mxu0 }
 0xcec   :  { %v3664_v16 = vpop.f32.mrf.mxu0 }
 0xced   :  { %9191 = vmatmul.mubr.msk.f32.gmra.mxu1 %vm1402_vm5, %v3629_v27 }
 0xcee   :  { %9193 = vmatprep.mubr.msk.f32.mxu1 %vm9848_vm4, %v13499_v8  ;;  %v3666_v17 = vpop.f32.mrf.mxu0 }
 0xcf0   :  { %v3669_v32 = vpop.f32.mrf.mxu0 }
 0xcf1   :  { %9194 = vmatmul.mubr.msk.f32.gmra.mxu1 %vm1402_vm5, %v3634_v1 }
 0xcf2   :  { %9196 = vmatprep.mubr.msk.f32.mxu1 %vm9848_vm4, %v13499_v8  ;;  %v3671_v14 = vpop.f32.mrf.mxu0 }
 0xcf4   :  { %v3674_v28 = vpop.f32.mrf.mxu0 }
 0xcf5   :  { %9197 = vmatmul.mubr.msk.f32.gmra.mxu1 %vm1402_vm5, %v3639_v53 }
 0xcf6   :  { %9199 = vmatprep.mubr.msk.f32.mxu1 %vm9848_vm4, %v13499_v8  ;;  %v3676_v19 = vpop.f32.mrf.mxu0 }
 0xcf8   :  { %v3679_v63 = vpop.f32.mrf.mxu0 }
 0xcf9   :  { %9200 = vmatmul.mubr.msk.f32.gmra.mxu1 %vm1402_vm5, %v3644_v54  ;;  %v9827_v54 = vld [vmem:[%s13185_s2 + $0x98] sm:$0xff] }
 0xcfa   :  { %9202 = vmatprep.mubr.msk.f32.mxu1 %vm9848_vm4, %v13499_v8  ;;  %v3681_v42 = vpop.f32.mrf.mxu0 }
 0xcfc   :  { %v3684_v36 = vpop.f32.mrf.mxu0 }
 0xcfd   :  { %9203 = vmatmul.mubr.msk.f32.gmra.mxu1 %vm1402_vm5, %v3649_v52 }
 0xcfe   :  { %9209 = vmatprep.mubr.msk.f32.mxu1 %vm9848_vm4, %v13499_v8  ;;  %v3686_v13 = vpop.f32.mrf.mxu0 }
 0xd00   :  { %v3689_v39 = vpop.f32.mrf.mxu0 }
 0xd01   :  { %9210 = vmatmul.mubr.msk.f32.vlgmr.msra.gmra.mxu1 %vm1402_vm5, %v3654_v31 }
 0xd02   :  { %9212 = vmatprep.mubr.msk.f32.mxu1 %vm9848_vm4, %v13499_v8  ;;  %9231 = vmatpush3.msra.mxu1 %v9822_v24  ;;  %v3691_v61 = vpop.f32.mrf.mxu0 }
 0xd03   :  { %9232 = vmatprep.subr.mxu1 %v13499_v8 }
 0xd04   :  { %9233 = vmatpush3.msra.mxu1 %v9823_v25  ;;  %v3694_v2 = vpop.f32.mrf.mxu0 }
 0xd05   :  { %9213 = vmatmul.mubr.msk.f32.gmra.mxu1 %vm1402_vm5, %v3659_v38  ;;  %9255 = vmatprep.subr.mxu1 %v13499_v8 }
 0xd06   :  { %9215 = vmatprep.mubr.msk.f32.mxu1 %vm9848_vm4, %v13499_v8  ;;  %v3696_v58 = vpop.f32.mrf.mxu0 }
 0xd08   :  { %v3699_v3 = vpop.f32.mrf.mxu0 }
 0xd09   :  { %9216 = vmatmul.mubr.msk.f32.gmra.mxu1 %vm1402_vm5, %v3664_v16 }
 0xd0a   :  { %9218 = vmatprep.mubr.msk.f32.mxu1 %vm9848_vm4, %v13499_v8  ;;  %v3701_v11 = vpop.f32.mrf.mxu0 }
 0xd0c   :  { %v3704_v18 = vpop.f32.mrf.mxu0 }
 0xd0d   :  { %9219 = vmatmul.mubr.msk.f32.gmra.mxu1 %vm1402_vm5, %v3669_v32 }
 0xd0e   :  { %9221 = vmatprep.mubr.msk.f32.mxu1 %vm9848_vm4, %v13499_v8  ;;  %v3706_v0 = vpop.f32.mrf.mxu0 }
 0xd10   :  { %v3709_v45 = vpop.f32.mrf.mxu0 }
 0xd11   :  { %9222 = vmatmul.mubr.msk.f32.gmra.mxu1 %vm1402_vm5, %v3674_v28 }
 0xd12   :  { %9224 = vmatprep.mubr.msk.f32.mxu1 %vm9848_vm4, %v13499_v8  ;;  %v3711_v34 = vpop.f32.mrf.mxu0 }
 0xd14   :  { %v3714_v44 = vpop.f32.mrf.mxu0 }
 0xd15   :  { %9225 = vmatmul.mubr.msk.f32.gmra.mxu1 %vm1402_vm5, %v3679_v63 }
 0xd16   :  { %9227 = vmatprep.mubr.msk.f32.mxu1 %vm9848_vm4, %v13499_v8  ;;  %v3716_v62 = vpop.f32.mrf.mxu0 }
 0xd17   :  { %v9830_v62 = vld [vmem:[%s13185_s2 + $0xf0] sm:$0xff] }
 0xd18   :  { %v3719_v33 = vpop.f32.mrf.mxu0 }
 0xd19   :  { %9228 = vmatmul.mubr.msk.f32.gmra.mxu1 %vm1402_vm5, %v3684_v36 }
 0xd1a   :  { %9234 = vmatprep.mubr.msk.f32.mxu1 %vm9848_vm4, %v13499_v8  ;;  %v3721_v37 = vpop.f32.mrf.mxu0 }
 0xd1b   :  { %v9831_v37 = vld [vmem:[%s13185_s2 + $0xe8] sm:$0xff] }
 0xd1c   :  { %v3724_v47 = vpop.f32.mrf.mxu0 }
 0xd1d   :  { %9235 = vmatmul.mubr.msk.f32.vlgmr.msra.gmra.mxu1 %vm1402_vm5, %v3689_v39 }
 0xd1e   :  { %9237 = vmatprep.mubr.msk.f32.mxu1 %vm9848_vm4, %v13499_v8  ;;  %9256 = vmatpush3.msra.mxu1 %v9824_v56  ;;  %v3726_v29 = vpop.f32.mrf.mxu0 }
 0xd1f   :  { %9257 = vmatprep.subr.mxu1 %v13499_v8 }
 0xd20   :  { %9258 = vmatpush3.msra.mxu1 %v9825_v59  ;;  %v3729_v5 = vpop.f32.mrf.mxu0 }
 0xd21   :  { %9238 = vmatmul.mubr.msk.f32.gmra.mxu1 %vm1402_vm5, %v3694_v2  ;;  %9280 = vmatprep.subr.mxu1 %v13499_v8 }
 0xd22   :  { %9240 = vmatprep.mubr.msk.f32.mxu1 %vm9848_vm4, %v13499_v8  ;;  %v3731_v46 = vpop.f32.mrf.mxu0 }
 0xd24   :  { %v3734_v22 = vpop.f32.mrf.mxu0 }
 0xd25   :  { %9241 = vmatmul.mubr.msk.f32.gmra.mxu1 %vm1402_vm5, %v3699_v3 }
 0xd26   :  { %9243 = vmatprep.mubr.msk.f32.mxu1 %vm9848_vm4, %v13499_v8  ;;  %v3736_v21 = vpop.f32.mrf.mxu0 }
 0xd28   :  { %v3739_v23 = vpop.f32.mrf.mxu0 }
 0xd29   :  { %9244 = vmatmul.mubr.msk.f32.gmra.mxu1 %vm1402_vm5, %v3704_v18  ;;  %v9828_v18 = vld [vmem:[%s13185_s2 + $0x100] sm:$0xff] }
 0xd2a   :  { %9246 = vmatprep.mubr.msk.f32.mxu1 %vm9848_vm4, %v13499_v8  ;;  %v3741_v20 = vpop.f32.mrf.mxu0 }
 0xd2c   :  { %v3744_v57 = vpop.f32.mrf.mxu0 }
 0xd2d   :  { %9247 = vmatmul.mubr.msk.f32.gmra.mxu1 %vm1402_vm5, %v3709_v45  ;;  %v9829_v45 = vld [vmem:[%s13185_s2 + $0xf8] sm:$0xff] }
 0xd2e   :  { %9249 = vmatprep.mubr.msk.f32.mxu1 %vm9848_vm4, %v13499_v8  ;;  %v3746_v4 = vpop.f32.mrf.mxu0 }
 0xd30   :  { %v3749_v12 = vpop.f32.mrf.mxu0 }
 0xd31   :  { %9250 = vmatmul.mubr.msk.f32.gmra.mxu1 %vm1402_vm5, %v3714_v44 }
 0xd32   :  { %9252 = vmatprep.mubr.msk.f32.mxu1 %vm9848_vm4, %v13499_v8  ;;  %v3751_v50 = vpop.f32.mrf.mxu0 }
 0xd34   :  { %v3754_v15 = vpop.f32.mrf.mxu0 }
 0xd35   :  { %v3880_v35 = vpop.f32.mrf.mxu1  ;;  %9253 = vmatmul.mubr.msk.f32.gmra.mxu1 %vm1402_vm5, %v3719_v33 }
 0xd36   :  { %9259 = vmatprep.mubr.msk.f32.mxu1 %vm9848_vm4, %v13499_v8  ;;  %v3756_v55 = vpop.f32.mrf.mxu0 }
 0xd37   :  { %v9086_v27 = vpop.f32.mrf.mxu1 }
 0xd38   :  { %v3759_v51 = vpop.f32.mrf.mxu0 }
 0xd39   :  { %v3885_v1 = vpop.f32.mrf.mxu1  ;;  %9260 = vmatmul.mubr.msk.f32.vlgmr.msra.gmra.mxu1 %vm1402_vm5, %v3724_v47 }
 0xd3a   :  { %9262 = vmatprep.mubr.msk.f32.mxu1 %vm9848_vm4, %v13499_v8  ;;  %9281 = vmatpush3.msra.mxu1 %v9826_v9  ;;  %v3761_v53 = vpop.f32.mrf.mxu0 }
 0xd3b   :  { %v9089_v30 = vpop.f32.mrf.mxu1  ;;  %9282 = vmatprep.subr.mxu1 %v13499_v8 }
 0xd3c   :  { %9283 = vmatpush3.msra.mxu1 %v9827_v54  ;;  %v3764_v48 = vpop.f32.mrf.mxu0 }
 0xd3d   :  { %v3890_v52 = vpop.f32.mrf.mxu1  ;;  %9263 = vmatmul.mubr.msk.f32.gmra.mxu1 %vm1402_vm5, %v3729_v5  ;;  %9305 = vmatprep.subr.mxu1 %v13499_v8 }
 0xd3e   :  { %9265 = vmatprep.mubr.msk.f32.mxu1 %vm9848_vm4, %v13499_v8  ;;  %v3766_v41 = vpop.f32.mrf.mxu0 }
 0xd3f   :  { %v9092_v31 = vpop.f32.mrf.mxu1 }
 0xd40   :  { %v3769_v60 = vpop.f32.mrf.mxu0 }
 0xd41   :  { %v3895_v10 = vpop.f32.mrf.mxu1  ;;  %9266 = vmatmul.mubr.msk.f32.gmra.mxu1 %vm1402_vm5, %v3734_v22 }
 0xd42   :  { %9268 = vmatprep.mubr.msk.f32.mxu1 %vm9848_vm4, %v13499_v8  ;;  %v3771_v26 = vpop.f32.mrf.mxu0 }
 0xd43   :  { %v9095_v38 = vpop.f32.mrf.mxu1 }
 0xd44   :  { %v3774_v6 = vpop.f32.mrf.mxu0 }
 0xd45   :  { %v3900_v16 = vpop.f32.mrf.mxu1  ;;  %9269 = vmatmul.mubr.msk.f32.gmra.mxu1 %vm1402_vm5, %v3739_v23 }
 0xd46   :  { %9271 = vmatprep.mubr.msk.f32.mxu1 %vm9848_vm4, %v13499_v8  ;;  %v3776_v17 = vpop.f32.mrf.mxu0 }
 0xd47   :  { %v9098_v32 = vpop.f32.mrf.mxu1 }
 0xd48   :  { %v3779_v14 = vpop.f32.mrf.mxu0 }
 0xd49   :  { %v3905_v28 = vpop.f32.mrf.mxu1  ;;  %9272 = vmatmul.mubr.msk.f32.gmra.mxu1 %vm1402_vm5, %v3744_v57 }
 0xd4a   :  { %9274 = vmatprep.mubr.msk.f32.mxu1 %vm9848_vm4, %v13499_v8  ;;  %v3781_v19 = vpop.f32.mrf.mxu0 }
 0xd4b   :  { %v9101_v63 = vpop.f32.mrf.mxu1 }
 0xd4c   :  { %v3784_v42 = vpop.f32.mrf.mxu0 }
 0xd4d   :  { %v3910_v36 = vpop.f32.mrf.mxu1  ;;  %9275 = vmatmul.mubr.msk.f32.gmra.mxu1 %vm1402_vm5, %v3749_v12 }
 0xd4e   :  { %9277 = vmatprep.mubr.msk.f32.mxu1 %vm9848_vm4, %v13499_v8  ;;  %v3786_v13 = vpop.f32.mrf.mxu0 }
 0xd4f   :  { %v9104_v39 = vpop.f32.mrf.mxu1 }
 0xd50   :  { %v3789_v24 = vpop.f32.mrf.mxu0 }
 0xd51   :  { %v4001_v61 = vpop.f32.mrf.mxu1  ;;  %9278 = vmatmul.mubr.msk.f32.gmra.mxu1 %vm1402_vm5, %v3754_v15 }
 0xd52   :  { %v4002_v25 = vadd.f32 %v4001_v61, %v3880_v35  ;;  %9284 = vmatprep.mubr.msk.f32.mxu1 %vm9848_vm4, %v13499_v8  ;;  %v3791_v2 = vpop.f32.mrf.mxu0 }
 0xd53   :  { %v9111_v58 = vpop.f32.mrf.mxu1 }
 0xd55   :  { %v4006_v3 = vpop.f32.mrf.mxu1  ;;  %9285 = vmatmul.mubr.msk.f32.vlgmr.msra.gmra.mxu1 %vm1402_vm5, %v3759_v51 }
 0xd56   :  { %v4007_v11 = vadd.f32 %v4006_v3, %v3885_v1  ;;  %9287 = vmatprep.mubr.msk.f32.mxu1 %vm9848_vm4, %v13499_v8  ;;  %9306 = vmatpush3.msra.mxu1 %v9828_v18 }
 0xd57   :  { %v9114_v0 = vpop.f32.mrf.mxu1  ;;  %9307 = vmatprep.subr.mxu1 %v13499_v8 }
 0xd58   :  { %9308 = vmatpush3.msra.mxu1 %v9829_v45 }
 0xd59   :  { %v4011_v34 = vpop.f32.mrf.mxu1  ;;  %9288 = vmatmul.mubr.msk.f32.gmra.mxu1 %vm1402_vm5, %v3764_v48  ;;  %9309 = vmatprep.subr.mxu1 %v13499_v8 }
 0xd5a   :  { %v4012_v44 = vadd.f32 %v4011_v34, %v3890_v52  ;;  %9290 = vmatprep.mubr.msk.f32.mxu1 %vm9848_vm4, %v13499_v8  ;;  %9310 = vmatpush3.msra.mxu1 %v9830_v62 }
 0xd5b   :  { %v9117_v33 = vpop.f32.mrf.mxu1  ;;  %9311 = vmatprep.subr.mxu1 %v13499_v8 }
 0xd5c   :  { %9312 = vmatpush3.msra.mxu1 %v9831_v37 }
 0xd5d   :  { %v4016_v47 = vpop.f32.mrf.mxu1  ;;  %9291 = vmatmul.mubr.msk.f32.gmra.mxu1 %vm1402_vm5, %v3769_v60  ;;  %9334 = vmatprep.subr.mxu1 %v13499_v8 }
 0xd5e   :  { %v4017_v56 = vadd.f32 %v4016_v47, %v3895_v10  ;;  %9293 = vmatprep.mubr.msk.f32.mxu1 %vm9848_vm4, %v13499_v8 }
 0xd5f   :  { %v9120_v29 = vpop.f32.mrf.mxu1 }
 0xd61   :  { %v4021_v59 = vpop.f32.mrf.mxu1  ;;  %9294 = vmatmul.mubr.msk.f32.gmra.mxu1 %vm1402_vm5, %v3774_v6 }
 0xd62   :  { %v4022_v5 = vadd.f32 %v4021_v59, %v3900_v16  ;;  %9296 = vmatprep.mubr.msk.f32.mxu1 %vm9848_vm4, %v13499_v8 }
 0xd63   :  { %v9123_v46 = vpop.f32.mrf.mxu1 }
 0xd65   :  { %v4026_v22 = vpop.f32.mrf.mxu1  ;;  %9297 = vmatmul.mubr.msk.f32.gmra.mxu1 %vm1402_vm5, %v3779_v14 }
 0xd66   :  { %v4027_v21 = vadd.f32 %v4026_v22, %v3905_v28  ;;  %9299 = vmatprep.mubr.msk.f32.mxu1 %vm9848_vm4, %v13499_v8 }
 0xd67   :  { %v9126_v23 = vpop.f32.mrf.mxu1 }
 0xd69   :  { %v4031_v20 = vpop.f32.mrf.mxu1  ;;  %9300 = vmatmul.mubr.msk.f32.gmra.mxu1 %vm1402_vm5, %v3784_v42 }
 0xd6a   :  { %v4032_v57 = vadd.f32 %v4031_v20, %v3910_v36  ;;  %9302 = vmatprep.mubr.msk.f32.mxu1 %vm9848_vm4, %v13499_v8 }
 0xd6b   :  { %v9129_v4 = vpop.f32.mrf.mxu1 }
 0xd6d   :  { %v4122_v12 = vpop.f32.mrf.mxu1  ;;  %9303 = vmatmul.mubr.msk.f32.gmra.mxu1 %vm1402_vm5, %v3789_v24 }
 0xd6e   :  { %v4156_v50 = vadd.f32 %v4122_v12, %v4002_v25  ;;  %9313 = vmatprep.mubr.msk.f32.mxu1 %vm9848_vm4, %v13499_v8 }
 0xd6f   :  { %v9136_v15 = vpop.f32.mrf.mxu1 }
 0xd71   :  { %v4127_v35 = vpop.f32.mrf.mxu1 }
 0xd72   :  { %v4157_v55 = vadd.f32 %v4127_v35, %v4007_v11 }
 0xd73   :  { %v9139_v27 = vpop.f32.mrf.mxu1 }
 0xd75   :  { %v4132_v51 = vpop.f32.mrf.mxu1 }
 0xd76   :  { %v4158_v1 = vadd.f32 %v4132_v51, %v4012_v44 }
 0xd77   :  { %v9142_v9 = vpop.f32.mrf.mxu1 }
 0xd79   :  { %v4137_v53 = vpop.f32.mrf.mxu1 }
 0xd7a   :  { %v4159_v30 = vadd.f32 %v4137_v53, %v4017_v56 }
 0xd7b   :  { %v9145_v54 = vpop.f32.mrf.mxu1 }
 0xd7d   :  { %v4142_v48 = vpop.f32.mrf.mxu1 }
 0xd7e   :  { %v4160_v52 = vadd.f32 %v4142_v48, %v4022_v5 }
 0xd7f   :  { %v9148_v41 = vpop.f32.mrf.mxu1 }
 0xd81   :  { %v4147_v31 = vpop.f32.mrf.mxu1 }
 0xd82   :  { %v4161_v60 = vadd.f32 %v4147_v31, %v4027_v21 }
 0xd83   :  { %v9151_v10 = vpop.f32.mrf.mxu1 }
 0xd85   :  { %v4152_v26 = vpop.f32.mrf.mxu1 }
 0xd86   :  { %v4162_v38 = vadd.f32 %v4152_v26, %v4032_v57 }
 0xd87   :  { %v9154_v6 = vpop.f32.mrf.mxu1 }
 0xd89   :  { %v4250_v16 = vpop.f32.mrf.mxu1 }
 0xd8a   :  { %v4284_v17 = vadd.f32 %v4250_v16, %v4156_v50 }
 0xd8b   :  { %v9161_v32 = vpop.f32.mrf.mxu1 }
 0xd8d   :  { %v4255_v14 = vpop.f32.mrf.mxu1 }
 0xd8e   :  { %v4285_v28 = vadd.f32 %v4255_v14, %v4157_v55 }
 0xd8f   :  { %v9164_v19 = vpop.f32.mrf.mxu1 }
 0xd91   :  { %v4260_v63 = vpop.f32.mrf.mxu1 }
 0xd92   :  { %v4286_v42 = vadd.f32 %v4260_v63, %v4158_v1 }
 0xd93   :  { %v9167_v36 = vpop.f32.mrf.mxu1 }
 0xd95   :  { %v4265_v13 = vpop.f32.mrf.mxu1 }
 0xd96   :  { %v4287_v39 = vadd.f32 %v4265_v13, %v4159_v30 }
 0xd97   :  { %v9170_v24 = vpop.f32.mrf.mxu1 }
 0xd99   :  { %v4270_v61 = vpop.f32.mrf.mxu1 }
 0xd9a   :  { %v4288_v25 = vadd.f32 %v4270_v61, %v4160_v52 }
 0xd9b   :  { %v9173_v2 = vpop.f32.mrf.mxu1 }
 0xd9d   :  { %v4275_v58 = vpop.f32.mrf.mxu1 }
 0xd9e   :  { %v4289_v3 = vadd.f32 %v4275_v58, %v4161_v60 }
 0xd9f   :  { %v9176_v11 = vpop.f32.mrf.mxu1 }
 0xda1   :  { %v4280_v18 = vpop.f32.mrf.mxu1 }
 0xda2   :  { %v4290_v0 = vadd.f32 %v4280_v18, %v4162_v38 }
 0xda3   :  { %v9179_v45 = vpop.f32.mrf.mxu1 }
 0xda5   :  { %v4378_v34 = vpop.f32.mrf.mxu1 }
 0xda6   :  { %v4412_v44 = vadd.f32 %v4378_v34, %v4284_v17 }
 0xda7   :  { %v9186_v62 = vpop.f32.mrf.mxu1 }
 0xda9   :  { %v4383_v33 = vpop.f32.mrf.mxu1 }
 0xdaa   :  { %v4413_v37 = vadd.f32 %v4383_v33, %v4285_v28 }
 0xdab   :  { %v9189_v47 = vpop.f32.mrf.mxu1 }
 0xdad   :  { %v4388_v56 = vpop.f32.mrf.mxu1 }
 0xdae   :  { %v4414_v29 = vadd.f32 %v4388_v56, %v4286_v42 }
 0xdaf   :  { %v9192_v59 = vpop.f32.mrf.mxu1 }
 0xdb1   :  { %v4393_v5 = vpop.f32.mrf.mxu1 }
 0xdb2   :  { %v4415_v46 = vadd.f32 %v4393_v5, %v4287_v39 }
 0xdb3   :  { %v9195_v22 = vpop.f32.mrf.mxu1 }
 0xdb5   :  { %v4398_v21 = vpop.f32.mrf.mxu1 }
 0xdb6   :  { %v4416_v23 = vadd.f32 %v4398_v21, %v4288_v25 }
 0xdb7   :  { %v9198_v20 = vpop.f32.mrf.mxu1 }
 0xdb9   :  { %v4403_v57 = vpop.f32.mrf.mxu1 }
 0xdba   :  { %v4417_v4 = vadd.f32 %v4403_v57, %v4289_v3 }
 0xdbb   :  { %v9201_v12 = vpop.f32.mrf.mxu1 }
 0xdbd   :  { %v4408_v50 = vpop.f32.mrf.mxu1 }
 0xdbe   :  { %v4418_v15 = vadd.f32 %v4408_v50, %v4290_v0  ;;  %v9832_v50 = vld [vmem:[%s13185_s2 + $0xa8] ss:$0 sm:$0xff] }
 0xdbf   :  { %v9204_v35 = vpop.f32.mrf.mxu1 }
 0xdc1   :  { %v4506_v55 = vpop.f32.mrf.mxu1 }
 0xdc2   :  { %v4540_v27 = vadd.f32 %v4506_v55, %v4412_v44 }
 0xdc3   :  { %v9211_v51 = vpop.f32.mrf.mxu1 }
 0xdc5   :  { %v4511_v1 = vpop.f32.mrf.mxu1 }
 0xdc6   :  { %v4541_v9 = vadd.f32 %v4511_v1, %v4413_v37 }
 0xdc7   :  { %v9214_v53 = vpop.f32.mrf.mxu1 }
 0xdc9   :  { %v4516_v30 = vpop.f32.mrf.mxu1 }
 0xdca   :  { %v4542_v54 = vadd.f32 %v4516_v30, %v4414_v29 }
 0xdcb   :  { %v9217_v48 = vpop.f32.mrf.mxu1 }
 0xdcd   :  { %v4521_v52 = vpop.f32.mrf.mxu1 }
 0xdce   :  { %v4543_v41 = vadd.f32 %v4521_v52, %v4415_v46 }
 0xdcf   :  { %v9220_v31 = vpop.f32.mrf.mxu1 }
 0xdd1   :  { %v4526_v60 = vpop.f32.mrf.mxu1 }
 0xdd2   :  { %v12277_v10 = vadd.f32 %v4526_v60, %v4416_v23 }
 0xdd3   :  { %v9223_v26 = vpop.f32.mrf.mxu1 }
 0xdd5   :  { %v4531_v38 = vpop.f32.mrf.mxu1 }
 0xdd6   :  { %v12279_v6 = vadd.f32 %v4531_v38, %v4417_v4 }
 0xdd7   :  { %v9226_v16 = vpop.f32.mrf.mxu1 }
 0xdd9   :  { %v4536_v17 = vpop.f32.mrf.mxu1 }
 0xdda   :  { %v12281_v32 = vadd.f32 %v4536_v17, %v4418_v15  ;;  %v9834_v17 = vld [vmem:[%s13185_s2 + $0xb8] sm:$0xff] }
 0xddb   :  { %v9229_v14 = vpop.f32.mrf.mxu1 }
 0xddd   :  { %v4634_v28 = vpop.f32.mrf.mxu1 }
 0xdde   :  { %v4668_v46 = vadd.f32 %v4634_v28, %v4540_v27 }
 0xddf   :  { %v9236_v19 = vpop.f32.mrf.mxu1 }
 0xde1   :  { %v4639_v63 = vpop.f32.mrf.mxu1 }
 0xde2   :  { %v4669_v20 = vadd.f32 %v4639_v63, %v4541_v9  ;;  %v9833_v9 = vld [vmem:[%s13185_s2 + $0xb0] sm:$0xff] }
 0xde3   :  { %v9239_v42 = vpop.f32.mrf.mxu1 }
 0xde5   :  { %v4644_v36 = vpop.f32.mrf.mxu1 }
 0xde6   :  { %v4670_v55 = vadd.f32 %v4644_v36, %v4542_v54 }
 0xde7   :  { %v9242_v13 = vpop.f32.mrf.mxu1 }
 0xde9   :  { %v4649_v39 = vpop.f32.mrf.mxu1 }
 0xdea   :  { %v4671_v31 = vadd.f32 %v4649_v39, %v4543_v41  ;;  %v9835_v39 = vld [vmem:[%s13185_s2 + $0xc0] sm:$0xff] }
 0xdeb   :  { %v9245_v24 = vpop.f32.mrf.mxu1 }
 0xded   :  { %v4654_v61 = vpop.f32.mrf.mxu1 }
 0xdee   :  { %v4672_v41 = vadd.f32 %v4654_v61, %v12277_v10 }
 0xdef   :  { %v9248_v25 = vpop.f32.mrf.mxu1 }
 0xdf1   :  { %v4659_v2 = vpop.f32.mrf.mxu1 }
 0xdf2   :  { %v4673_v10 = vadd.f32 %v4659_v2, %v12279_v6 }
 0xdf3   :  { %v9251_v58 = vpop.f32.mrf.mxu1 }
 0xdf5   :  { %v12283_v3 = vpop.f32.mrf.mxu1 }
 0xdf6   :  { %v4674_v6 = vadd.f32 %v12283_v3, %v12281_v32 }
 0xdf7   :  { %v9254_v11 = vpop.f32.mrf.mxu1 }
 0xdf9   :  { %v4762_v18 = vpop.f32.mrf.mxu1 }
 0xdfa   :  { %v4796_v21 = vadd.f32 %v4762_v18, %v4668_v46 }
 0xdfb   :  { %v9261_v0 = vpop.f32.mrf.mxu1 }
 0xdfd   :  { %v4767_v45 = vpop.f32.mrf.mxu1 }
 0xdfe   :  { %v4797_v12 = vadd.f32 %v4767_v45, %v4669_v20  ;;  %v9836_v45 = vld [vmem:[%s13185_s2 + $0xc8] sm:$0xff]  ;;  %v9839_v20 = vld [vmem:[%s13185_s2 + $0xe0] sm:$0x1] }
 0xdff   :  { %v9264_v34 = vpop.f32.mrf.mxu1 }
 0xe01   :  { %v4772_v44 = vpop.f32.mrf.mxu1 }
 0xe02   :  { %v4798_v30 = vadd.f32 %v4772_v44, %v4670_v55 }
 0xe03   :  { %v9267_v62 = vpop.f32.mrf.mxu1 }
 0xe05   :  { %v4777_v33 = vpop.f32.mrf.mxu1 }
 0xe06   :  { %v4799_v38 = vadd.f32 %v4777_v33, %v4671_v31  ;;  %v9840_v31 = vld [vmem:[%s13185_s2 + $0x108] ss:$0 sm:$0xff] }
 0xe07   :  { %v9270_v37 = vpop.f32.mrf.mxu1 }
 0xe09   :  { %v4782_v47 = vpop.f32.mrf.mxu1 }
 0xe0a   :  { %v4800_v36 = vadd.f32 %v4782_v47, %v4672_v41 }
 0xe0b   :  { %v9273_v56 = vpop.f32.mrf.mxu1 }
 0xe0c   :  { %v9837_v56 = vld [vmem:[%s13185_s2 + $0xd0] sm:$0xff] }
 0xe0d   :  { %v4787_v29 = vpop.f32.mrf.mxu1 }
 0xe0e   :  { %v4801_v18 = vadd.f32 %v4787_v29, %v4673_v10 }
 0xe0f   :  { %v9276_v59 = vpop.f32.mrf.mxu1 }
 0xe11   :  { %v4792_v5 = vpop.f32.mrf.mxu1 }
 0xe12   :  { %v4802_v37 = vadd.f32 %v4792_v5, %v4674_v6  ;;  %v9838_v5 = vld [vmem:[%s13185_s2 + $0xd8] sm:$0xff]  ;;  %v9846_v6 = vld [vmem:[%s13185_s2 + $0x140] sm:$0x3] }
 0xe13   :  { %v9279_v22 = vpop.f32.mrf.mxu1 }
 0xe15   :  { %v4890_v23 = vpop.f32.mrf.mxu1 }
 0xe16   :  { %v4924_v57 = vadd.f32 %v4890_v23, %v4796_v21 }
 0xe17   :  { %v9286_v4 = vpop.f32.mrf.mxu1 }
 0xe18   :  { %v4931_v15 = vadd.f32 %v9832_v50, %v4924_v57 }
 0xe19   :  { %v4895_v35 = vpop.f32.mrf.mxu1 }
 0xe1a   :  { %v12288_v51 = vmax.f32 %v4931_v15, 0.0  ;;  %v4925_v1 = vadd.f32 %v4895_v35, %v4797_v12 }
 0xe1b   :  { %v9289_v53 = vpop.f32.mrf.mxu1 }
 0xe1c   :  { %v4932_v27 = vadd.f32 %v9832_v50, %v4925_v1  ;;  %v4945_v48 = vadd.f32 %v9833_v9, %v12288_v51 }
 0xe1d   :  { %v4900_v52 = vpop.f32.mrf.mxu1 }
 0xe1e   :  { %v12294_v60 = vmax.f32 %v4932_v27, 0.0  ;;  %v4926_v26 = vadd.f32 %v4900_v52, %v4798_v30  ;;  %9314 = vmatmul.mubr.msk.f32.vlgmr.msra.gmra.mxu1 %vm2570_vm6, %v4945_v48 }
 0xe1f   :  { %v9292_v54 = vpop.f32.mrf.mxu1  ;;  %9316 = vmatprep.mubr.msk.f32.mxu1 %vm9848_vm4, %v13499_v8 }
 0xe20   :  { %v4933_v16 = vadd.f32 %v9832_v50, %v4926_v26  ;;  %v4946_v14 = vadd.f32 %v9834_v17, %v12294_v60 }
 0xe21   :  { %v4905_v28 = vpop.f32.mrf.mxu1 }
 0xe22   :  { %v12304_v19 = vmax.f32 %v4933_v16, 0.0  ;;  %v4927_v63 = vadd.f32 %v4905_v28, %v4799_v38  ;;  %9317 = vmatmul.mubr.msk.f32.gmra.mxu1 %vm2570_vm6, %v4946_v14 }
 0xe23   :  { %v9295_v42 = vpop.f32.mrf.mxu1  ;;  %9319 = vmatprep.mubr.msk.f32.mxu1 %vm9848_vm4, %v13499_v8 }
 0xe24   :  { %v4934_v13 = vadd.f32 %v9832_v50, %v4927_v63  ;;  %v4947_v24 = vadd.f32 %v9835_v39, %v12304_v19  ;;  %v9841_v63 = vld [vmem:[%s13185_s2 + $0x110] sm:$0xff]  ;;  %v9842_v42 = vld [vmem:[%s13185_s2 + $0x118] sm:$0xff] }
 0xe25   :  { %v4910_v25 = vpop.f32.mrf.mxu1  ;;  %v9845_v39 = vld [vmem:[%s13185_s2 + $0x130] sm:$0x1] }
 0xe26   :  { %v12314_v61 = vmax.f32 %v4934_v13, 0.0  ;;  %v4928_v58 = vadd.f32 %v4910_v25, %v4800_v36  ;;  %9320 = vmatmul.mubr.msk.f32.gmra.mxu1 %vm2570_vm6, %v4947_v24  ;;  %v9843_v36 = vld [vmem:[%s13185_s2 + $0x120] sm:$0xff]  ;;  %v9844_v13 = vld [vmem:[%s13185_s2 + $0x128] sm:$0xff] }
 0xe27   :  { %v9298_v11 = vpop.f32.mrf.mxu1  ;;  %9322 = vmatprep.mubr.msk.f32.mxu1 %vm9848_vm4, %v13499_v8 }
 0xe28   :  { %v4935_v0 = vadd.f32 %v9832_v50, %v4928_v58  ;;  %v4948_v34 = vadd.f32 %v9836_v45, %v12314_v61 }
 0xe29   :  { %v4915_v44 = vpop.f32.mrf.mxu1 }
 0xe2a   :  { %v12325_v2 = vmax.f32 %v4935_v0, 0.0  ;;  %v4929_v62 = vadd.f32 %v4915_v44, %v4801_v18  ;;  %9323 = vmatmul.mubr.msk.f32.gmra.mxu1 %vm2570_vm6, %v4948_v34 }
 0xe2b   :  { %v9301_v33 = vpop.f32.mrf.mxu1  ;;  %9325 = vmatprep.mubr.msk.f32.mxu1 %vm9848_vm4, %v13499_v8 }
 0xe2c   :  { %v4936_v47 = vadd.f32 %v9832_v50, %v4929_v62  ;;  %v4949_v29 = vadd.f32 %v9837_v56, %v12325_v2 }
 0xe2d   :  { %v4920_v59 = vpop.f32.mrf.mxu1 }
 0xe2e   :  { %v12334_v46 = vmax.f32 %v4936_v47, 0.0  ;;  %v4930_v32 = vadd.f32 %v4920_v59, %v4802_v37  ;;  %9326 = vmatmul.mubr.msk.f32.gmra.mxu1 %vm2570_vm6, %v4949_v29 }
 0xe2f   :  { %v9304_v3 = vpop.f32.mrf.mxu1  ;;  %9328 = vmatprep.mubr.msk.f32.mxu1 %vm9848_vm4, %v13499_v8 }
 0xe30   :  { %v4937_v22 = vadd.f32 %v9832_v50, %v4930_v32  ;;  %v4950_v21 = vadd.f32 %v9838_v5, %v12334_v46 }
 0xe32   :  { %v12343_v23 = vmax.f32 %v4937_v22, 0.0  ;;  %9329 = vmatmul.mubr.msk.f32.gmra.mxu1 %vm2570_vm6, %v4950_v21 }
 0xe33   :  { %9331 = vmatprep.mubr.msk.f32.mxu1 %vm9848_vm4, %v13499_v8 }
 0xe34   :  { %v4951_v57 = vadd.f32 %v9839_v20, %v12343_v23 }
 0xe36   :  { %9332 = vmatmul.mubr.msk.f32.gmra.mxu1 %vm2570_vm6, %v4951_v57 }
 0xe37   :  { %9348 = vmatprep.mubr.msk.f32.mxu1 %vm9848_vm4, %v13499_v8 }
 0xede   :  { %v5039_v4 = vpop.f32.mrf.mxu1 }
 0xedf   :  { %v5040_v41 = vadd.f32 %v9840_v31, %v5039_v4 }
 0xee0   :  { %v9315_v12 = vpop.f32.mrf.mxu1 }
 0xee2   :  { %v5044_v50 = vpop.f32.mrf.mxu1 }
 0xee3   :  { %v5045_v28 = vadd.f32 %v9840_v31, %v5044_v50 }
 0xee4   :  { %v9318_v15 = vpop.f32.mrf.mxu1 }
 0xee6   :  { %v5049_v35 = vpop.f32.mrf.mxu1 }
 0xee7   :  { %v5050_v14 = vadd.f32 %v9840_v31, %v5049_v35 }
 0xee8   :  { %v9321_v55 = vpop.f32.mrf.mxu1 }
 0xeea   :  { %v5054_v1 = vpop.f32.mrf.mxu1 }
 0xeeb   :  { %v5055_v17 = vadd.f32 %v9840_v31, %v5054_v1 }
 0xeec   :  { %v9324_v53 = vpop.f32.mrf.mxu1 }
 0xeee   :  { %v5059_v30 = vpop.f32.mrf.mxu1 }
 0xeef   :  { %v5060_v16 = vadd.f32 %v9840_v31, %v5059_v30 }
 0xef0   :  { %v9327_v27 = vpop.f32.mrf.mxu1 }
 0xef2   :  { %v5064_v9 = vpop.f32.mrf.mxu1 }
 0xef3   :  { %v5065_v38 = vadd.f32 %v9840_v31, %v5064_v9 }
 0xef4   :  { %v9330_v48 = vpop.f32.mrf.mxu1 }
 0xef6   :  { %v5069_v52 = vpop.f32.mrf.mxu1 }
 0xef7   :  { %v5070_v26 = vadd.f32 %v9840_v31, %v5069_v52 }
 0xef8   :  { %v9333_v54 = vpop.f32.mrf.mxu1 }
 0xef9   :  { %9335 = vmatpush3.xpose.msk.msra.mxu1 %vm2570_vm6, %v5070_v26 }
 0xefa   :  { %9336 = vmatprep.subr.mxu1 %v13499_v8 }
 0xefd   :  { %9337 = vmatpush3.xpose.msk.msra.mxu1 %vm2570_vm6, %v5065_v38 }
 0xefe   :  { %9338 = vmatprep.subr.mxu1 %v13499_v8 }
 0xf01   :  { %9339 = vmatpush3.xpose.msk.msra.mxu1 %vm2570_vm6, %v5060_v16 }
 0xf02   :  { %9340 = vmatprep.subr.mxu1 %v13499_v8 }
 0xf05   :  { %9341 = vmatpush3.xpose.msk.msra.mxu1 %vm2570_vm6, %v5055_v17 }
 0xf06   :  { %9342 = vmatprep.subr.mxu1 %v13499_v8 }
 0xf09   :  { %9343 = vmatpush3.xpose.msk.msra.mxu1 %vm2570_vm6, %v5050_v14 }
 0xf0a   :  { %9344 = vmatprep.subr.mxu1 %v13499_v8 }
 0xf0d   :  { %9345 = vmatpush3.xpose.msk.msra.mxu1 %vm2570_vm6, %v5045_v28 }
 0xf0e   :  { %9346 = vmatprep.subr.mxu1 %v13499_v8 }
 0xf11   :  { %9347 = vmatpush3.xpose.msk.msra.mxu1 %vm2570_vm6, %v5040_v41 }
 0xf12   :  { %9374 = vmatprep.subr.msk.mxu1 %vm459_vm0, %v12343_v23 }
 0xf14   :  { %9349 = vmatmul.mubr.msk.f32.vlgmr.msra.gmra.mxu1 %vm2570_vm6, %v9841_v63 }
 0xf15   :  { %9375 = vmatpush3.msk.msra.mxu1 %vm459_vm0, %v12343_v23  ;;  %9351 = vmatprep.mubr.msk.f32.mxu1 %vm9848_vm4, %v13499_v8 }
 0xf16   :  { %9376 = vmatprep.subr.mxu1 %v12334_v46 }
 0xf17   :  { %9377 = vmatpush3.msra.mxu1 %v12334_v46 }
 0xf18   :  { %9352 = vmatmul.mubr.msk.f32.gmra.mxu1 %vm2570_vm6, %v9842_v42  ;;  %9378 = vmatprep.subr.mxu1 %v12325_v2 }
 0xf19   :  { %9379 = vmatpush3.msra.mxu1 %v12325_v2  ;;  %9354 = vmatprep.mubr.msk.f32.mxu1 %vm9848_vm4, %v13499_v8 }
 0xf1a   :  { %9380 = vmatprep.subr.mxu1 %v12314_v61 }
 0xf1b   :  { %9381 = vmatpush3.msra.mxu1 %v12314_v61 }
 0xf1c   :  { %9355 = vmatmul.mubr.msk.f32.gmra.mxu1 %vm2570_vm6, %v9843_v36  ;;  %9382 = vmatprep.subr.mxu1 %v12304_v19 }
 0xf1d   :  { %9383 = vmatpush3.msra.mxu1 %v12304_v19  ;;  %9357 = vmatprep.mubr.msk.f32.mxu1 %vm9848_vm4, %v13499_v8 }
 0xf1e   :  { %9384 = vmatprep.subr.mxu1 %v12294_v60 }
 0xf1f   :  { %9385 = vmatpush3.msra.mxu1 %v12294_v60 }
 0xf20   :  { %9358 = vmatmul.mubr.msk.f32.gmra.mxu1 %vm2570_vm6, %v9844_v13  ;;  %9386 = vmatprep.subr.mxu1 %v12288_v51 }
 0xf21   :  { %9387 = vmatpush3.msra.mxu1 %v12288_v51  ;;  %9360 = vmatprep.mubr.msk.f32.mxu1 %vm9848_vm4, %v13499_v8 }
 0xf24   :  { %9361 = vmatmul.mubr.msk.f32.gmra.mxu1 %vm2570_vm6, %v9845_v39 }
 0xfd4   :  { %v12415_v24 = vpop.f32.mrf.mxu1 }
 0xfd6   :  { %v9350_v25 = vpop.f32.mrf.mxu1 }
 0xfd8   :  { %v12417_v10 = vpop.f32.mrf.mxu1 }
 0xfda   :  { %v9353_v58 = vpop.f32.mrf.mxu1 }
 0xfdc   :  { %v5170_v11 = vpop.f32.mrf.mxu1 }
 0xfde   :  { %v9356_v18 = vpop.f32.mrf.mxu1 }
 0xfe0   :  { %v5175_v0 = vpop.f32.mrf.mxu1 }
 0xfe1   :  { %9363 = vmatprep.subr.mxu0 %v5175_v0  ;;  %9419 = vmatprep.subr.mxu1 %v5175_v0 }
 0xfe2   :  { %v9359_v45 = vpop.f32.mrf.mxu1  ;;  %9364 = vmatpush3.msra.mxu0 %v5175_v0 }
 0xfe3   :  { %9365 = vmatprep.subr.mxu0 %v5170_v11 }
 0xfe4   :  { %9366 = vmatpush3.msra.mxu0 %v5170_v11  ;;  %v5180_v34 = vpop.f32.mrf.mxu1 }
 0xfe5   :  { %9367 = vmatprep.subr.mxu0 %v12417_v10  ;;  %v12434_v62 = vrot.slane %v5180_v34, %v11487_v7 }
 0xfe6   :  { %9368 = vmatpush3.msra.mxu0 %v12417_v10  ;;  %v9362_v44 = vpop.f32.mrf.mxu1 }
 0xfe7   :  { %9369 = vmatprep.subr.mxu0 %v12415_v24 }
 0xfe8   :  { %9370 = vmatpush3.msra.mxu0 %v12415_v24 }
 0xfe9   :  { %9372 = vmatmul.mubr.msk.f32.vlgmr.msra.gmra.mxu0 %vm2570_vm6, %v9846_v6  ;;  %9391 = vmatprep.subr.mxu0 %v5175_v0 }
 0xfea   :  { %9392 = vmatpush3.msra.mxu0 %v5175_v0 }
 0xfeb   :  { %9393 = vmatprep.subr.mxu0 %v5170_v11 }
 0xfec   :  { %9394 = vmatpush3.msra.mxu0 %v5170_v11 }
 0xfed   :  { %9395 = vmatprep.subr.mxu0 %v12417_v10 }
 0xfee   :  { %9396 = vmatpush3.msra.mxu0 %v12417_v10 }
 0xfef   :  { %9397 = vmatprep.subr.mxu0 %v12415_v24 }
 0xff0   :  { %9398 = vmatpush3.msra.mxu0 %v12415_v24 }
 0xff1   :  { %9402 = vmatprep.subr.msk.mxu0 %vm459_vm0, %v12343_v23 }
0x10a9   :  { %v9373_v33 = vpop.f32.mrf.mxu0 }
0x10aa   :  { %v5260_v37 = vadd.f32 %v9373_v33, %v12434_v62 }
0x10ab   :  { %v5254_v47 = vpop.f32.mrf.mxu0 }
0x10ac   :  { %v8039_v56 = vmul.f32 -1.442695, %v5260_v37  ;;  %v5255_v29 = vadd.f32 %v5254_v47, %v12434_v62 }
0x10ae   :  { %9755 = vpow2.f32 %v8039_v56  ;;  %v8038_v59 = vmul.f32 -1.442695, %v5255_v29  ;;  %v5766_v56 = vld [vmem:[%s13185_s2 + $0x150] sm:$0x3]  ;;  %v5765_v29 = vld [vmem:[%s13185_s2 + $0x148] sm:$0xff] }
0x10b0   :  { %9757 = vpow2.f32 %v8038_v59 }
0x10bb   :  { %v9756_v32 = vpop.eup %9755 }
0x10bc   :  { %v5270_v3 = vadd.f32 1.0, %v9756_v32 }
0x10bd   :  { %v9758_v22 = vpop.eup %9757 }
0x10be   :  { %9759 = vrcp.f32 %v5270_v3  ;;  %v5269_v5 = vadd.f32 1.0, %v9758_v22 }
0x10c0   :  { %9761 = vrcp.f32 %v5269_v5 }
0x10cb   :  { %v9760_v21 = vpop.eup %9759 }
0x10cc   :  { %v5278_v20 = vsel %vm2919_vm8, %v9760_v21, 0.0 }
0x10cd   :  { %v9762_v57 = vpop.eup %9761  ;;  %5279 = vadd.xlane.f32.xlu1 %v5278_v20 }
0x10ce   :  { %v5275_v4 = vsel %vm2915_vm7, %v9762_v57, 0.0 }
0x10cf   :  { %5276 = vadd.xlane.f32.xlu0 %v5275_v4 }
0x1156   :  { %v5280_v12 = vpop.xlane.xlu1 %5279 }
0x1157   :  { %v5282_v50 = vadd.f32 1e-08, %v5280_v12 }
0x1158   :  { %v5277_v15 = vpop.xlane.xlu0 %5276 }
0x1159   :  { %v5281_v35 = vadd.f32 1e-08, %v5277_v15  ;;  %9763 = vrcp.f32 %v5282_v50 }
0x115b   :  { %9765 = vrcp.f32 %v5281_v35 }
0x1166   :  { %v9764_v55 = vpop.eup %9763 }
0x1167   :  { %v5286_v30 = vmul.f32 %v9764_v55, %v9760_v21 }
0x1168   :  { %v9766_v1 = vpop.eup %9765 }
0x1169   :  { %v5284_v53 = vmul.f32 %v9766_v1, %v9762_v57  ;;  %v5852_v1 = vld [vmem:[%s13185_s2 + $0x168] sm:$0x3] }
0x116b   :  { %9388 = vmatprep.mubr.msk.f32.mxu1 %vm2915_vm7, %v5284_v53  ;;  %v5851_v53 = vld [vmem:[%s13185_s2 + $0x160] sm:$0xff] }
0x116c   :  { %9389 = vmatmul.mubr.msk.f32.vlgmr.msra.gmra.mxu1 %vm2915_vm7, %v5286_v30  ;;  %v5939_v30 = vld [vmem:[%s13191_s3 + $0x40] sm:$0x3] }
0x116d   :  { %9420 = vmatpush3.msra.mxu1 %v5175_v0 }
0x116e   :  { %9421 = vmatprep.subr.mxu1 %v5170_v11 }
0x116f   :  { %9422 = vmatpush3.msra.mxu1 %v5170_v11 }
0x1170   :  { %9423 = vmatprep.subr.mxu1 %v12417_v10 }
0x1171   :  { %9424 = vmatpush3.msra.mxu1 %v12417_v10 }
0x1172   :  { %9425 = vmatprep.subr.mxu1 %v12415_v24 }
0x1173   :  { %9426 = vmatpush3.msra.mxu1 %v12415_v24 }
0x1174   :  { %9430 = vmatprep.subr.msk.mxu1 %vm459_vm0, %v12343_v23 }
0x122c   :  { %v9390_v27 = vpop.f32.mrf.mxu1 }
0x122e   :  { %v5362_v9 = vpop.f32.mrf.mxu1 }
0x122f   :  { %9399 = vmatprep.mubr.msk.f32.mxu0 %vm2570_vm6, %v5362_v9  ;;  %v9467_v9 = vld [vmem:[%s13192_s4 + $0x18c] ss:$28 sps:$4 sm:$0xff]  }
0x1230   :  { %9400 = vmatmul.mubr.msk.f32.vlgmr.msra.gmra.mxu0 %vm2570_vm6, %v9390_v27  ;;  %v9465_v27 = vld [vmem:[%s13192_s4 + $0x188] ss:$28 sps:$4 sm:$0xff]  }
0x1231   :  { %9403 = vmatpush3.msk.msra.mxu0 %vm459_vm0, %v12343_v23 }
0x1232   :  { %9404 = vmatprep.subr.mxu0 %v12334_v46 }
0x1233   :  { %9405 = vmatpush3.msra.mxu0 %v12334_v46 }
0x1234   :  { %9406 = vmatprep.subr.mxu0 %v12325_v2 }
0x1235   :  { %9407 = vmatpush3.msra.mxu0 %v12325_v2 }
0x1236   :  { %9408 = vmatprep.subr.mxu0 %v12314_v61 }
0x1237   :  { %9409 = vmatpush3.msra.mxu0 %v12314_v61 }
0x1238   :  { %9410 = vmatprep.subr.mxu0 %v12304_v19 }
0x1239   :  { %9411 = vmatpush3.msra.mxu0 %v12304_v19 }
0x123a   :  { %9412 = vmatprep.subr.mxu0 %v12294_v60 }
0x123b   :  { %9413 = vmatpush3.msra.mxu0 %v12294_v60 }
0x123c   :  { %9414 = vmatprep.subr.mxu0 %v12288_v51 }
0x123d   :  { %9415 = vmatpush3.msra.mxu0 %v12288_v51 }
0x123e   :  { %9447 = vmatprep.subr.mxu0 %v13499_v8 }
0x12f0   :  { %v9401_v48 = vpop.f32.mrf.mxu0 }
0x12f1   :  { %v5449_v52 = vadd.f32 %v9401_v48, %v12434_v62  ;;  %v9470_v48 = vld [vmem:[%s13192_s4 + $0x154] ss:$28 sps:$4 sm:$0xff]  }
0x12f2   :  { %v5443_v31 = vpop.f32.mrf.mxu0 }
0x12f3   :  { %v8046_v26 = vmul.f32 -1.442695, %v5449_v52  ;;  %v5444_v54 = vadd.f32 %v5443_v31, %v12434_v62  ;;  %v9468_v52 = vld [vmem:[%s13192_s4 + $0x150] ss:$28 sps:$4 sm:$0xff]   ;;  %v9473_v31 = vld [vmem:[%s13192_s4 + $0x11c] ss:$28 sps:$4 sm:$0xff]  }
0x12f5   :  { %9767 = vpow2.f32 %v8046_v26  ;;  %v8045_v38 = vmul.f32 -1.442695, %v5444_v54  ;;  %v9471_v26 = vld [vmem:[%s13192_s4 + $0x118] ss:$28 sps:$4 sm:$0xff]   ;;  %v9476_v54 = vld [vmem:[%s13192_s4 + $0xe4] ss:$28 sps:$4 sm:$0xff]  }
0x12f7   :  { %9769 = vpow2.f32 %v8045_v38  ;;  %v9474_v38 = vld [vmem:[%s13192_s4 + $0xe0] ss:$28 sps:$4 sm:$0xff]  }
0x1302   :  { %v9768_v16 = vpop.eup %9767 }
0x1303   :  { %v5459_v17 = vadd.f32 1.0, %v9768_v16  ;;  %v9479_v16 = vld [vmem:[%s13192_s4 + $0xac] ss:$28 sps:$4 sm:$0xff]  }
0x1304   :  { %v9770_v14 = vpop.eup %9769 }
0x1305   :  { %9771 = vrcp.f32 %v5459_v17  ;;  %v5458_v28 = vadd.f32 1.0, %v9770_v14  ;;  %v9477_v17 = vld [vmem:[%s13192_s4 + $0xa8] ss:$28 sps:$4 sm:$0xff]   ;;  %v9482_v14 = vld [vmem:[%s13192_s4 + $0x74] ss:$28 sps:$4 sm:$0xff]  }
0x1307   :  { %9773 = vrcp.f32 %v5458_v28  ;;  %v9480_v28 = vld [vmem:[%s13192_s4 + $0x70] ss:$28 sps:$4 sm:$0xff]  }
0x1312   :  { %v9772_v41 = vpop.eup %9771 }
0x1313   :  { %v5467_v63 = vsel %vm2919_vm8, %v9772_v41, 0.0 }
0x1314   :  { %v9774_v42 = vpop.eup %9773  ;;  %5468 = vadd.xlane.f32.xlu1 %v5467_v63  ;;  %v9483_v63 = vld [vmem:[%s13192_s4 + $0x38] ss:$28 sps:$4 sm:$0xff]  }
0x1315   :  { %v5464_v36 = vsel %vm2915_vm7, %v9774_v42, 0.0 }
0x1316   :  { %5465 = vadd.xlane.f32.xlu0 %v5464_v36  ;;  %v9486_v36 = vld [vmem:[%s13192_s4] ss:$28 sps:$4 sm:$0xff]  }
0x139d   :  { %v5469_v13 = vpop.xlane.xlu1 %5468 }
0x139e   :  { %v5471_v39 = vadd.f32 1e-08, %v5469_v13  ;;  %v9491_v13 = vld [vmem:[%s13192_s4 + $0x34c] ss:$28 sps:$4 sm:$0xff]  }
0x139f   :  { %v5466_v24 = vpop.xlane.xlu0 %5465 }
0x13a0   :  { %v5470_v25 = vadd.f32 1e-08, %v5466_v24  ;;  %9775 = vrcp.f32 %v5471_v39  ;;  %v9489_v39 = vld [vmem:[%s13192_s4 + $0x348] ss:$28 sps:$4 sm:$0xff]   ;;  %v9497_v24 = vld [vmem:[%s13192_s4 + $0x314] ss:$28 sps:$4 sm:$0xff]  }
0x13a2   :  { %9777 = vrcp.f32 %v5470_v25  ;;  %v9495_v25 = vld [vmem:[%s13192_s4 + $0x310] ss:$28 sps:$4 sm:$0xff]  }
0x13ad   :  { %v9776_v10 = vpop.eup %9775 }
0x13ae   :  { %v5475_v18 = vmul.f32 %v9776_v10, %v9772_v41  ;;  %v9485_v41 = vld [vmem:[%s13192_s4 + $0x3c] ss:$28 sps:$4 sm:$0xff]  }
0x13af   :  { %v9778_v58 = vpop.eup %9777  ;;  %v9503_v10 = vld [vmem:[%s13192_s4 + $0x2dc] ss:$28 sps:$4 sm:$0xff]  }
0x13b0   :  { %v5473_v11 = vmul.f32 %v9778_v58, %v9774_v42  ;;  %v9488_v42 = vld [vmem:[%s13192_s4 + $0x4] ss:$28 sps:$4 sm:$0xff]   ;;  %v9501_v58 = vld [vmem:[%s13192_s4 + $0x2d8] ss:$28 sps:$4 sm:$0xff]  }
0x13b2   :  { %9416 = vmatprep.mubr.msk.f32.mxu0 %vm2915_vm7, %v5473_v11  ;;  %v9509_v11 = vld [vmem:[%s13192_s4 + $0x2a4] ss:$28 sps:$4 sm:$0xff]  }
0x13b3   :  { %9417 = vmatmul.mubr.msk.f32.vlgmr.msra.gmra.mxu0 %vm2915_vm7, %v5475_v18  ;;  %v9507_v18 = vld [vmem:[%s13192_s4 + $0x2a0] ss:$28 sps:$4 sm:$0xff]  }
0x13b4   :  { %9451 = vmatprep.mubr.msk.f32.mxu0 %vm9848_vm4, %v13499_v8  ;;  %9448 = vmatpush3.msk.msra.mxu0 %vm5776_vm12, %v5766_v56  ;;  %v9494_v56 = vld [vmem:[%s13192_s4 + $0x50c] ss:$28 sps:$4 sm:$0xff]  }
0x13b5   :  { %9449 = vmatprep.subr.mxu0 %v13499_v8 }
0x13b6   :  { %9450 = vmatpush3.msra.mxu0 %v5765_v29  ;;  %v9492_v29 = vld [vmem:[%s13192_s4 + $0x508] ss:$28 sps:$4 sm:$0xff]  }
0x13b7   :  { %9454 = vmatprep.subr.mxu0 %v13499_v8 }
0x1473   :  { %v9418_v0 = vpop.f32.mrf.mxu0 }
0x1475   :  { %v5548_v45 = vpop.f32.mrf.mxu0 }
0x1476   :  { %9427 = vmatprep.mubr.msk.f32.mxu1 %vm2570_vm6, %v5548_v45  ;;  %v9513_v45 = vld [vmem:[%s13192_s4 + $0x268] ss:$28 sps:$4 sm:$0xff]  }
0x1477   :  { %9428 = vmatmul.mubr.msk.f32.vlgmr.msra.gmra.mxu1 %vm2570_vm6, %v9418_v0  ;;  %v9515_v0 = vld [vmem:[%s13192_s4 + $0x26c] ss:$28 sps:$4 sm:$0xff]  }
0x1478   :  { %9431 = vmatpush3.msk.msra.mxu1 %vm459_vm0, %v12343_v23  ;;  %vm7646_vm0 = vcmask 1043458  }
0x1479   :  { %9432 = vmatprep.subr.mxu1 %v12334_v46  ;;  %vm7647_vm1 = vmor %vm7646_vm0, %vm5776_vm12 }
0x147a   :  { %9433 = vmatpush3.msra.mxu1 %v12334_v46  ;;  %vm7649_vm3 = vmor %vm7648_vm2, %vm7647_vm1 }
0x147b   :  { %9434 = vmatprep.subr.mxu1 %v12325_v2 }
0x147c   :  { %9435 = vmatpush3.msra.mxu1 %v12325_v2 }
0x147d   :  { %9436 = vmatprep.subr.mxu1 %v12314_v61 }
0x147e   :  { %9437 = vmatpush3.msra.mxu1 %v12314_v61 }
0x147f   :  { %9438 = vmatprep.subr.mxu1 %v12304_v19 }
0x1480   :  { %9439 = vmatpush3.msra.mxu1 %v12304_v19 }
0x1481   :  { %9440 = vmatprep.subr.mxu1 %v12294_v60 }
0x1482   :  { %9441 = vmatpush3.msra.mxu1 %v12294_v60 }
0x1483   :  { %9442 = vmatprep.subr.mxu1 %v12288_v51 }
0x1484   :  { %9443 = vmatpush3.msra.mxu1 %v12288_v51 }
0x1485   :  { %7270 = vmatprep.subr.bf16.mxu1 %v9467_v9  ;;  %v9542_v9 = vld [vmem:[%s13192_s4 + $0x514] ss:$28 sps:$4 sm:$0xff]  }
0x1537   :  { %v9429_v46 = vpop.f32.mrf.mxu1 }
0x1538   :  { %v5635_v23 = vadd.f32 %v9429_v46, %v12434_v62 }
0x1539   :  { %v5629_v2 = vpop.f32.mrf.mxu1 }
0x153a   :  { %v8053_v34 = vmul.f32 -1.442695, %v5635_v23  ;;  %v5630_v44 = vadd.f32 %v5629_v2, %v12434_v62  ;;  %v8061_v2 = vld [vmem:[%s13185_s2 + $0x158] ss:$0 sm:$0xff] }
0x153c   :  { %9779 = vpow2.f32 %v8053_v34  ;;  %v8052_v61 = vmul.f32 -1.442695, %v5630_v44 }
0x153e   :  { %9781 = vpow2.f32 %v8052_v61 }
0x1549   :  { %v9780_v6 = vpop.eup %9779 }
0x154a   :  { %v5645_v19 = vadd.f32 1.0, %v9780_v6 }
0x154b   :  { %v9782_v33 = vpop.eup %9781 }
0x154c   :  { %9783 = vrcp.f32 %v5645_v19  ;;  %v5644_v37 = vadd.f32 1.0, %v9782_v33  ;;  %v5938_v19 = vld [vmem:[%s13191_s3 + $0x38] sm:$0x3]  ;;  %v5935_v33 = vld [vmem:[%s13191_s3 + $0x8] sm:$0xff] }
0x154e   :  { %9785 = vrcp.f32 %v5644_v37  ;;  %v5934_v37 = vld [vmem:[%s13191_s3] sm:$0xff] }
0x1559   :  { %v9784_v60 = vpop.eup %9783 }
0x155a   :  { %8058 = vst.msk [vmem:[%s13188_s6 + $0x18] sm:$0x3] %vm2919_vm8, %v9784_v60  ;;  %v5653_v51 = vsel %vm2919_vm8, %v9784_v60, 0.0 }
0x155b   :  { %v9786_v47 = vpop.eup %9785  ;;  %5654 = vadd.xlane.f32.xlu1 %v5653_v51  ;;  %v5940_v51 = vld [vmem:[%s13191_s3 + $0x48] sm:$0x3] }
0x155c   :  { %8057 = vst.msk [vmem:[%s13188_s6 + $0x10] sm:$0xff] %vm2915_vm7, %v9786_v47  ;;  %v5650_v62 = vsel %vm2915_vm7, %v9786_v47, 0.0 }
0x155d   :  { %5651 = vadd.xlane.f32.xlu0 %v5650_v62  ;;  %v5936_v62 = vld [vmem:[%s13191_s3 + $0x10] sm:$0xff] }
0x15e4   :  { %v5655_v59 = vpop.xlane.xlu1 %5654 }
0x15e5   :  { %v5657_v32 = vadd.f32 1e-08, %v5655_v59  ;;  %9787 = vtanh.f32 %v5655_v59  ;;  %v9500_v59 = vld [vmem:[%s13192_s4 + $0x4d4] ss:$28 sps:$4 sm:$0xff]  }
0x15e6   :  { %v5652_v3 = vpop.xlane.xlu0 %5651 }
0x15e7   :  { %9789 = vrcp.f32 %v5657_v32  ;;  %v5656_v22 = vadd.f32 1e-08, %v5652_v3  ;;  %v9498_v32 = vld [vmem:[%s13192_s4 + $0x4d0] ss:$28 sps:$4 sm:$0xff]  }
0x15e8   :  { %9791 = vtanh.f32 %v5652_v3  ;;  %v9504_v3 = vld [vmem:[%s13192_s4 + $0x498] ss:$28 sps:$4 sm:$0xff]  }
0x15e9   :  { %9793 = vrcp.f32 %v5656_v22  ;;  %v9512_v22 = vld [vmem:[%s13192_s4 + $0x464] ss:$28 sps:$4 sm:$0xff]  }
0x15f2   :  { %v9788_v5 = vpop.eup %9787 }
0x15f3   :  { %v5760_v4 = vrot.slane %v9788_v5, %v11571_v43  ;;  %v9510_v5 = vld [vmem:[%s13192_s4 + $0x460] ss:$28 sps:$4 sm:$0xff]  }
0x15f4   :  { %v9790_v21 = vpop.eup %9789 }
0x15f5   :  { %v9792_v20 = vpop.eup %9791  ;;  %v5661_v15 = vmul.f32 %v9790_v21, %v9784_v60  ;;  %v5941_v60 = vld [vmem:[%s13191_s3 + $0x50] sm:$0x3]  ;;  %v9518_v21 = vld [vmem:[%s13192_s4 + $0x42c] ss:$28 sps:$4 sm:$0xff]  }
0x15f6   :  { %v9794_v57 = vpop.eup %9793  ;;  %v5756_v12 = vrot.slane %v9792_v20, %v11574_v49  ;;  %v9516_v20 = vld [vmem:[%s13192_s4 + $0x428] ss:$28 sps:$4 sm:$0xff]  }
0x15f7   :  { %v5659_v50 = vmul.f32 %v9794_v57, %v9786_v47  ;;  %v5937_v47 = vld [vmem:[%s13191_s3 + $0x18] sm:$0xff]  ;;  %v9521_v57 = vld [vmem:[%s13192_s4 + $0x234] ss:$28 sps:$4 sm:$0xff]  }
0x15f8   :  { %v5761_v35 = vsel %vm3405_vm9, %v5760_v4, %v5756_v12  ;;  %v9524_v4 = vld [vmem:[%s13192_s4 + $0x3f4] ss:$28 sps:$4 sm:$0xff]  }
0x15f9   :  { %5763 = vst.msk [vmem:[#allocation2 + $0x1] sm:$0x1] %vm3408_vm10, %v5761_v35  ;;  %9444 = vmatprep.mubr.msk.f32.mxu1 %vm2915_vm7, %v5659_v50  ;;  %v9519_v12 = vld [vmem:[%s13192_s4 + $0x230] ss:$28 sps:$4 sm:$0xff]   ;;  %v9530_v35 = vld [vmem:[%s13192_s4 + $0x3bc] ss:$28 sps:$4 sm:$0xff]  }
0x15fa   :  { %9445 = vmatmul.mubr.msk.f32.vlgmr.msra.gmra.mxu1 %vm2915_vm7, %v5661_v15  ;;  %v9522_v50 = vld [vmem:[%s13192_s4 + $0x3f0] ss:$28 sps:$4 sm:$0xff]   ;;  %v9527_v15 = vld [vmem:[%s13192_s4 + $0x1fc] ss:$28 sps:$4 sm:$0xff]  }
0x15fb   :  { %7271 = vmatpush1.bf16.msra.mxu1 %v9465_v27  ;;  %v9539_v27 = vld [vmem:[%s13192_s4 + $0x544] ss:$28 sps:$4 sm:$0xff]  }
0x15fc   :  { %7272 = vmatprep.subr.bf16.mxu1 %v9470_v48  ;;  %v9537_v48 = vld [vmem:[%s13192_s4 + $0x540] ss:$28 sps:$4 sm:$0xff]  }
0x15ff   :  { %7273 = vmatpush1.bf16.msra.mxu1 %v9468_v52  ;;  %v9545_v52 = vld [vmem:[%s13192_s4 + $0x194] ss:$28 sps:$4 sm:$0xff]  }
0x1600   :  { %v12516_v55 = vld [vmem:[#allocation2] sm:$0x3]  ;;  %7274 = vmatprep.subr.bf16.mxu1 %v9473_v31  ;;  %v8064_v31 = vld [vmem:[%s13185_s2 + $0x170] ss:$0 sm:$0xff] }
0x1601   :  { %9452 = vmatmul.mubr.msk.f32.vlgmr.msra.gmra.mxu0 %vm5772_vm13, %v12516_v55  ;;  %v8255_v43 = vadd.f32 -0.5, %v12516_v55 }
0x1602   :  { %9458 = vmatprep.mubr.msk.f32.mxu0 %vm9848_vm4, %v13499_v8  ;;  %9455 = vmatpush3.msk.msra.mxu0 %vm5776_vm12, %v5852_v1  ;;  %v9536_v1 = vld [vmem:[%s13192_s4 + $0x384] ss:$28 sps:$4 sm:$0xff]  }
0x1603   :  { %v7652_v49 = vmul.f32 2.0, %v8255_v43  ;;  %9456 = vmatprep.subr.mxu0 %v13499_v8  ;;  %7275 = vmatpush1.bf16.msra.mxu1 %v9471_v26  ;;  %v9528_v43 = vld [vmem:[%s13192_s4 + $0x3b8] ss:$28 sps:$4 sm:$0xff]  }
0x1604   :  { %9457 = vmatpush3.msra.mxu0 %v5851_v53  ;;  %7276 = vmatprep.subr.bf16.mxu1 %v9476_v54  ;;  %v9531_v53 = vld [vmem:[%s13192_s4 + $0x1c0] ss:$28 sps:$4 sm:$0xff]   ;;  %v5955_v54 = vsub.s32 1, %v11484_v40 }
0x1605   :  { %7654 = vst.msk [vmem:[%s13190_s5 + $0xe] sm:$0x3] %vm7653_vm14, %v7652_v49  ;;  %8070 = vmatprep.subr.msk.mxu0 %vm5776_vm12, %v5939_v30  ;;  %v9533_v49 = vld [vmem:[%s13192_s4 + $0x1c4] ss:$28 sps:$4 sm:$0xff]  }
0x1606   :  { %v9534_v30 = vld [vmem:[%s13192_s4 + $0x380] ss:$28 sps:$4 sm:$0xff]  }
0x1607   :  { %7277 = vmatpush1.bf16.msra.mxu1 %v9474_v38  ;;  %v8067_v26 = vld [vmem:[%s13191_s3 + $0x70] ss:$8 sm:$0xf] }
0x1608   :  { %7278 = vmatprep.subr.bf16.mxu1 %v9479_v16 }
0x160b   :  { %7279 = vmatpush1.bf16.msra.mxu1 %v9477_v17  ;;  %v5952_v17 = vrot.slane %v8067_v26, %v11487_v7 }
0x160c   :  { %7280 = vmatprep.subr.bf16.mxu1 %v9482_v14  ;;  %v5959_v14 = vsub.s32 2, %v11484_v40 }
0x160f   :  { %7281 = vmatpush1.bf16.msra.mxu1 %v9480_v28 }
0x1610   :  { %7282 = vmatprep.subr.bf16.mxu1 %v9485_v41  ;;  %v5956_v41 = vrot.slane %v8067_v26, %v5955_v54 }
0x1613   :  { %7283 = vmatpush1.bf16.msra.mxu1 %v9483_v63  ;;  %v5963_v63 = vsub.s32 3, %v11484_v40 }
0x1614   :  { %7284 = vmatprep.subr.bf16.mxu1 %v9488_v42 }
0x1617   :  { %7285 = vmatpush1.bf16.msra.mxu1 %v9486_v36 }
0x1618   :  { %7286 = vmatprep.subr.bf16.mxu1 %v9491_v13  ;;  %v5960_v13 = vrot.slane %v8067_v26, %v5959_v14 }
0x161b   :  { %7287 = vmatpush2.bf16.msra.mxu1 %v9489_v39 }
0x161c   :  { %7288 = vmatprep.subr.bf16.mxu1 %v9497_v24 }
0x161f   :  { %7289 = vmatpush2.bf16.msra.mxu1 %v9495_v25  ;;  %v5964_v25 = vrot.slane %v8067_v26, %v5963_v63  ;;  %v9594_v26 = vld [vmem:[%s13192_s4 + $0x198] ss:$28 sps:$4 sm:$0xff]  }
0x1620   :  { %7290 = vmatprep.subr.bf16.mxu1 %v9503_v10 }
0x1623   :  { %7291 = vmatpush2.bf16.msra.mxu1 %v9501_v58 }
0x1624   :  { %7292 = vmatprep.subr.bf16.mxu1 %v9509_v11 }
0x1627   :  { %7293 = vmatpush2.bf16.msra.mxu1 %v9507_v18 }
0x1628   :  { %7294 = vmatprep.subr.bf16.mxu1 %v9515_v0 }
0x162b   :  { %7295 = vmatpush2.bf16.msra.mxu1 %v9513_v45 }
0x162c   :  { %7296 = vmatprep.subr.bf16.mxu1 %v9521_v57  ;;  %v9567_v57 = vld [vmem:[%s13192_s4 + $0xb0] ss:$28 sps:$4 sm:$0xff]  }
0x162f   :  { %7297 = vmatpush2.bf16.msra.mxu1 %v9519_v12  ;;  %v9575_v12 = vld [vmem:[%s13192_s4 + $0x7c] ss:$28 sps:$4 sm:$0xff]  }
0x1630   :  { %7298 = vmatprep.subr.bf16.mxu1 %v9527_v15  ;;  %v9573_v15 = vld [vmem:[%s13192_s4 + $0x78] ss:$28 sps:$4 sm:$0xff]  }
0x16ba   :  { %v9446_v46 = vpop.f32.mrf.mxu1 }
0x16bb   :  { %8060 = vst.msk [vmem:[%s13189_s7 + $0x18] sm:$0x3] %vm3388_vm11, %v9446_v46 }
0x16bc   :  { %v5734_v23 = vpop.f32.mrf.mxu1 }
0x16bd   :  { %8059 = vst.msk [vmem:[%s13189_s7 + $0x10] sm:$0xff] %vm2570_vm6, %v5734_v23  ;;  %v9540_v23 = vld [vmem:[%s13192_s4 + $0x510] ss:$28 sps:$4 sm:$0xff]  }
0x16c1   :  { %v5846_v34 = vpop.f32.mrf.mxu0 }
0x16c2   :  { %v5847_v44 = vadd.f32 %v8061_v2, %v5846_v34 }
0x16c3   :  { %v9453_v61 = vpop.f32.mrf.mxu0 }
0x16c4   :  { %v5850_v6 = vmax.f32 %v5847_v44, 0.0  ;;  %v9548_v44 = vld [vmem:[%s13192_s4 + $0x4dc] ss:$28 sps:$4 sm:$0xff]  }
0x16c6   :  { %9459 = vmatmul.mubr.msk.f32.vlgmr.msra.gmra.mxu0 %vm5772_vm13, %v5850_v6 }
0x16c7   :  { %8071 = vmatpush1.msk.msra.mxu0 %vm5776_vm12, %v5938_v19  ;;  %6045 = vmatprep.mubr.f32.mxu0 %v13499_v8  ;;  %v9543_v19 = vld [vmem:[%s13192_s4 + $0x190] ss:$28 sps:$4 sm:$0xff]  }
0x16c8   :  { %6011 = vmatprep.subr.mxu0 %v5935_v33  ;;  %v9546_v33 = vld [vmem:[%s13192_s4 + $0x4d8] ss:$28 sps:$4 sm:$0xff]  }
0x16c9   :  { %6012 = vmatpush1.msra.mxu0 %v5934_v37 }
0x16ca   :  { %8072 = vmatmul.mubr.msk.f32.vlgmr.msra.gmra.mxu0 %vm5772_vm13, %v12516_v55  ;;  %8073 = vmatprep.subr.msk.mxu0 %vm5776_vm12, %v5941_v60  ;;  %v9551_v60 = vld [vmem:[%s13192_s4 + $0x15c] ss:$28 sps:$4 sm:$0xff]  }
0x16cb   :  { %8074 = vmatpush1.msk.msra.mxu0 %vm5776_vm12, %v5940_v51  ;;  %6116 = vmatprep.mubr.f32.mxu0 %v13499_v8  ;;  %v9506_v8 = vld [vmem:[%s13192_s4 + $0x49c] ss:$28 sps:$4 sm:$0xff]   ;;  %v9554_v51 = vld [vmem:[%s13192_s4 + $0x4a4] ss:$28 sps:$4 sm:$0xff]  }
0x16cc   :  { %6082 = vmatprep.subr.mxu0 %v5937_v47  ;;  %v9549_v47 = vld [vmem:[%s13192_s4 + $0x158] ss:$28 sps:$4 sm:$0xff]  }
0x16cd   :  { %6083 = vmatpush1.msra.mxu0 %v5936_v62  ;;  %v9552_v62 = vld [vmem:[%s13192_s4 + $0x4a0] ss:$28 sps:$4 sm:$0xff]  }
0x16ce   :  { %8075 = vmatmul.mubr.msk.f32.vlgmr.msra.gmra.mxu0 %vm5772_vm13, %v12516_v55  ;;  %7311 = vmatprep.subr.bf16.mxu0 %v9494_v56  ;;  %v9525_v55 = vld [vmem:[%s13192_s4 + $0x1f8] ss:$28 sps:$4 sm:$0xff]   ;;  %v9557_v56 = vld [vmem:[%s13192_s4 + $0x124] ss:$28 sps:$4 sm:$0xff]  }
0x16cf   :  { %7312 = vmatpush1.bf16.msra.mxu0 %v9492_v29  ;;  %7299 = vmatpush2.bf16.msra.mxu1 %v9525_v55  ;;  %v9560_v29 = vld [vmem:[%s13192_s4 + $0x46c] ss:$28 sps:$4 sm:$0xff]   ;;  %v9581_v55 = vld [vmem:[%s13192_s4 + $0x44] ss:$28 sps:$4 sm:$0xff]  }
0x16d0   :  { %7313 = vmatprep.subr.bf16.mxu0 %v9500_v59  ;;  %7300 = vmatprep.subr.bf16.mxu1 %v9533_v49  ;;  %v9555_v59 = vld [vmem:[%s13192_s4 + $0x120] ss:$28 sps:$4 sm:$0xff]  }
0x16d1   :  { %v9579_v49 = vld [vmem:[%s13192_s4 + $0x40] ss:$28 sps:$4 sm:$0xff]  }
0x16d3   :  { %7314 = vmatpush1.bf16.msra.mxu0 %v9498_v32  ;;  %7301 = vmatpush2.bf16.msra.mxu1 %v9531_v53  ;;  %v9558_v32 = vld [vmem:[%s13192_s4 + $0x468] ss:$28 sps:$4 sm:$0xff]  }
0x16d4   :  { %7315 = vmatprep.subr.bf16.mxu0 %v9506_v8  ;;  %7393 = vmatprep.subr.bf16.mxu1 %v9542_v9  ;;  %v9563_v8 = vld [vmem:[%s13192_s4 + $0xec] ss:$28 sps:$4 sm:$0xff]  }
0x16d5   :  { %v9587_v53 = vld [vmem:[%s13192_s4 + $0xc] ss:$28 sps:$4 sm:$0xff]  }
0x16d6   :  { %v9588_v9 = vld [vmem:[%s13192_s4 + $0x548] ss:$28 sps:$4 sm:$0xff]  }
0x16d7   :  { %7316 = vmatpush1.bf16.msra.mxu0 %v9504_v3  ;;  %v9566_v3 = vld [vmem:[%s13192_s4 + $0x434] ss:$28 sps:$4 sm:$0xff]  }
0x16d8   :  { %7317 = vmatprep.subr.bf16.mxu0 %v9512_v22  ;;  %v9561_v22 = vld [vmem:[%s13192_s4 + $0xe8] ss:$28 sps:$4 sm:$0xff]  }
0x16db   :  { %7318 = vmatpush1.bf16.msra.mxu0 %v9510_v5  ;;  %v9564_v5 = vld [vmem:[%s13192_s4 + $0x430] ss:$28 sps:$4 sm:$0xff]  }
0x16dc   :  { %7319 = vmatprep.subr.bf16.mxu0 %v9518_v21  ;;  %v9569_v21 = vld [vmem:[%s13192_s4 + $0xb4] ss:$28 sps:$4 sm:$0xff]  }
0x16df   :  { %7320 = vmatpush1.bf16.msra.mxu0 %v9516_v20  ;;  %v9572_v20 = vld [vmem:[%s13192_s4 + $0x3fc] ss:$28 sps:$4 sm:$0xff]  }
0x16e0   :  { %7321 = vmatprep.subr.bf16.mxu0 %v9524_v4  ;;  %v9570_v4 = vld [vmem:[%s13192_s4 + $0x3f8] ss:$28 sps:$4 sm:$0xff]  }
0x16e3   :  { %7322 = vmatpush1.bf16.msra.mxu0 %v9522_v50  ;;  %v9578_v50 = vld [vmem:[%s13192_s4 + $0x3c4] ss:$28 sps:$4 sm:$0xff]  }
0x16e4   :  { %7323 = vmatprep.subr.bf16.mxu0 %v9530_v35  ;;  %v9576_v35 = vld [vmem:[%s13192_s4 + $0x3c0] ss:$28 sps:$4 sm:$0xff]  }
0x16e7   :  { %7324 = vmatpush1.bf16.msra.mxu0 %v9528_v43  ;;  %v9584_v43 = vld [vmem:[%s13192_s4 + $0x38c] ss:$28 sps:$4 sm:$0xff]  }
0x16e8   :  { %7325 = vmatprep.subr.bf16.mxu0 %v9536_v1  ;;  %v9582_v1 = vld [vmem:[%s13192_s4 + $0x388] ss:$28 sps:$4 sm:$0xff]  }
0x16eb   :  { %7326 = vmatpush1.bf16.msra.mxu0 %v9534_v30  ;;  %v9590_v30 = vld [vmem:[%s13192_s4 + $0x54c] ss:$28 sps:$4 sm:$0xff]  }
0x16ec   :  { %7341 = vmatprep.subr.bf16.mxu0 %v9539_v27  ;;  %v9585_v27 = vld [vmem:[%s13192_s4 + $0x8] ss:$28 sps:$4 sm:$0xff]  }
0x16ef   :  { %7342 = vmatpush2.bf16.msra.mxu0 %v9537_v48  ;;  %v9593_v48 = vld [vmem:[%s13192_s4 + $0x354] ss:$28 sps:$4 sm:$0xff]  }
0x16f0   :  { %7352 = vmatprep.subr.bf16.mxu0 %v9545_v52  ;;  %v9596_v52 = vld [vmem:[%s13192_s4 + $0x19c] ss:$28 sps:$4 sm:$0xff]  }
0x1786   :  { %v5930_v38 = vpop.f32.mrf.mxu0 }
0x1787   :  { %v5931_v16 = vadd.f32 %v8064_v31, %v5930_v38  ;;  %v9591_v31 = vld [vmem:[%s13192_s4 + $0x350] ss:$28 sps:$4 sm:$0xff]   ;;  %v9599_v38 = vld [vmem:[%s13192_s4 + $0x31c] ss:$28 sps:$4 sm:$0xff]  }
0x1788   :  { %v9460_v28 = vpop.f32.mrf.mxu0 }
0x1789   :  { %7656 = vst.msk [vmem:[%s13190_s5 + $0x10] sm:$0x3] %vm7655_vm15, %v5931_v16  ;;  %v9602_v16 = vld [vmem:[%s13192_s4 + $0x164] ss:$28 sps:$4 sm:$0xff]  }
0x178a   :  { %v6047_v42 = vpop.f32.mrf.mxu0  ;;  %v9600_v28 = vld [vmem:[%s13192_s4 + $0x160] ss:$28 sps:$4 sm:$0xff]  }
0x178b   :  { %v6048_v36 = vadd.f32 %v6047_v42, %v5952_v17  ;;  %v9597_v17 = vld [vmem:[%s13192_s4 + $0x318] ss:$28 sps:$4 sm:$0xff]   ;;  %v9608_v42 = vld [vmem:[%s13192_s4 + $0x12c] ss:$28 sps:$4 sm:$0xff]  }
0x178c   :  { %v6049_v39 = vpop.f32.mrf.mxu0 }
0x178d   :  { %v6050_v24 = vadd.f32 %v6049_v39, %v5956_v41  ;;  %v6123_v10 = vmax.f32 %v6048_v36, 0.0  ;;  %v9605_v41 = vld [vmem:[%s13192_s4 + $0x2e4] ss:$28 sps:$4 sm:$0xff]   ;;  %v9611_v39 = vld [vmem:[%s13192_s4 + $0x2ac] ss:$28 sps:$4 sm:$0xff]  }
0x178e   :  { %v6118_v58 = vpop.f32.mrf.mxu0  ;;  %v9603_v36 = vld [vmem:[%s13192_s4 + $0x2e0] ss:$28 sps:$4 sm:$0xff]  }
0x178f   :  { %v6124_v11 = vmax.f32 %v6050_v24, 0.0  ;;  %v6119_v18 = vadd.f32 %v6118_v58, %v5960_v13  ;;  %v12760_v2 = vpack.c.bf16 %v6123_v10, %v6123_v10  ;;  %v9606_v13 = vld [vmem:[%s13192_s4 + $0x128] ss:$28 sps:$4 sm:$0xff]   ;;  %v9614_v24 = vld [vmem:[%s13192_s4 + $0xf4] ss:$28 sps:$4 sm:$0xff]  }
0x1790   :  { %v6120_v0 = vpop.f32.mrf.mxu0  ;;  %v9612_v10 = vld [vmem:[%s13192_s4 + $0xf0] ss:$28 sps:$4 sm:$0xff]  }
0x1791   :  { %v12755_v45 = vpack.c.bf16 %v6124_v11, %v6124_v11  ;;  %v6121_v46 = vadd.f32 %v6120_v0, %v5964_v25  ;;  %v6125_v34 = vmax.f32 %v6119_v18, 0.0  ;;  %v9609_v25 = vld [vmem:[%s13192_s4 + $0x2a8] ss:$28 sps:$4 sm:$0xff]   ;;  %v9617_v58 = vld [vmem:[%s13192_s4 + $0x274] ss:$28 sps:$4 sm:$0xff]  }
0x1792   :  { %v9620_v11 = vld [vmem:[%s13192_s4 + $0xbc] ss:$28 sps:$4 sm:$0xff]   ;;  %v9615_v18 = vld [vmem:[%s13192_s4 + $0x270] ss:$28 sps:$4 sm:$0xff]  }
0x1793   :  { %v6126_v61 = vmax.f32 %v6121_v46, 0.0  ;;  %7302 = vmatprep.mubr.bf16.mxu1 %v12755_v45  ;;  %v12775_v37 = vpack.c.bf16 %v6125_v34, %v6125_v34  ;;  %v9618_v0 = vld [vmem:[%s13192_s4 + $0xb8] ss:$28 sps:$4 sm:$0xff]  }
0x1794   :  { %7303 = vmatmul.mubr.bf16.vlgmr.msra.gmra.mxu1 %v12760_v2  ;;  %v9623_v46 = vld [vmem:[%s13192_s4 + $0x23c] ss:$28 sps:$4 sm:$0xff]  }
0x1795   :  { %v12767_v6 = vpack.c.bf16 %v6126_v61, %v6126_v61  ;;  %7394 = vmatpush1.bf16.msra.mxu1 %v9540_v23  ;;  %v9626_v23 = vld [vmem:[%s13192_s4 + $0x84] ss:$28 sps:$4 sm:$0xff]   ;;  %v9621_v34 = vld [vmem:[%s13192_s4 + $0x238] ss:$28 sps:$4 sm:$0xff]  }
0x1796   :  { %7395 = vmatprep.subr.bf16.mxu1 %v9548_v44  ;;  %v9624_v44 = vld [vmem:[%s13192_s4 + $0x80] ss:$28 sps:$4 sm:$0xff]  }
0x1797   :  { %8251 = vmatprep.mubr.msk.bf16.mxu0 %vm1402_vm5, %v12767_v6  ;;  %8252 = vmatprep.mubr.msk.bf16.mxu1 %vm1402_vm5, %v12767_v6  ;;  %v9629_v61 = vld [vmem:[%s13192_s4 + $0x204] ss:$28 sps:$4 sm:$0xff]  }
0x1798   :  { %7344 = vmatmul.mubr.bf16.vlgmr.msra.gmra.mxu0 %v12775_v37 }
0x1799   :  { %7353 = vmatpush1.bf16.msra.mxu0 %v9543_v19  ;;  %7396 = vmatpush1.bf16.msra.mxu1 %v9546_v33  ;;  %v9632_v19 = vld [vmem:[%s13192_s4 + $0x4c] ss:$28 sps:$4 sm:$0xff]   ;;  %v9627_v33 = vld [vmem:[%s13192_s4 + $0x200] ss:$28 sps:$4 sm:$0xff]  }
0x179a   :  { %7384 = vmatprep.mubr.bf16.mxu0 %v12755_v45  ;;  %7354 = vmatprep.subr.bf16.mxu0 %v9551_v60  ;;  %v9630_v60 = vld [vmem:[%s13192_s4 + $0x48] ss:$28 sps:$4 sm:$0xff]  }
0x179b   :  { %7397 = vmatprep.subr.bf16.mxu1 %v9554_v51  ;;  %v9635_v51 = vld [vmem:[%s13192_s4 + $0x1cc] ss:$28 sps:$4 sm:$0xff]  }
0x179d   :  { %7355 = vmatpush1.bf16.msra.mxu0 %v9549_v47  ;;  %7398 = vmatpush1.bf16.msra.mxu1 %v9552_v62  ;;  %v9638_v47 = vld [vmem:[%s13192_s4 + $0x14] ss:$28 sps:$4 sm:$0xff]   ;;  %v9633_v62 = vld [vmem:[%s13192_s4 + $0x1c8] ss:$28 sps:$4 sm:$0xff]  }
0x179e   :  { %7356 = vmatprep.subr.bf16.mxu0 %v9557_v56  ;;  %7399 = vmatprep.subr.bf16.mxu1 %v9560_v29  ;;  %v9636_v56 = vld [vmem:[%s13192_s4 + $0x10] ss:$28 sps:$4 sm:$0xff]   ;;  %v9641_v29 = vld [vmem:[%s13192_s4 + $0x35c] ss:$28 sps:$4 sm:$0xff]  }
0x17a1   :  { %7357 = vmatpush1.bf16.msra.mxu0 %v9555_v59  ;;  %7400 = vmatpush1.bf16.msra.mxu1 %v9558_v32  ;;  %v9644_v59 = vld [vmem:[%s13192_s4 + $0x51c] ss:$28 sps:$4 sm:$0xff]  }
0x17a2   :  { %7358 = vmatprep.subr.bf16.mxu0 %v9563_v8  ;;  %7401 = vmatprep.subr.bf16.mxu1 %v9566_v3  ;;  %v9639_v32 = vld [vmem:[%s13192_s4 + $0x358] ss:$28 sps:$4 sm:$0xff]   ;;  %v9647_v3 = vld [vmem:[%s13192_s4 + $0x324] ss:$28 sps:$4 sm:$0xff]  }
0x17a3   :  { %v9642_v8 = vld [vmem:[%s13192_s4 + $0x518] ss:$28 sps:$4 sm:$0xff]  }
0x17a5   :  { %7359 = vmatpush1.bf16.msra.mxu0 %v9561_v22  ;;  %7402 = vmatpush1.bf16.msra.mxu1 %v9564_v5  ;;  %v9650_v22 = vld [vmem:[%s13192_s4 + $0x4e4] ss:$28 sps:$4 sm:$0xff]  }
0x17a6   :  { %7360 = vmatprep.subr.bf16.mxu0 %v9569_v21  ;;  %7403 = vmatprep.subr.bf16.mxu1 %v9572_v20  ;;  %v9645_v5 = vld [vmem:[%s13192_s4 + $0x320] ss:$28 sps:$4 sm:$0xff]   ;;  %v9653_v20 = vld [vmem:[%s13192_s4 + $0x2ec] ss:$28 sps:$4 sm:$0xff]  }
0x17a7   :  { %v9648_v21 = vld [vmem:[%s13192_s4 + $0x4e0] ss:$28 sps:$4 sm:$0xff]  }
0x17a9   :  { %7361 = vmatpush1.bf16.msra.mxu0 %v9567_v57  ;;  %7404 = vmatpush1.bf16.msra.mxu1 %v9570_v4  ;;  %v9656_v57 = vld [vmem:[%s13192_s4 + $0x4ac] ss:$28 sps:$4 sm:$0xff]  }
0x17aa   :  { %7362 = vmatprep.subr.bf16.mxu0 %v9575_v12  ;;  %7405 = vmatprep.subr.bf16.mxu1 %v9578_v50  ;;  %v9651_v4 = vld [vmem:[%s13192_s4 + $0x2e8] ss:$28 sps:$4 sm:$0xff]   ;;  %v9659_v50 = vld [vmem:[%s13192_s4 + $0x2b4] ss:$28 sps:$4 sm:$0xff]  }
0x17ab   :  { %v9654_v12 = vld [vmem:[%s13192_s4 + $0x4a8] ss:$28 sps:$4 sm:$0xff]  }
0x17ad   :  { %7363 = vmatpush1.bf16.msra.mxu0 %v9573_v15  ;;  %7406 = vmatpush1.bf16.msra.mxu1 %v9576_v35  ;;  %v9662_v15 = vld [vmem:[%s13192_s4 + $0x474] ss:$28 sps:$4 sm:$0xff]  }
0x17ae   :  { %7364 = vmatprep.subr.bf16.mxu0 %v9581_v55  ;;  %7407 = vmatprep.subr.bf16.mxu1 %v9584_v43  ;;  %v9657_v35 = vld [vmem:[%s13192_s4 + $0x2b0] ss:$28 sps:$4 sm:$0xff]   ;;  %v9665_v43 = vld [vmem:[%s13192_s4 + $0x27c] ss:$28 sps:$4 sm:$0xff]  }
0x17af   :  { %v9660_v55 = vld [vmem:[%s13192_s4 + $0x470] ss:$28 sps:$4 sm:$0xff]  }
0x17b1   :  { %7365 = vmatpush1.bf16.msra.mxu0 %v9579_v49  ;;  %7408 = vmatpush1.bf16.msra.mxu1 %v9582_v1  ;;  %v9668_v49 = vld [vmem:[%s13192_s4 + $0x43c] ss:$28 sps:$4 sm:$0xff]  }
0x17b2   :  { %7366 = vmatprep.subr.bf16.mxu0 %v9587_v53  ;;  %7423 = vmatprep.subr.bf16.mxu1 %v9590_v30  ;;  %v9663_v1 = vld [vmem:[%s13192_s4 + $0x278] ss:$28 sps:$4 sm:$0xff]   ;;  %v9671_v30 = vld [vmem:[%s13192_s4 + $0x244] ss:$28 sps:$4 sm:$0xff]  }
0x17b3   :  { %v9666_v53 = vld [vmem:[%s13192_s4 + $0x438] ss:$28 sps:$4 sm:$0xff]  }
0x17b5   :  { %7367 = vmatpush1.bf16.msra.mxu0 %v9585_v27  ;;  %7424 = vmatpush2.bf16.msra.mxu1 %v9588_v9  ;;  %v9674_v27 = vld [vmem:[%s13192_s4 + $0x404] ss:$28 sps:$4 sm:$0xff]  }
0x17b6   :  { %7368 = vmatprep.subr.bf16.mxu0 %v9593_v48  ;;  %7434 = vmatprep.subr.bf16.mxu1 %v9596_v52  ;;  %v9669_v9 = vld [vmem:[%s13192_s4 + $0x240] ss:$28 sps:$4 sm:$0xff]   ;;  %v9677_v52 = vld [vmem:[%s13192_s4 + $0x20c] ss:$28 sps:$4 sm:$0xff]  }
0x17b7   :  { %v9672_v48 = vld [vmem:[%s13192_s4 + $0x400] ss:$28 sps:$4 sm:$0xff]  }
0x17b8   :  { %7426 = vmatmul.mubr.bf16.vlgmr.msra.gmra.mxu1 %v12775_v37 }
0x17b9   :  { %7369 = vmatpush2.bf16.msra.mxu0 %v9591_v31  ;;  %7435 = vmatpush1.bf16.msra.mxu1 %v9594_v26  ;;  %v9680_v31 = vld [vmem:[%s13192_s4 + $0x3cc] ss:$28 sps:$4 sm:$0xff]  }
0x17ba   :  { %7466 = vmatprep.mubr.bf16.mxu1 %v12755_v45  ;;  %7370 = vmatprep.subr.bf16.mxu0 %v9599_v38  ;;  %v9675_v26 = vld [vmem:[%s13192_s4 + $0x208] ss:$28 sps:$4 sm:$0xff]  }
0x17bb   :  { %7436 = vmatprep.subr.bf16.mxu1 %v9602_v16  ;;  %v9678_v38 = vld [vmem:[%s13192_s4 + $0x3c8] ss:$28 sps:$4 sm:$0xff]   ;;  %v9683_v16 = vld [vmem:[%s13192_s4 + $0x1d4] ss:$28 sps:$4 sm:$0xff]  }
0x17bd   :  { %7371 = vmatpush2.bf16.msra.mxu0 %v9597_v17  ;;  %7437 = vmatpush1.bf16.msra.mxu1 %v9600_v28  ;;  %v9686_v17 = vld [vmem:[%s13192_s4 + $0x394] ss:$28 sps:$4 sm:$0xff]  }
0x17be   :  { %7372 = vmatprep.subr.bf16.mxu0 %v9605_v41  ;;  %7438 = vmatprep.subr.bf16.mxu1 %v9608_v42  ;;  %v9681_v28 = vld [vmem:[%s13192_s4 + $0x1d0] ss:$28 sps:$4 sm:$0xff]  }
0x17bf   :  { %v9684_v41 = vld [vmem:[%s13192_s4 + $0x390] ss:$28 sps:$4 sm:$0xff]  }
0x17c0   :  { %v9689_v42 = vld [vmem:[%s13192_s4 + $0x554] ss:$28 sps:$4 sm:$0xff]  }
0x17c1   :  { %7373 = vmatpush2.bf16.msra.mxu0 %v9603_v36  ;;  %7439 = vmatpush1.bf16.msra.mxu1 %v9606_v13  ;;  %v9687_v36 = vld [vmem:[%s13192_s4 + $0x550] ss:$28 sps:$4 sm:$0xff]   ;;  %v9690_v13 = vld [vmem:[%s13192_s4 + $0x520] ss:$28 sps:$4 sm:$0xff]  }
0x17c2   :  { %7374 = vmatprep.subr.bf16.mxu0 %v9611_v39  ;;  %7440 = vmatprep.subr.bf16.mxu1 %v9614_v24  ;;  %v9849_v39 = vmov 0   ;;  %v9691_v24 = vld [vmem:[%s13192_s4 + $0x360] ss:$28 sps:$4 sm:$0xff]  }
0x17c5   :  { %7375 = vmatpush2.bf16.msra.mxu0 %v9609_v25  ;;  %7441 = vmatpush1.bf16.msra.mxu1 %v9612_v10  ;;  %v9692_v25 = vld [vmem:[%s13192_s4 + $0x1a0] ss:$28 sps:$4 sm:$0xff]   ;;  %v9693_v10 = vld [vmem:[%s13192_s4 + $0x4e8] ss:$28 sps:$4 sm:$0xff]  }
0x17c6   :  { %7376 = vmatprep.subr.bf16.mxu0 %v9617_v58  ;;  %7442 = vmatprep.subr.bf16.mxu1 %v9620_v11  ;;  %v9694_v58 = vld [vmem:[%s13192_s4 + $0x328] ss:$28 sps:$4 sm:$0xff]  }
0x17c7   :  { %v9695_v11 = vld [vmem:[%s13192_s4 + $0x168] ss:$28 sps:$4 sm:$0xff]  }
0x17c9   :  { %7377 = vmatpush2.bf16.msra.mxu0 %v9615_v18  ;;  %7443 = vmatpush1.bf16.msra.mxu1 %v9618_v0  ;;  %v9697_v18 = vld [vmem:[%s13192_s4 + $0x2f0] ss:$28 sps:$4 sm:$0xff]   ;;  %v9699_v0 = vld [vmem:[%s13192_s4 + $0x478] ss:$28 sps:$4 sm:$0xff]  }
0x17ca   :  { %7378 = vmatprep.subr.bf16.mxu0 %v9623_v46  ;;  %7444 = vmatprep.subr.bf16.mxu1 %v9626_v23  ;;  %v9700_v46 = vld [vmem:[%s13192_s4 + $0x2b8] ss:$28 sps:$4 sm:$0xff]  }
0x17cb   :  { %v9701_v23 = vld [vmem:[%s13192_s4 + $0xf8] ss:$28 sps:$4 sm:$0xff]  }
0x17cd   :  { %7379 = vmatpush2.bf16.msra.mxu0 %v9621_v34  ;;  %7445 = vmatpush1.bf16.msra.mxu1 %v9624_v44  ;;  %v9702_v34 = vld [vmem:[%s13192_s4 + $0x440] ss:$28 sps:$4 sm:$0xff]  }
0x17ce   :  { %7380 = vmatprep.subr.bf16.mxu0 %v9629_v61  ;;  %7446 = vmatprep.subr.bf16.mxu1 %v9632_v19  ;;  %v9703_v44 = vld [vmem:[%s13192_s4 + $0x280] ss:$28 sps:$4 sm:$0xff]   ;;  %v9705_v19 = vld [vmem:[%s13192_s4 + $0x408] ss:$28 sps:$4 sm:$0xff]  }
0x17cf   :  { %v9704_v61 = vld [vmem:[%s13192_s4 + $0xc0] ss:$28 sps:$4 sm:$0xff]  }
0x17d1   :  { %7381 = vmatpush2.bf16.msra.mxu0 %v9627_v33  ;;  %7447 = vmatpush1.bf16.msra.mxu1 %v9630_v60  ;;  %v9706_v33 = vld [vmem:[%s13192_s4 + $0x248] ss:$28 sps:$4 sm:$0xff]  }
0x17d2   :  { %7382 = vmatprep.subr.bf16.mxu0 %v9635_v51  ;;  %7448 = vmatprep.subr.bf16.mxu1 %v9638_v47  ;;  %v9707_v60 = vld [vmem:[%s13192_s4 + $0x88] ss:$28 sps:$4 sm:$0xff]   ;;  %v9708_v51 = vld [vmem:[%s13192_s4 + $0x3d0] ss:$28 sps:$4 sm:$0xff]  }
0x17d3   :  { %v9709_v47 = vld [vmem:[%s13192_s4 + $0x210] ss:$28 sps:$4 sm:$0xff]  }
0x17d5   :  { %7383 = vmatpush2.bf16.msra.mxu0 %v9633_v62  ;;  %7449 = vmatpush1.bf16.msra.mxu1 %v9636_v56  ;;  %v9710_v62 = vld [vmem:[%s13192_s4 + $0x50] ss:$28 sps:$4 sm:$0xff]   ;;  %v9711_v56 = vld [vmem:[%s13192_s4 + $0x398] ss:$28 sps:$4 sm:$0xff]  }
0x17d6   :  { %7450 = vmatprep.subr.bf16.mxu1 %v9641_v29  ;;  %7475 = vmatprep.subr.bf16.mxu0 %v9644_v59  ;;  %v9712_v29 = vld [vmem:[%s13192_s4 + $0x1d8] ss:$28 sps:$4 sm:$0xff]  }
0x17d7   :  { %v9713_v59 = vld [vmem:[%s13192_s4 + $0x18] ss:$28 sps:$4 sm:$0xff]  }
0x17d8   :  { %7385 = vmatmul.mubr.bf16.vlgmr.msra.gmra.mxu0 %v12760_v2 }
0x17d9   :  { %7451 = vmatpush2.bf16.msra.mxu1 %v9639_v32  ;;  %7476 = vmatpush1.bf16.msra.mxu0 %v9642_v8  ;;  %v9714_v32 = vld [vmem:[%s13192_s4 + $0x558] ss:$28 sps:$4 sm:$0xff]  }
0x17da   :  { %8253 = vmatprep.mubr.msk.bf16.mxu0 %vm1402_vm5, %v12767_v6  ;;  %7452 = vmatprep.subr.bf16.mxu1 %v9647_v3  ;;  %v8068_v8 = vld [vmem:[%s13191_s3 + $0xa8] ss:$8 sm:$0xf] }
0x17db   :  { %7477 = vmatprep.subr.bf16.mxu0 %v9650_v22  ;;  %v8069_v3 = vld [vmem:[%s13191_s3 + $0xa8] ss:$8 sm:$0x70] }
0x17dc   :  { %v13158_v22 = vor.u32 %v8069_v3, %v8068_v8 }
0x17dd   :  { %7453 = vmatpush2.bf16.msra.mxu1 %v9645_v5  ;;  %7478 = vmatpush1.bf16.msra.mxu0 %v9648_v21 }
0x17de   :  { %7454 = vmatprep.subr.bf16.mxu1 %v9653_v20  ;;  %7479 = vmatprep.subr.bf16.mxu0 %v9656_v57  ;;  %v6335_v5 = vrot.slane %v13158_v22, %v11487_v7 }
0x17e1   :  { %7455 = vmatpush2.bf16.msra.mxu1 %v9651_v4  ;;  %7480 = vmatpush1.bf16.msra.mxu0 %v9654_v12 }
0x17e2   :  { %7456 = vmatprep.subr.bf16.mxu1 %v9659_v50  ;;  %7481 = vmatprep.subr.bf16.mxu0 %v9662_v15 }
0x17e5   :  { %7457 = vmatpush2.bf16.msra.mxu1 %v9657_v35  ;;  %7482 = vmatpush1.bf16.msra.mxu0 %v9660_v55 }
0x17e6   :  { %7458 = vmatprep.subr.bf16.mxu1 %v9665_v43  ;;  %7483 = vmatprep.subr.bf16.mxu0 %v9668_v49 }
0x17e9   :  { %7459 = vmatpush2.bf16.msra.mxu1 %v9663_v1  ;;  %7484 = vmatpush1.bf16.msra.mxu0 %v9666_v53 }
0x17ea   :  { %7460 = vmatprep.subr.bf16.mxu1 %v9671_v30  ;;  %7485 = vmatprep.subr.bf16.mxu0 %v9674_v27 }
0x17ed   :  { %7461 = vmatpush2.bf16.msra.mxu1 %v9669_v9  ;;  %7486 = vmatpush1.bf16.msra.mxu0 %v9672_v48  ;;  %v6343_v48 = vrot.slane %v13158_v22, %v5959_v14 }
0x17ee   :  { %7462 = vmatprep.subr.bf16.mxu1 %v9677_v52  ;;  %7487 = vmatprep.subr.bf16.mxu0 %v9680_v31  ;;  %v6347_v52 = vrot.slane %v13158_v22, %v5963_v63 }
0x17f1   :  { %7463 = vmatpush2.bf16.msra.mxu1 %v9675_v26  ;;  %7488 = vmatpush1.bf16.msra.mxu0 %v9678_v38 }
0x17f2   :  { %7464 = vmatprep.subr.bf16.mxu1 %v9683_v16  ;;  %7489 = vmatprep.subr.bf16.mxu0 %v9686_v17 }
0x17f5   :  { %7465 = vmatpush2.bf16.msra.mxu1 %v9681_v28  ;;  %7490 = vmatpush1.bf16.msra.mxu0 %v9684_v41 }
0x17f6   :  { %7505 = vmatprep.subr.bf16.mxu0 %v9689_v42  ;;  %7556 = vmatprep.subr.bf16.mxu1 %v9849_v39 }
0x17f8   :  { %7467 = vmatmul.mubr.bf16.vlgmr.msra.gmra.mxu1 %v12760_v2 }
0x17f9   :  { %7506 = vmatpush2.bf16.msra.mxu0 %v9687_v36  ;;  %7557 = vmatpush1.bf16.msra.mxu1 %v9690_v13  ;;  %v9850_v36 = vmov 1983009808  }
0x17fa   :  { %8254 = vmatprep.mubr.msk.bf16.mxu1 %vm1402_vm5, %v12767_v6  ;;  %8612 = vmatprep.subr.bf16.mxu0 %v9691_v24  ;;  %v9696_v6 = vld [vmem:[%s13192_s4 + $0x4b0] ss:$28 sps:$4 sm:$0xff]   ;;  %v7613_v13 = vunpack.c.l.s4 %v9850_v36 }
0x17fb   :  { %7558 = vmatprep.subr.bf16.mxu1 %v9849_v39 }
0x17fc   :  { %7508 = vmatmul.mubr.bf16.vlgmr.msra.gmra.mxu0 %v12775_v37 }
0x17fd   :  { %8613 = vmatpush3.bf16.msra.mxu0 %v9692_v25  ;;  %7548 = vmatprep.mubr.bf16.mxu0 %v12755_v45  ;;  %v9698_v45 = vld [vmem:[%s13192_s4 + $0x130] ss:$28 sps:$4 sm:$0xff]  }
0x17fe   :  { %7559 = vmatpush1.bf16.msra.mxu1 %v9693_v10  ;;  %8614 = vmatprep.subr.bf16.mxu0 %v9694_v58 }
0x17ff   :  { %7560 = vmatprep.subr.bf16.mxu1 %v9849_v39 }
0x1801   :  { %8615 = vmatpush3.bf16.msra.mxu0 %v9695_v11 }
0x1802   :  { %7561 = vmatpush1.bf16.msra.mxu1 %v9696_v6  ;;  %8616 = vmatprep.subr.bf16.mxu0 %v9697_v18 }
0x1803   :  { %7562 = vmatprep.subr.bf16.mxu1 %v9849_v39 }
0x1805   :  { %8617 = vmatpush3.bf16.msra.mxu0 %v9698_v45 }
0x1806   :  { %7563 = vmatpush1.bf16.msra.mxu1 %v9699_v0  ;;  %8618 = vmatprep.subr.bf16.mxu0 %v9700_v46 }
0x1807   :  { %7564 = vmatprep.subr.bf16.mxu1 %v9849_v39 }
0x1809   :  { %8619 = vmatpush3.bf16.msra.mxu0 %v9701_v23 }
0x180a   :  { %7565 = vmatpush1.bf16.msra.mxu1 %v9702_v34  ;;  %8620 = vmatprep.subr.bf16.mxu0 %v9703_v44 }
0x180b   :  { %7566 = vmatprep.subr.bf16.mxu1 %v9849_v39 }
0x180d   :  { %8621 = vmatpush3.bf16.msra.mxu0 %v9704_v61  ;;  %v6354_v61 = vsub.s32 5, %v11484_v40 }
0x180e   :  { %7567 = vmatpush1.bf16.msra.mxu1 %v9705_v19  ;;  %8622 = vmatprep.subr.bf16.mxu0 %v9706_v33  ;;  %v6350_v19 = vsub.s32 4, %v11484_v40 }
0x180f   :  { %7568 = vmatprep.subr.bf16.mxu1 %v9849_v39  ;;  %v6355_v33 = vrot.slane %v13158_v22, %v6354_v61 }
0x1811   :  { %8623 = vmatpush3.bf16.msra.mxu0 %v9707_v60  ;;  %v6351_v60 = vrot.slane %v13158_v22, %v6350_v19 }
0x1812   :  { %7569 = vmatpush1.bf16.msra.mxu1 %v9708_v51  ;;  %8624 = vmatprep.subr.bf16.mxu0 %v9709_v47  ;;  %v6358_v47 = vsub.s32 6, %v11484_v40 }
0x1813   :  { %7570 = vmatprep.subr.bf16.mxu1 %v9849_v39 }
0x1814   :  { %v6359_v8 = vrot.slane %v13158_v22, %v6358_v47 }
0x1815   :  { %8625 = vmatpush3.bf16.msra.mxu0 %v9710_v62 }
0x1816   :  { %7571 = vmatpush1.bf16.msra.mxu1 %v9711_v56  ;;  %8626 = vmatprep.subr.bf16.mxu0 %v9712_v29 }
0x1817   :  { %7586 = vmatprep.subr.bf16.mxu1 %v9849_v39  ;;  %v7614_v39 = vunpack.c.0.s8 %v7613_v13 }
0x1819   :  { %8627 = vmatpush3.bf16.msra.mxu0 %v9713_v59  ;;  %v7617_v14 = vsub.s32 %v7614_v39, %v11484_v40 }
0x181a   :  { %7587 = vmatpush2.bf16.msra.mxu1 %v9714_v32 }
0x181c   :  { %7549 = vmatmul.mubr.bf16.vlgmr.msra.gmra.mxu0 %v12760_v2  ;;  %v6339_v2 = vrot.slane %v13158_v22, %v5955_v54 }
0x181d   :  { %7589 = vmatmul.mubr.bf16.vlgmr.msra.gmra.mxu1 %v12775_v37 }
0x1854   :  { %v7304_v21 = vpop.f32.mrf.mxu1 }
0x1855   :  { %v7305_v37 = vadd.f32 %v7304_v21, %v6335_v5 }
0x1856   :  { %v7306_v20 = vpop.f32.mrf.mxu1 }
0x1857   :  { %v7307_v12 = vadd.f32 %v7306_v20, %v6339_v2 }
0x1858   :  { %v7308_v57 = vpop.f32.mrf.mxu1  ;;  %v7345_v4 = vpop.f32.mrf.mxu0 }
0x1859   :  { %v7346_v50 = vadd.f32 %v7345_v4, %v7305_v37 }
0x185a   :  { %v7309_v15 = vpop.f32.mrf.mxu1  ;;  %v7347_v35 = vpop.f32.mrf.mxu0 }
0x185b   :  { %v7348_v55 = vadd.f32 %v7347_v35, %v7307_v12  ;;  %9795 = vtanh.f32 %v7346_v50 }
0x185c   :  { %v7349_v43 = vpop.f32.mrf.mxu0 }
0x185d   :  { %9797 = vtanh.f32 %v7348_v55 }
0x185e   :  { %v7350_v49 = vpop.f32.mrf.mxu0 }
0x1868   :  { %v9796_v1 = vpop.eup %9795 }
0x186a   :  { %v9798_v7 = vpop.eup %9797 }
0x186b   :  { %v7610_v53 = vcombine.low %v9796_v1, %v9798_v7 }
0x186d   :  { %v7618_v58 = vrot.slane %v7610_v53, %v7617_v14 }
0x1878   :  { %v7427_v30 = vpop.f32.mrf.mxu1 }
0x187a   :  { %v7429_v27 = vpop.f32.mrf.mxu1 }
0x187c   :  { %v7431_v9 = vpop.f32.mrf.mxu1 }
0x187e   :  { %v7432_v54 = vpop.f32.mrf.mxu1 }
0x1898   :  { %v7386_v31 = vpop.f32.mrf.mxu0 }
0x1899   :  { %v7387_v26 = vadd.f32 %v7386_v31, %v6343_v48 }
0x189a   :  { %v7388_v38 = vpop.f32.mrf.mxu0 }
0x189b   :  { %v7428_v16 = vadd.f32 %v7427_v30, %v7387_v26  ;;  %v7389_v17 = vadd.f32 %v7388_v38, %v6347_v52 }
0x189c   :  { %v7390_v28 = vpop.f32.mrf.mxu0 }
0x189d   :  { %v7430_v41 = vadd.f32 %v7429_v27, %v7389_v17  ;;  %9799 = vtanh.f32 %v7428_v16 }
0x189e   :  { %v7391_v42 = vpop.f32.mrf.mxu0 }
0x189f   :  { %9801 = vtanh.f32 %v7430_v41 }
0x18aa   :  { %v9800_v24 = vpop.eup %9799 }
0x18ac   :  { %v9802_v25 = vpop.eup %9801 }
0x18ad   :  { %v7611_v10 = vcombine.low %v9800_v24, %v9802_v25 }
0x18af   :  { %v7625_v63 = vrot.slane %v7611_v10, %v7617_v14 }
0x18b1   :  { %v7626_v11 = vcombine.low %v7618_v58, %v7625_v63 }
0x18b3   :  { %7645 = vst [vmem:[%s13190_s5] sm:$0xff] %v7626_v11 }
0x18b8   :  { %v7468_v6 = vpop.f32.mrf.mxu1 }
0x18b9   :  { %v7469_v62 = vadd.f32 %v7468_v6, %v6351_v60 }
0x18ba   :  { %v7470_v18 = vpop.f32.mrf.mxu1 }
0x18bb   :  { %v7471_v51 = vadd.f32 %v7470_v18, %v6355_v33 }
0x18bc   :  { %v7472_v45 = vpop.f32.mrf.mxu1  ;;  %v7509_v0 = vpop.f32.mrf.mxu0 }
0x18bd   :  { %v7510_v59 = vadd.f32 %v7509_v0, %v7469_v62 }
0x18be   :  { %v7473_v46 = vpop.f32.mrf.mxu1  ;;  %v7511_v23 = vpop.f32.mrf.mxu0 }
0x18bf   :  { %v7512_v56 = vadd.f32 %v7511_v23, %v7471_v51 }
0x18c0   :  { %v7513_v34 = vpop.f32.mrf.mxu0 }
0x18c1   :  { %9803 = vtanh.f32 %v7512_v56 }
0x18c2   :  { %v7514_v44 = vpop.f32.mrf.mxu0  ;;  %9805 = vtanh.f32 %v7510_v59 }
0x18ce   :  { %v9804_v40 = vpop.eup %9803 }
0x18cf   :  { %v9806_v50 = vpop.eup %9805 }
0x18d0   :  { %v7627_v15 = vcombine.low %v9806_v50, %v9804_v40 }
0x18d2   :  { %v7634_v35 = vrot.slane %v7627_v15, %v7617_v14 }
0x18dc   :  { %v8628_v29 = vpop.f32.mrf.mxu0 }
0x18dd   :  { %v7590_v32 = vpop.f32.mrf.mxu1 }
0x18de   :  { %v8629_v3 = vpop.f32.mrf.mxu0 }
0x18df   :  { %v8630_v5 = vadd.f32 %v8629_v3, %v8628_v29  ;;  %v7592_v21 = vpop.f32.mrf.mxu1 }
0x18e0   :  { %v8631_v2 = vpop.f32.mrf.mxu0 }
0x18e1   :  { %v7551_v20 = vadd.f32 %v8630_v5, %v6359_v8  ;;  %v7593_v37 = vpop.f32.mrf.mxu1 }
0x18e2   :  { %v8632_v57 = vpop.f32.mrf.mxu0 }
0x18e3   :  { %v7591_v4 = vadd.f32 %v7590_v32, %v7551_v20  ;;  %v7594_v12 = vpop.f32.mrf.mxu1 }
0x18e5   :  { %9807 = vtanh.f32 %v7591_v4 }
0x18f2   :  { %v9808_v22 = vpop.eup %9807 }
0x18f3   :  { %v7641_v55 = vrot.slane %v9808_v22, %v7617_v14 }
0x18f5   :  { %v7642_v43 = vcombine.low %v7634_v35, %v7641_v55 }
0x18f7   :  { %7650 = vst.msk [vmem:[%s13190_s5 + $0x8] sm:$0x3f] %vm7649_vm3, %v7642_v43 }

</bundles_post_ra>
